<compile_context>
chip_gen: v6e
topology: v6e:2x2x1
jax: 0.10.0
libtpu: 0.0.40
codegen_flags: <defaults>
</compile_context>

<pallas_src>
import jax
import jax.numpy as jnp
from jax.experimental import pallas as pl
from jax.experimental.pallas import tpu as pltpu


def _make_logits_kernel(W, NHW):
    """NHW = (batch elements in this block) * H * W; W = spatial width."""

    def kernel(p1_ref, xid_ref, mask_ref, pool_ref, w1_ref, b1_ref,
               w2_ref, b2_ref, wl_ref, bl_ref, o_ref):
        # p1_ref  : (NHW, 9C)  im2col patches of padded input (conv1)
        # xid_ref : (NHW, C)   identity branch (block input), flattened
        # mask_ref: (NHW, 9C)  precomputed 0/1 border mask for the conv2 taps
        # pool_ref: (N, NHW)   block-diagonal pooling matrix (carries 1/HW)
        # w1_ref  : (9C, C)    conv1 weights, BN1-folded, pre-flattened
        # b1_ref  : (1, C)     conv1 folded bias
        # w2_ref  : (9C, C)    conv2 weights, BN2-folded, pre-flattened
        # b2_ref  : (1, C)     conv2 folded bias
        # wl_ref  : (C, NCP)   linear head weight, transposed + lane-padded
        # bl_ref  : (1, NCP)   linear head bias, lane-padded
        # o_ref   : (N, NCP)   logits for the whole batch

        # ---- conv1 + folded BN1 + ReLU: ONE im2col MXU matmul, K = 9*Cin ----
        h1 = jnp.dot(p1_ref[...], w1_ref[...],
                     preferred_element_type=jnp.float32)
        h1 = jnp.maximum(h1 + b1_ref[...], 0.0)                 # (NHW, C)

        # ---- conv2 taps: 9 flat rolls (XLU), concatenated along lanes ----
        taps = []
        for t in range(9):
            dy, dx = t // 3 - 1, t % 3 - 1
            if dy == 0 and dx == 0:
                taps.append(h1)                                  # center tap
            else:
                off = dy * W + dx          # flat shift (valid away from borders)
                # tap[p] = h1[p + off]  <=>  roll(h1, -off)
                taps.append(pltpu.roll(h1, (-off) % NHW, axis=0))
        # Lane-dense tap matrix; a single precomputed multiplicative mask
        # zeroes every tap that crosses a spatial (or batch-element) border.
        tap_mat = jnp.concatenate(taps, axis=-1) * mask_ref[...]  # (NHW, 9C)

        # ---- conv2 + folded BN2: ONE MXU matmul, K = 9*C ----
        h2 = jnp.dot(tap_mat, w2_ref[...],
                     preferred_element_type=jnp.float32)
        # residual add + final ReLU of the BasicBlock
        h2 = jnp.maximum(h2 + b2_ref[...] + xid_ref[...], 0.0)   # (NHW, C)

        # ---- global average pool (1/HW folded into pool_ref) + linear ----
        pooled = jnp.dot(pool_ref[...], h2,
                         preferred_element_type=jnp.float32)     # (N, C)
        logits = jnp.dot(pooled, wl_ref[...],
                         preferred_element_type=jnp.float32) + bl_ref[...]
        o_ref[...] = logits.astype(o_ref.dtype)                  # (N, NCP)

    return kernel


def _fold_bn(w, gamma, beta, mean, var, eps=1e-5):
    """Fold an eval-mode BatchNorm into the preceding conv (HWIO weights)."""
    scale = gamma * jax.lax.rsqrt(var + eps)
    return w * scale[None, None, None, :], beta - mean * scale


def logits_forward(x_nchw, w1, bn1, w2, bn2, w_lin, b_lin):
    """LogitsModel forward: BasicBlock -> global avg pool -> flatten -> linear.

    x_nchw : (N, C, H, W) float32 (PyTorch NCHW layout)
    w1, w2 : (3, 3, C, C) HWIO conv weights
    bn1/bn2: (gamma, beta, running_mean, running_var), each (C,)
    w_lin  : (NC, C) PyTorch Linear weight ; b_lin : (NC,)
    returns: (N, NC) logits
    """
    # TODO(synk): general conv_layers suffixes (multiple residual stages,
    # strided/downsample shortcuts) are not implemented; only a single
    # stride-1 identity BasicBlock is modeled here.
    N, C, H, W = x_nchw.shape
    NC = w_lin.shape[0]
    HW = H * W
    NHW = N * HW
    K1 = 9 * C
    NCP = ((NC + 127) // 128) * 128          # lane-padded class count

    # --- eval-mode BN fold + weight layout plumbing (plain JAX glue) ---
    w1f, b1f = _fold_bn(w1, *bn1)
    w2f, b2f = _fold_bn(w2, *bn2)
    w1_flat = w1f.reshape(K1, C)             # (9*Cin, C)
    w2_flat = w2f.reshape(K1, C)             # (9*C, C), same tap order as kernel
    b1_2d = b1f.reshape(1, C)
    b2_2d = b2f.reshape(1, C)
    wl = jnp.zeros((C, NCP), jnp.float32).at[:, :NC].set(jnp.transpose(w_lin))
    bl = jnp.zeros((1, NCP), jnp.float32).at[0, :NC].set(b_lin)

    # --- NCHW -> NHWC, flatten batch+space, im2col patches for conv1 ---
    x_nhwc = jnp.transpose(x_nchw, (0, 2, 3, 1))
    x_flat = x_nhwc.reshape(NHW, C)                               # identity branch
    xp = jnp.pad(x_nhwc, ((0, 0), (1, 1), (1, 1), (0, 0)))
    cols = [xp[:, ky:ky + H, kx:kx + W, :]
            for ky in range(3) for kx in range(3)]
    patches1 = jnp.concatenate(cols, axis=-1).reshape(NHW, K1)
    # TODO(synk): at real ResNet-stage sizes (e.g. HW=56*56, C=256) this single
    # (N*HW, 9C) block does not fit v7x's 64 MiB VMEM; tile over row strips
    # (and set vmem_limit_bytes) or build conv1's taps in-kernel with the same
    # roll trick instead of wrapper-side im2col.

    # --- precomputed 0/1 border mask for the 9 conv2 taps ---
    # (periodic per element, so it also stops the flat rolls from pulling data
    #  across batch-element boundaries after the batch collapse)
    rr = jnp.arange(HW, dtype=jnp.int32) // W
    cc = jnp.arange(HW, dtype=jnp.int32) % W
    tap_masks = []
    for t in range(9):
        dy, dx = t // 3 - 1, t % 3 - 1
        valid = ((rr + dy >= 0) & (rr + dy < H) &
                 (cc + dx >= 0) & (cc + dx < W))
        tap_masks.append(jnp.broadcast_to(valid[:, None], (HW, C)))
    mask = jnp.tile(jnp.concatenate(tap_masks, axis=-1).astype(jnp.float32),
                    (N, 1))                                       # (NHW, 9C)

    # --- block-diagonal pooling matrix carrying the 1/HW factor ---
    pool = jnp.repeat(jnp.eye(N, dtype=jnp.float32), HW, axis=1) / float(HW)

    kernel = _make_logits_kernel(W, NHW)

    def full(*shape):
        nd = len(shape)
        return pl.BlockSpec(shape, lambda i, _nd=nd: (0,) * _nd)

    out = pl.pallas_call(
        kernel,
        out_shape=jax.ShapeDtypeStruct((N, NCP), jnp.float32),
        grid_spec=pltpu.PrefetchScalarGridSpec(
            num_scalar_prefetch=0,
            grid=(1,),                       # whole batch in one fat step
            in_specs=[
                full(NHW, K1),               # patches1
                full(NHW, C),                # identity branch
                full(NHW, K1),               # border mask
                full(N, NHW),                # pooling matrix
                full(K1, C),                 # w1 (folded)
                full(1, C),                  # b1
                full(K1, C),                 # w2 (folded)
                full(1, C),                  # b2
                full(C, NCP),                # linear weight (padded)
                full(1, NCP),                # linear bias (padded)
            ],
            out_specs=full(N, NCP),
        ),
        compiler_params=pltpu.CompilerParams(
            dimension_semantics=("arbitrary",)),
    )(patches1, x_flat, mask, pool, w1_flat, b1_2d, w2_flat, b2_2d, wl, bl)

    return out[:, :NC]


def _reference(x_nchw, w1, bn1, w2, bn2, w_lin, b_lin, eps=1e-5):
    """Pure-JAX reference: BasicBlock (explicit eval BN) -> avgpool -> linear."""
    x = jnp.transpose(x_nchw, (0, 2, 3, 1))
    dn = ("NHWC", "HWIO", "NHWC")
    hp = jax.lax.Precision.HIGHEST

    def bn(y, params):
        g, b, m, v = params
        return (y - m) * (g * jax.lax.rsqrt(v + eps)) + b

    y = jax.lax.conv_general_dilated(x, w1, (1, 1), ((1, 1), (1, 1)),
                                     dimension_numbers=dn, precision=hp)
    y = jnp.maximum(bn(y, bn1), 0.0)
    y = jax.lax.conv_general_dilated(y, w2, (1, 1), ((1, 1), (1, 1)),
                                     dimension_numbers=dn, precision=hp)
    y = jnp.maximum(bn(y, bn2) + x, 0.0)          # residual + ReLU
    pooled = jnp.mean(y, axis=(1, 2))             # global average pool
    return jnp.dot(pooled, jnp.transpose(w_lin), precision=hp) + b_lin


if __name__ == "__main__":
    # Shrunk ResNet-stage shapes: batch=2, channels=16, spatial 16x16, 10 classes.
    N, C, H, W = 2, 16, 16, 16
    NC = 10

    key = jax.random.PRNGKey(0)
    ks = jax.random.split(key, 12)

    x = jax.random.normal(ks[0], (N, C, H, W), dtype=jnp.float32)
    w1 = jax.random.normal(ks[1], (3, 3, C, C), dtype=jnp.float32) * 0.1
    w2 = jax.random.normal(ks[2], (3, 3, C, C), dtype=jnp.float32) * 0.1
    bn1 = (jax.random.normal(ks[3], (C,)) * 0.1 + 1.0,                 # gamma
           jax.random.normal(ks[4], (C,)) * 0.1,                       # beta
           jax.random.normal(ks[5], (C,)) * 0.1,                       # running_mean
           jax.nn.softplus(jax.random.normal(ks[6], (C,))) + 0.5)      # running_var
    bn2 = (jax.random.normal(ks[7], (C,)) * 0.1 + 1.0,
           jax.random.normal(ks[8], (C,)) * 0.1,
           jax.random.normal(ks[9], (C,)) * 0.1,
           jax.nn.softplus(jax.random.normal(ks[10], (C,))) + 0.5)
    w_lin = jax.random.normal(ks[11], (NC, C), dtype=jnp.float32) * 0.1
    b_lin = jnp.linspace(-0.1, 0.1, NC, dtype=jnp.float32)

    out = jax.block_until_ready(
        logits_forward(x, w1, bn1, w2, bn2, w_lin, b_lin))
    ref = jax.block_until_ready(
        _reference(x, w1, bn1, w2, bn2, w_lin, b_lin))

    assert out.shape == (N, NC), out.shape
    # f32 MXU matmuls are multi-pass emulated (near-f32); modest headroom only.
    assert jnp.allclose(out, ref, atol=2e-3, rtol=2e-3), (
        "mismatch vs reference, max abs err = "
        f"{float(jnp.max(jnp.abs(out - ref)))}")

    print("KERNEL_OK")
</pallas_src>

<mosaic_0001>
module attributes {stable_mosaic.version = 11 : i64} {
  func.func @kernel(%arg0: i32, %arg1: memref<512x144xf32, #tpu.memory_space<vmem>>, %arg2: memref<512x16xf32, #tpu.memory_space<vmem>>, %arg3: memref<512x144xf32, #tpu.memory_space<vmem>>, %arg4: memref<2x512xf32, #tpu.memory_space<vmem>>, %arg5: memref<144x16xf32, #tpu.memory_space<vmem>>, %arg6: memref<1x16xf32, #tpu.memory_space<vmem>>, %arg7: memref<144x16xf32, #tpu.memory_space<vmem>>, %arg8: memref<1x16xf32, #tpu.memory_space<vmem>>, %arg9: memref<16x128xf32, #tpu.memory_space<vmem>>, %arg10: memref<1x128xf32, #tpu.memory_space<vmem>>, %arg11: memref<2x128xf32, #tpu.memory_space<vmem>>) attributes {dimension_semantics = [#tpu.dimension_semantics<arbitrary>], iteration_bounds = array<i64: 1>, scalar_prefetch = 0 : i64, scratch_operands = 0 : i64, tpu.core_type = #tpu.core_type<tc>, window_params = [{pipeline_mode = #tpu.pipeline_mode<synchronous>, transform_indices = @transform_0, window_bounds = array<i64: 512, 144>}, {pipeline_mode = #tpu.pipeline_mode<synchronous>, transform_indices = @transform_1, window_bounds = array<i64: 512, 16>}, {pipeline_mode = #tpu.pipeline_mode<synchronous>, transform_indices = @transform_2, window_bounds = array<i64: 512, 144>}, {pipeline_mode = #tpu.pipeline_mode<synchronous>, transform_indices = @transform_3, window_bounds = array<i64: 2, 512>}, {pipeline_mode = #tpu.pipeline_mode<synchronous>, transform_indices = @transform_4, window_bounds = array<i64: 144, 16>}, {pipeline_mode = #tpu.pipeline_mode<synchronous>, transform_indices = @transform_5, window_bounds = array<i64: 1, 16>}, {pipeline_mode = #tpu.pipeline_mode<synchronous>, transform_indices = @transform_6, window_bounds = array<i64: 144, 16>}, {pipeline_mode = #tpu.pipeline_mode<synchronous>, transform_indices = @transform_7, window_bounds = array<i64: 1, 16>}, {pipeline_mode = #tpu.pipeline_mode<synchronous>, transform_indices = @transform_8, window_bounds = array<i64: 16, 128>}, {pipeline_mode = #tpu.pipeline_mode<synchronous>, transform_indices = @transform_9, window_bounds = array<i64: 1, 128>}, {pipeline_mode = #tpu.pipeline_mode<synchronous>, transform_indices = @transform_10, window_bounds = array<i64: 2, 128>}]} {
    %c0 = arith.constant 0 : index
    %c0_0 = arith.constant 0 : index
    %0 = vector.load %arg1[%c0, %c0_0] : memref<512x144xf32, #tpu.memory_space<vmem>>, vector<512x144xf32>
    %c0_1 = arith.constant 0 : index
    %c0_2 = arith.constant 0 : index
    %1 = vector.load %arg5[%c0_1, %c0_2] : memref<144x16xf32, #tpu.memory_space<vmem>>, vector<144x16xf32>
    %cst = arith.constant dense<0.000000e+00> : vector<512x16xf32>
    %2 = tpu.matmul %0, %1, %cst {dimension_numbers = #tpu.dot_dimension_numbers<[1], [0], [0], [1], [0, 0, 1, 1], [], []>} : vector<512x144xf32>, vector<144x16xf32>, vector<512x16xf32> -> vector<512x16xf32>
    %c0_3 = arith.constant 0 : index
    %c0_4 = arith.constant 0 : index
    %3 = vector.load %arg6[%c0_3, %c0_4] : memref<1x16xf32, #tpu.memory_space<vmem>>, vector<1x16xf32>
    %4 = vector.broadcast %3 : vector<1x16xf32> to vector<512x16xf32>
    %5 = arith.addf %2, %4 : vector<512x16xf32>
    %cst_5 = arith.constant 0.000000e+00 : f32
    %6 = vector.broadcast %cst_5 : f32 to vector<512x16xf32>
    %7 = arith.maximumf %5, %6 : vector<512x16xf32>
    %c17_i32 = arith.constant 17 : i32
    %8 = tpu.dynamic_rotate %7 by %c17_i32 dim 0 : vector<512x16xf32>, i32 -> vector<512x16xf32>
    %c16_i32 = arith.constant 16 : i32
    %9 = tpu.dynamic_rotate %7 by %c16_i32 dim 0 : vector<512x16xf32>, i32 -> vector<512x16xf32>
    %c15_i32 = arith.constant 15 : i32
    %10 = tpu.dynamic_rotate %7 by %c15_i32 dim 0 : vector<512x16xf32>, i32 -> vector<512x16xf32>
    %c1_i32 = arith.constant 1 : i32
    %11 = tpu.dynamic_rotate %7 by %c1_i32 dim 0 : vector<512x16xf32>, i32 -> vector<512x16xf32>
    %c511_i32 = arith.constant 511 : i32
    %12 = tpu.dynamic_rotate %7 by %c511_i32 dim 0 : vector<512x16xf32>, i32 -> vector<512x16xf32>
    %c497_i32 = arith.constant 497 : i32
    %13 = tpu.dynamic_rotate %7 by %c497_i32 dim 0 : vector<512x16xf32>, i32 -> vector<512x16xf32>
    %c496_i32 = arith.constant 496 : i32
    %14 = tpu.dynamic_rotate %7 by %c496_i32 dim 0 : vector<512x16xf32>, i32 -> vector<512x16xf32>
    %c495_i32 = arith.constant 495 : i32
    %15 = tpu.dynamic_rotate %7 by %c495_i32 dim 0 : vector<512x16xf32>, i32 -> vector<512x16xf32>
    %16 = tpu.concatenate %8, %9, %10, %11, %7, %12, %13, %14, %15 in 1 : vector<512x16xf32>, vector<512x16xf32>, vector<512x16xf32>, vector<512x16xf32>, vector<512x16xf32>, vector<512x16xf32>, vector<512x16xf32>, vector<512x16xf32>, vector<512x16xf32> -> vector<512x144xf32>
    %c0_6 = arith.constant 0 : index
    %c0_7 = arith.constant 0 : index
    %17 = vector.load %arg3[%c0_6, %c0_7] : memref<512x144xf32, #tpu.memory_space<vmem>>, vector<512x144xf32>
    %18 = arith.mulf %16, %17 : vector<512x144xf32>
    %c0_8 = arith.constant 0 : index
    %c0_9 = arith.constant 0 : index
    %19 = vector.load %arg7[%c0_8, %c0_9] : memref<144x16xf32, #tpu.memory_space<vmem>>, vector<144x16xf32>
    %cst_10 = arith.constant dense<0.000000e+00> : vector<512x16xf32>
    %20 = tpu.matmul %18, %19, %cst_10 {dimension_numbers = #tpu.dot_dimension_numbers<[1], [0], [0], [1], [0, 0, 1, 1], [], []>} : vector<512x144xf32>, vector<144x16xf32>, vector<512x16xf32> -> vector<512x16xf32>
    %c0_11 = arith.constant 0 : index
    %c0_12 = arith.constant 0 : index
    %21 = vector.load %arg8[%c0_11, %c0_12] : memref<1x16xf32, #tpu.memory_space<vmem>>, vector<1x16xf32>
    %22 = vector.broadcast %21 : vector<1x16xf32> to vector<512x16xf32>
    %23 = arith.addf %20, %22 : vector<512x16xf32>
    %c0_13 = arith.constant 0 : index
    %c0_14 = arith.constant 0 : index
    %24 = vector.load %arg2[%c0_13, %c0_14] : memref<512x16xf32, #tpu.memory_space<vmem>>, vector<512x16xf32>
    %25 = arith.addf %23, %24 : vector<512x16xf32>
    %cst_15 = arith.constant 0.000000e+00 : f32
    %26 = vector.broadcast %cst_15 : f32 to vector<512x16xf32>
    %27 = arith.maximumf %25, %26 : vector<512x16xf32>
    %c0_16 = arith.constant 0 : index
    %c0_17 = arith.constant 0 : index
    %28 = vector.load %arg4[%c0_16, %c0_17] : memref<2x512xf32, #tpu.memory_space<vmem>>, vector<2x512xf32>
    %cst_18 = arith.constant dense<0.000000e+00> : vector<2x16xf32>
    %29 = tpu.matmul %28, %27, %cst_18 {dimension_numbers = #tpu.dot_dimension_numbers<[1], [0], [0], [1], [0, 0, 1, 1], [], []>} : vector<2x512xf32>, vector<512x16xf32>, vector<2x16xf32> -> vector<2x16xf32>
    %c0_19 = arith.constant 0 : index
    %c0_20 = arith.constant 0 : index
    %30 = vector.load %arg9[%c0_19, %c0_20] : memref<16x128xf32, #tpu.memory_space<vmem>>, vector<16x128xf32>
    %cst_21 = arith.constant dense<0.000000e+00> : vector<2x128xf32>
    %31 = tpu.matmul %29, %30, %cst_21 {dimension_numbers = #tpu.dot_dimension_numbers<[1], [0], [0], [1], [0, 0, 1, 1], [], []>} : vector<2x16xf32>, vector<16x128xf32>, vector<2x128xf32> -> vector<2x128xf32>
    %c0_22 = arith.constant 0 : index
    %c0_23 = arith.constant 0 : index
    %32 = vector.load %arg10[%c0_22, %c0_23] : memref<1x128xf32, #tpu.memory_space<vmem>>, vector<1x128xf32>
    %33 = vector.broadcast %32 : vector<1x128xf32> to vector<2x128xf32>
    %34 = arith.addf %31, %33 : vector<2x128xf32>
    %c0_24 = arith.constant 0 : index
    %c0_25 = arith.constant 0 : index
    %35 = vector.load %arg11[%c0_24, %c0_25] : memref<2x128xf32, #tpu.memory_space<vmem>>, vector<2x128xf32>
    tpu.vector_store %arg11[%c0_24, %c0_25], %34 {strides = array<i32>} : memref<2x128xf32, #tpu.memory_space<vmem>>, vector<2x128xf32>,
    return
  }
  func.func @transform_0(%arg0: i32) -> (i32, i32) {
    %c0_i32 = arith.constant 0 : i32
    %c0_i32_0 = arith.constant 0 : i32
    %c0_i32_1 = arith.constant 0 : i32
    return %c0_i32, %c0_i32_0 : i32, i32
  }
  func.func @transform_1(%arg0: i32) -> (i32, i32) {
    %c0_i32 = arith.constant 0 : i32
    %c0_i32_0 = arith.constant 0 : i32
    %c0_i32_1 = arith.constant 0 : i32
    return %c0_i32, %c0_i32_0 : i32, i32
  }
  func.func @transform_2(%arg0: i32) -> (i32, i32) {
    %c0_i32 = arith.constant 0 : i32
    %c0_i32_0 = arith.constant 0 : i32
    %c0_i32_1 = arith.constant 0 : i32
    return %c0_i32, %c0_i32_0 : i32, i32
  }
  func.func @transform_3(%arg0: i32) -> (i32, i32) {
    %c0_i32 = arith.constant 0 : i32
    %c0_i32_0 = arith.constant 0 : i32
    %c0_i32_1 = arith.constant 0 : i32
    return %c0_i32, %c0_i32_0 : i32, i32
  }
  func.func @transform_4(%arg0: i32) -> (i32, i32) {
    %c0_i32 = arith.constant 0 : i32
    %c0_i32_0 = arith.constant 0 : i32
    %c0_i32_1 = arith.constant 0 : i32
    return %c0_i32, %c0_i32_0 : i32, i32
  }
  func.func @transform_5(%arg0: i32) -> (i32, i32) {
    %c0_i32 = arith.constant 0 : i32
    %c0_i32_0 = arith.constant 0 : i32
    %c0_i32_1 = arith.constant 0 : i32
    return %c0_i32, %c0_i32_0 : i32, i32
  }
  func.func @transform_6(%arg0: i32) -> (i32, i32) {
    %c0_i32 = arith.constant 0 : i32
    %c0_i32_0 = arith.constant 0 : i32
    %c0_i32_1 = arith.constant 0 : i32
    return %c0_i32, %c0_i32_0 : i32, i32
  }
  func.func @transform_7(%arg0: i32) -> (i32, i32) {
    %c0_i32 = arith.constant 0 : i32
    %c0_i32_0 = arith.constant 0 : i32
    %c0_i32_1 = arith.constant 0 : i32
    return %c0_i32, %c0_i32_0 : i32, i32
  }
  func.func @transform_8(%arg0: i32) -> (i32, i32) {
    %c0_i32 = arith.constant 0 : i32
    %c0_i32_0 = arith.constant 0 : i32
    %c0_i32_1 = arith.constant 0 : i32
    return %c0_i32, %c0_i32_0 : i32, i32
  }
  func.func @transform_9(%arg0: i32) -> (i32, i32) {
    %c0_i32 = arith.constant 0 : i32
    %c0_i32_0 = arith.constant 0 : i32
    %c0_i32_1 = arith.constant 0 : i32
    return %c0_i32, %c0_i32_0 : i32, i32
  }
  func.func @transform_10(%arg0: i32) -> (i32, i32) {
    %c0_i32 = arith.constant 0 : i32
    %c0_i32_0 = arith.constant 0 : i32
    %c0_i32_1 = arith.constant 0 : i32
    return %c0_i32, %c0_i32_0 : i32, i32
  }
}

</mosaic_0001>

<bundles_post_ra>
// kernel: tpu_custom_call.1
= control target key start
LH: loop header
LB: loop body
LE: loop exit
PB: predicated region body
PF: predicated region fallthrough
CT: control target
= control target key end

     0   :  { %v9700_v1 = vmov 0.0   ;;  %vm189_vm0 = vcmask 130048   ;;  %s9687_s0 = inlined_call_operand.vmem [shape: f32[512,144], index: 0, kind: input, shape index: {}]   ;;  %s9688_s1 = inlined_call_operand.vmem [shape: f32[512,16], index: 1, kind: input, shape index: {}]   ;;  %s9689_s2 = inlined_call_operand.vmem [shape: f32[512,144], index: 2, kind: input, shape index: {}]   ;;  %s9690_s3 = inlined_call_operand.vmem [shape: f32[2,512], index: 3, kind: input, shape index: {}]   ;;  %s9691_s4 = inlined_call_operand.vmem [shape: f32[144,16], index: 4, kind: input, shape index: {}]   ;;  %s9692_s5 = inlined_call_operand.vmem [shape: f32[1,16], index: 5, kind: input, shape index: {}]   ;;  %s9693_s6 = inlined_call_operand.vmem [shape: f32[144,16], index: 6, kind: input, shape index: {}]   ;;  %s9694_s7 = inlined_call_operand.vmem [shape: f32[1,16], index: 7, kind: input, shape index: {}]   ;;  %s9695_s8 = inlined_call_operand.vmem [shape: f32[16,128], index: 8, kind: input, shape index: {}]   ;;  %s9696_s9 = inlined_call_operand.vmem [shape: f32[1,128], index: 9, kind: input, shape index: {}]   ;;  %s9697_s10 = inlined_call_operand.hbm [shape: f32[2,128], index: 10, kind: output, shape index: {}]  }
   0x1   :  { %v179_v0 = vld [vmem:[%s9691_s4 + $0x78] sm:$0xff]  ;;  %382 = vmatprep.subr.mxu0 %v9700_v1  ;;  %v178_v2 = vld [vmem:[%s9691_s4 + $0x70] sm:$0xff]  ;;  %3554 = vmatprep.subr.mxu1 %v9700_v1  ;;  %v177_v3 = vld [vmem:[%s9691_s4 + $0x68] sm:$0xff] }
   0x2   :  { %383 = vmatpush1.msra.mxu0 %v179_v0  ;;  %v176_v4 = vld [vmem:[%s9691_s4 + $0x60] sm:$0xff]  ;;  %v37_v5 = vld [vmem:[%s9687_s0 + $0x8] sm:$0xff]  ;;  %v175_v6 = vld [vmem:[%s9691_s4 + $0x58] sm:$0xff] }
   0x3   :  { %384 = vmatprep.subr.mxu0 %v9700_v1  ;;  %4392 = vmatprep.mubr.msk.f32.mxu0 %vm189_vm0, %v37_v5  ;;  %v174_v7 = vld [vmem:[%s9691_s4 + $0x50] sm:$0xff]  ;;  %v173_v8 = vld [vmem:[%s9691_s4 + $0x48] sm:$0xff]  ;;  %v172_v9 = vld [vmem:[%s9691_s4 + $0x40] sm:$0xff] }
   0x4   :  { %385 = vmatpush1.msra.mxu0 %v178_v2  ;;  %v171_v10 = vld [vmem:[%s9691_s4 + $0x38] sm:$0xff]  ;;  %v170_v11 = vld [vmem:[%s9691_s4 + $0x30] sm:$0xff]  ;;  %v169_v12 = vld [vmem:[%s9691_s4 + $0x28] sm:$0xff] }
   0x5   :  { %386 = vmatprep.subr.mxu0 %v9700_v1  ;;  %v168_v13 = vld [vmem:[%s9691_s4 + $0x20] sm:$0xff]  ;;  %v167_v14 = vld [vmem:[%s9691_s4 + $0x18] sm:$0xff]  ;;  %v166_v15 = vld [vmem:[%s9691_s4 + $0x10] sm:$0xff] }
   0x6   :  { %387 = vmatpush1.msra.mxu0 %v177_v3 }
   0x7   :  { %388 = vmatprep.subr.mxu0 %v9700_v1 }
   0x8   :  { %389 = vmatpush1.msra.mxu0 %v176_v4 }
   0x9   :  { %390 = vmatprep.subr.mxu0 %v9700_v1 }
   0xa   :  { %391 = vmatpush1.msra.mxu0 %v175_v6 }
   0xb   :  { %392 = vmatprep.subr.mxu0 %v9700_v1 }
   0xc   :  { %393 = vmatpush1.msra.mxu0 %v174_v7 }
   0xd   :  { %394 = vmatprep.subr.mxu0 %v9700_v1 }
   0xe   :  { %395 = vmatpush1.msra.mxu0 %v173_v8 }
   0xf   :  { %396 = vmatprep.subr.mxu0 %v9700_v1 }
  0x10   :  { %397 = vmatpush1.msra.mxu0 %v172_v9 }
  0x11   :  { %398 = vmatprep.subr.mxu0 %v9700_v1 }
  0x12   :  { %399 = vmatpush1.msra.mxu0 %v171_v10 }
  0x13   :  { %400 = vmatprep.subr.mxu0 %v9700_v1 }
  0x14   :  { %401 = vmatpush1.msra.mxu0 %v170_v11 }
  0x15   :  { %402 = vmatprep.subr.mxu0 %v9700_v1 }
  0x16   :  { %403 = vmatpush1.msra.mxu0 %v169_v12 }
  0x17   :  { %404 = vmatprep.subr.mxu0 %v9700_v1 }
  0x18   :  { %405 = vmatpush1.msra.mxu0 %v168_v13 }
  0x19   :  { %406 = vmatprep.subr.mxu0 %v9700_v1 }
  0x1a   :  { %407 = vmatpush1.msra.mxu0 %v167_v14 }
  0x1b   :  { %15 = vsyncpa [#allocation3], 0  ;;  %408 = vmatprep.subr.mxu0 %v9700_v1  ;;  %v165_v16 = vld [vmem:[%s9691_s4 + $0x8] sm:$0xff]  ;;  %v164_v17 = vld [vmem:[%s9691_s4] sm:$0xff]  ;;  %s4639_s23 = smov 64   ;;  %s4640_s28 = smov 16  }
  0x1c   :  { %409 = vmatpush1.msra.mxu0 %v166_v15  ;;  %v181_v18 = vld [vmem:[%s9691_s4 + $0x88] sm:$0xff]  ;;  %v180_v19 = vld [vmem:[%s9691_s4 + $0x80] sm:$0xff]  ;;  %v39_v21 = vld [vmem:[%s9687_s0 + $0x18] sm:$0xff]  ;;  %s4641_s13 = smov 80   ;;  %s4642_s17 = smov 32   ;;  %vm2691_vm3 = vcmask 261120  }
  0x1d   :  { %410 = vmatprep.subr.mxu0 %v9700_v1  ;;  %v36_v20 = vld [vmem:[%s9687_s0] sm:$0xff]  ;;  %v38_v22 = vld [vmem:[%s9687_s0 + $0x10] sm:$0xff]  ;;  %v41_v23 = vld [vmem:[%s9687_s0 + $0x28] sm:$0xff]  ;;  %s4643_s18 = smov 48   ;;  %s4644_s26 = smov 112   ;;  %vm2756_vm4 = vcmask 392192  }
  0x1e   :  { %411 = vmatpush1.msra.mxu0 %v165_v16  ;;  %v40_v24 = vld [vmem:[%s9687_s0 + $0x20] sm:$0xff]  ;;  %v43_v25 = vld [vmem:[%s9687_s0 + $0x38] sm:$0xff]  ;;  %v42_v26 = vld [vmem:[%s9687_s0 + $0x30] sm:$0xff]  ;;  %s4645_s22 = smov 96   ;;  %vm2821_vm5 = vcmask 523264   ;;  %vm2886_vm6 = vcmask 654336  }
  0x1f   :  { %412 = vmatprep.subr.mxu0 %v9700_v1  ;;  %v45_v27 = vld [vmem:[%s9687_s0 + $0x48] sm:$0xff]  ;;  %v44_v28 = vld [vmem:[%s9687_s0 + $0x40] sm:$0xff]  ;;  %v47_v29 = vld [vmem:[%s9687_s0 + $0x58] sm:$0xff]  ;;  %vm2951_vm7 = vcmask 785408   ;;  %vm3016_vm8 = vcmask 916480   ;;  %vm4647_vm9 = vmmov 0  }
  0x20   :  { %413 = vmatpush1.msra.mxu0 %v164_v17  ;;  %v46_v30 = vld [vmem:[%s9687_s0 + $0x50] sm:$0xff]  ;;  %v49_v31 = vld [vmem:[%s9687_s0 + $0x68] sm:$0xff]  ;;  %v48_v32 = vld [vmem:[%s9687_s0 + $0x60] sm:$0xff] }
  0x21   :  { %442 = vmatprep.subr.mxu0 %v9700_v1  ;;  %v51_v33 = vld [vmem:[%s9687_s0 + $0x78] sm:$0xff]  ;;  %v50_v34 = vld [vmem:[%s9687_s0 + $0x70] sm:$0xff]  ;;  %v53_v35 = vld [vmem:[%s9687_s0 + $0x88] sm:$0xff] }
  0x22   :  { %443 = vmatpush2.msra.mxu0 %v181_v18  ;;  %v52_v36 = vld [vmem:[%s9687_s0 + $0x80] sm:$0xff]  ;;  %v55_v37 = vld [vmem:[%s9687_s0 + $0x98] sm:$0xff]  ;;  %v54_v38 = vld [vmem:[%s9687_s0 + $0x90] sm:$0xff] }
  0x23   :  { %444 = vmatprep.subr.mxu0 %v9700_v1  ;;  %v57_v39 = vld [vmem:[%s9687_s0 + $0xa8] sm:$0xff]  ;;  %v56_v40 = vld [vmem:[%s9687_s0 + $0xa0] sm:$0xff]  ;;  %v59_v41 = vld [vmem:[%s9687_s0 + $0xb8] sm:$0xff] }
  0x24   :  { %445 = vmatpush2.msra.mxu0 %v180_v19  ;;  %v58_v42 = vld [vmem:[%s9687_s0 + $0xb0] sm:$0xff]  ;;  %v61_v43 = vld [vmem:[%s9687_s0 + $0xc8] sm:$0xff]  ;;  %v60_v44 = vld [vmem:[%s9687_s0 + $0xc0] sm:$0xff] }
  0x25   :  { %447 = vmatmul.mubr.f32.vlgmr.msra.gmra.mxu0 %v36_v20  ;;  %v63_v45 = vld [vmem:[%s9687_s0 + $0xd8] sm:$0xff]  ;;  %v62_v46 = vld [vmem:[%s9687_s0 + $0xd0] sm:$0xff]  ;;  %v65_v47 = vld [vmem:[%s9687_s0 + $0xe8] sm:$0xff] }
  0x26   :  { %4393 = vmatprep.mubr.msk.f32.mxu0 %vm189_vm0, %v39_v21  ;;  %v64_v48 = vld [vmem:[%s9687_s0 + $0xe0] sm:$0xff]  ;;  %v67_v49 = vld [vmem:[%s9687_s0 + $0xf8] sm:$0xff]  ;;  %v66_v50 = vld [vmem:[%s9687_s0 + $0xf0] sm:$0xff] }
  0x27   :  { %v69_v51 = vld [vmem:[%s9687_s0 + $0x108] sm:$0xff]  ;;  %v68_v52 = vld [vmem:[%s9687_s0 + $0x100] sm:$0xff]  ;;  %v71_v53 = vld [vmem:[%s9687_s0 + $0x118] sm:$0xff] }
  0x28   :  { %v70_v54 = vld [vmem:[%s9687_s0 + $0x110] sm:$0xff]  ;;  %v73_v55 = vld [vmem:[%s9687_s0 + $0x128] sm:$0xff]  ;;  %v72_v56 = vld [vmem:[%s9687_s0 + $0x120] sm:$0xff] }
  0x29   :  { %452 = vmatmul.mubr.f32.gmra.mxu0 %v38_v22  ;;  %v75_v57 = vld [vmem:[%s9687_s0 + $0x138] sm:$0xff]  ;;  %v74_v58 = vld [vmem:[%s9687_s0 + $0x130] sm:$0xff]  ;;  %v77_v59 = vld [vmem:[%s9687_s0 + $0x148] sm:$0xff] }
  0x2a   :  { %4394 = vmatprep.mubr.msk.f32.mxu0 %vm189_vm0, %v41_v23  ;;  %v76_v60 = vld [vmem:[%s9687_s0 + $0x140] sm:$0xff]  ;;  %v79_v61 = vld [vmem:[%s9687_s0 + $0x158] sm:$0xff]  ;;  %v78_v62 = vld [vmem:[%s9687_s0 + $0x150] sm:$0xff] }
  0x2b   :  { %v81_v63 = vld [vmem:[%s9687_s0 + $0x168] sm:$0xff]  ;;  %v80_v0 = vld [vmem:[%s9687_s0 + $0x160] sm:$0xff]  ;;  %v83_v2 = vld [vmem:[%s9687_s0 + $0x178] sm:$0xff] }
  0x2c   :  { %v82_v3 = vld [vmem:[%s9687_s0 + $0x170] sm:$0xff]  ;;  %v85_v4 = vld [vmem:[%s9687_s0 + $0x188] sm:$0xff]  ;;  %v84_v5 = vld [vmem:[%s9687_s0 + $0x180] sm:$0xff] }
  0x2d   :  { %457 = vmatmul.mubr.f32.gmra.mxu0 %v40_v24  ;;  %v87_v6 = vld [vmem:[%s9687_s0 + $0x198] sm:$0xff]  ;;  %v86_v7 = vld [vmem:[%s9687_s0 + $0x190] sm:$0xff]  ;;  %v89_v8 = vld [vmem:[%s9687_s0 + $0x1a8] sm:$0xff] }
  0x2e   :  { %4395 = vmatprep.mubr.msk.f32.mxu0 %vm189_vm0, %v43_v25  ;;  %v88_v9 = vld [vmem:[%s9687_s0 + $0x1a0] sm:$0xff]  ;;  %v91_v10 = vld [vmem:[%s9687_s0 + $0x1b8] sm:$0xff]  ;;  %v90_v11 = vld [vmem:[%s9687_s0 + $0x1b0] sm:$0xff] }
  0x2f   :  { %v93_v12 = vld [vmem:[%s9687_s0 + $0x1c8] sm:$0xff]  ;;  %v92_v13 = vld [vmem:[%s9687_s0 + $0x1c0] sm:$0xff]  ;;  %v95_v14 = vld [vmem:[%s9687_s0 + $0x1d8] sm:$0xff] }
  0x30   :  { %v94_v15 = vld [vmem:[%s9687_s0 + $0x1d0] sm:$0xff]  ;;  %v97_v16 = vld [vmem:[%s9687_s0 + $0x1e8] sm:$0xff]  ;;  %v96_v17 = vld [vmem:[%s9687_s0 + $0x1e0] sm:$0xff] }
  0x31   :  { %462 = vmatmul.mubr.f32.gmra.mxu0 %v42_v26  ;;  %v99_v18 = vld [vmem:[%s9687_s0 + $0x1f8] sm:$0xff]  ;;  %v98_v19 = vld [vmem:[%s9687_s0 + $0x1f0] sm:$0xff]  ;;  %v101_v20 = vld [vmem:[%s9687_s0 + $0x208] sm:$0xff] }
  0x32   :  { %4396 = vmatprep.mubr.msk.f32.mxu0 %vm189_vm0, %v45_v27  ;;  %v100_v21 = vld [vmem:[%s9687_s0 + $0x200] sm:$0xff]  ;;  %v103_v22 = vld [vmem:[%s9687_s0 + $0x218] sm:$0xff]  ;;  %v102_v23 = vld [vmem:[%s9687_s0 + $0x210] sm:$0xff] }
  0x33   :  { %v105_v24 = vld [vmem:[%s9687_s0 + $0x228] sm:$0xff]  ;;  %v104_v25 = vld [vmem:[%s9687_s0 + $0x220] sm:$0xff]  ;;  %v107_v26 = vld [vmem:[%s9687_s0 + $0x238] sm:$0xff] }
  0x34   :  { %v106_v27 = vld [vmem:[%s9687_s0 + $0x230] sm:$0xff] }
  0x35   :  { %467 = vmatmul.mubr.f32.gmra.mxu0 %v44_v28  ;;  %v109_v28 = vld [vmem:[%s9687_s0 + $0x248] sm:$0xff] }
  0x36   :  { %4397 = vmatprep.mubr.msk.f32.mxu0 %vm189_vm0, %v47_v29  ;;  %v108_v29 = vld [vmem:[%s9687_s0 + $0x240] sm:$0xff] }
  0x39   :  { %472 = vmatmul.mubr.f32.gmra.mxu0 %v46_v30  ;;  %v111_v30 = vld [vmem:[%s9687_s0 + $0x258] sm:$0xff] }
  0x3a   :  { %4398 = vmatprep.mubr.msk.f32.mxu0 %vm189_vm0, %v49_v31  ;;  %v110_v31 = vld [vmem:[%s9687_s0 + $0x250] sm:$0xff] }
  0x3d   :  { %477 = vmatmul.mubr.f32.gmra.mxu0 %v48_v32  ;;  %v113_v32 = vld [vmem:[%s9687_s0 + $0x268] sm:$0xff] }
  0x3e   :  { %4399 = vmatprep.mubr.msk.f32.mxu0 %vm189_vm0, %v51_v33  ;;  %v112_v33 = vld [vmem:[%s9687_s0 + $0x260] sm:$0xff] }
  0x41   :  { %482 = vmatmul.mubr.f32.gmra.mxu0 %v50_v34  ;;  %v115_v34 = vld [vmem:[%s9687_s0 + $0x278] sm:$0xff] }
  0x42   :  { %4400 = vmatprep.mubr.msk.f32.mxu0 %vm189_vm0, %v53_v35  ;;  %v114_v35 = vld [vmem:[%s9687_s0 + $0x270] sm:$0xff] }
  0x45   :  { %487 = vmatmul.mubr.f32.gmra.mxu0 %v52_v36  ;;  %v117_v36 = vld [vmem:[%s9687_s0 + $0x288] sm:$0xff] }
  0x46   :  { %4401 = vmatprep.mubr.msk.f32.mxu0 %vm189_vm0, %v55_v37  ;;  %v116_v37 = vld [vmem:[%s9687_s0 + $0x280] sm:$0xff] }
  0x49   :  { %492 = vmatmul.mubr.f32.gmra.mxu0 %v54_v38  ;;  %v119_v38 = vld [vmem:[%s9687_s0 + $0x298] sm:$0xff] }
  0x4a   :  { %4402 = vmatprep.mubr.msk.f32.mxu0 %vm189_vm0, %v57_v39  ;;  %v118_v39 = vld [vmem:[%s9687_s0 + $0x290] sm:$0xff] }
  0x4d   :  { %497 = vmatmul.mubr.f32.gmra.mxu0 %v56_v40  ;;  %v121_v40 = vld [vmem:[%s9687_s0 + $0x2a8] sm:$0xff] }
  0x4e   :  { %4403 = vmatprep.mubr.msk.f32.mxu0 %vm189_vm0, %v59_v41  ;;  %v120_v41 = vld [vmem:[%s9687_s0 + $0x2a0] sm:$0xff] }
  0x51   :  { %502 = vmatmul.mubr.f32.gmra.mxu0 %v58_v42  ;;  %v123_v42 = vld [vmem:[%s9687_s0 + $0x2b8] sm:$0xff] }
  0x52   :  { %4404 = vmatprep.mubr.msk.f32.mxu0 %vm189_vm0, %v61_v43  ;;  %v122_v43 = vld [vmem:[%s9687_s0 + $0x2b0] sm:$0xff] }
  0x55   :  { %507 = vmatmul.mubr.f32.gmra.mxu0 %v60_v44  ;;  %v125_v44 = vld [vmem:[%s9687_s0 + $0x2c8] sm:$0xff] }
  0x56   :  { %4405 = vmatprep.mubr.msk.f32.mxu0 %vm189_vm0, %v63_v45  ;;  %v124_v45 = vld [vmem:[%s9687_s0 + $0x2c0] sm:$0xff] }
  0x59   :  { %512 = vmatmul.mubr.f32.gmra.mxu0 %v62_v46  ;;  %v127_v46 = vld [vmem:[%s9687_s0 + $0x2d8] sm:$0xff] }
  0x5a   :  { %4406 = vmatprep.mubr.msk.f32.mxu0 %vm189_vm0, %v65_v47  ;;  %v126_v47 = vld [vmem:[%s9687_s0 + $0x2d0] sm:$0xff] }
  0x5d   :  { %517 = vmatmul.mubr.f32.gmra.mxu0 %v64_v48  ;;  %v129_v48 = vld [vmem:[%s9687_s0 + $0x2e8] sm:$0xff] }
  0x5e   :  { %4407 = vmatprep.mubr.msk.f32.mxu0 %vm189_vm0, %v67_v49  ;;  %v128_v49 = vld [vmem:[%s9687_s0 + $0x2e0] sm:$0xff] }
  0x61   :  { %522 = vmatmul.mubr.f32.gmra.mxu0 %v66_v50  ;;  %v131_v50 = vld [vmem:[%s9687_s0 + $0x2f8] sm:$0xff] }
  0x62   :  { %4408 = vmatprep.mubr.msk.f32.mxu0 %vm189_vm0, %v69_v51  ;;  %v130_v51 = vld [vmem:[%s9687_s0 + $0x2f0] sm:$0xff] }
  0x65   :  { %527 = vmatmul.mubr.f32.gmra.mxu0 %v68_v52  ;;  %v133_v52 = vld [vmem:[%s9687_s0 + $0x308] sm:$0xff] }
  0x66   :  { %4409 = vmatprep.mubr.msk.f32.mxu0 %vm189_vm0, %v71_v53  ;;  %v132_v53 = vld [vmem:[%s9687_s0 + $0x300] sm:$0xff] }
  0x69   :  { %532 = vmatmul.mubr.f32.gmra.mxu0 %v70_v54  ;;  %v5123_v54 = vld [vmem:[%s9692_s5] ss:$0 sm:$0xff] }
  0x6a   :  { %4410 = vmatprep.mubr.msk.f32.mxu0 %vm189_vm0, %v73_v55  ;;  %v135_v55 = vld [vmem:[%s9687_s0 + $0x318] sm:$0xff] }
  0x6d   :  { %537 = vmatmul.mubr.f32.gmra.mxu0 %v72_v56 }
  0x6e   :  { %4411 = vmatprep.mubr.msk.f32.mxu0 %vm189_vm0, %v75_v57  ;;  %v895_v57 = vlaneseq }
  0x71   :  { %542 = vmatmul.mubr.f32.gmra.mxu0 %v74_v58 }
  0x72   :  { %4412 = vmatprep.mubr.msk.f32.mxu0 %vm189_vm0, %v77_v59  ;;  %v134_v59 = vld [vmem:[%s9687_s0 + $0x310] sm:$0xff] }
  0x75   :  { %547 = vmatmul.mubr.f32.gmra.mxu0 %v76_v60 }
  0x76   :  { %4413 = vmatprep.mubr.msk.f32.mxu0 %vm189_vm0, %v79_v61  ;;  %v137_v61 = vld [vmem:[%s9687_s0 + $0x328] sm:$0xff] }
  0x79   :  { %552 = vmatmul.mubr.f32.gmra.mxu0 %v78_v62 }
  0x7a   :  { %4414 = vmatprep.mubr.msk.f32.mxu0 %vm189_vm0, %v81_v63 }
  0x7d   :  { %557 = vmatmul.mubr.f32.gmra.mxu0 %v80_v0  ;;  %v5138_v0 = vshrl.u32 %v895_v57, 7 }
  0x7e   :  { %4415 = vmatprep.mubr.msk.f32.mxu0 %vm189_vm0, %v83_v2 }
  0x7f   :  { %9954 = vst [vmem:[#allocation6_spill] sm:$0xff] %v5138_v0  ;;  %vm1026_vm1 = vcmp.lt.s32.totalorder %v5138_v0, 7  ;;  %vm897_vm2 = vcmp.lt.s32.totalorder %v5138_v0, 1 }
  0x81   :  { %562 = vmatmul.mubr.f32.gmra.mxu0 %v82_v3  ;;  %v136_v3 = vld [vmem:[%s9687_s0 + $0x320] sm:$0xff] }
  0x82   :  { %4416 = vmatprep.mubr.msk.f32.mxu0 %vm189_vm0, %v85_v4 }
  0x85   :  { %567 = vmatmul.mubr.f32.gmra.mxu0 %v84_v5 }
  0x86   :  { %4417 = vmatprep.mubr.msk.f32.mxu0 %vm189_vm0, %v87_v6  ;;  %v139_v6 = vld [vmem:[%s9687_s0 + $0x338] sm:$0xff] }
  0x89   :  { %572 = vmatmul.mubr.f32.gmra.mxu0 %v86_v7 }
  0x8a   :  { %4418 = vmatprep.mubr.msk.f32.mxu0 %vm189_vm0, %v89_v8 }
  0x8d   :  { %577 = vmatmul.mubr.f32.gmra.mxu0 %v88_v9  ;;  %v138_v9 = vld [vmem:[%s9687_s0 + $0x330] sm:$0xff] }
  0x8e   :  { %4419 = vmatprep.mubr.msk.f32.mxu0 %vm189_vm0, %v91_v10 }
  0x91   :  { %582 = vmatmul.mubr.f32.gmra.mxu0 %v90_v11 }
  0x92   :  { %4420 = vmatprep.mubr.msk.f32.mxu0 %vm189_vm0, %v93_v12 }
  0x95   :  { %587 = vmatmul.mubr.f32.gmra.mxu0 %v92_v13 }
  0x96   :  { %4421 = vmatprep.mubr.msk.f32.mxu0 %vm189_vm0, %v95_v14  ;;  %v141_v14 = vld [vmem:[%s9687_s0 + $0x348] sm:$0xff] }
  0x99   :  { %592 = vmatmul.mubr.f32.gmra.mxu0 %v94_v15 }
  0x9a   :  { %4422 = vmatprep.mubr.msk.f32.mxu0 %vm189_vm0, %v97_v16 }
  0x9d   :  { %597 = vmatmul.mubr.f32.gmra.mxu0 %v96_v17 }
  0x9e   :  { %4423 = vmatprep.mubr.msk.f32.mxu0 %vm189_vm0, %v99_v18 }
  0xa1   :  { %602 = vmatmul.mubr.f32.gmra.mxu0 %v98_v19  ;;  %v140_v19 = vld [vmem:[%s9687_s0 + $0x340] sm:$0xff] }
  0xa2   :  { %4424 = vmatprep.mubr.msk.f32.mxu0 %vm189_vm0, %v101_v20 }
  0xa5   :  { %607 = vmatmul.mubr.f32.gmra.mxu0 %v100_v21 }
  0xa6   :  { %4425 = vmatprep.mubr.msk.f32.mxu0 %vm189_vm0, %v103_v22 }
  0xa9   :  { %612 = vmatmul.mubr.f32.gmra.mxu0 %v102_v23  ;;  %v143_v23 = vld [vmem:[%s9687_s0 + $0x358] sm:$0xff] }
  0xaa   :  { %4426 = vmatprep.mubr.msk.f32.mxu0 %vm189_vm0, %v105_v24 }
  0xad   :  { %617 = vmatmul.mubr.f32.gmra.mxu0 %v104_v25 }
  0xae   :  { %4427 = vmatprep.mubr.msk.f32.mxu0 %vm189_vm0, %v107_v26 }
  0xb1   :  { %622 = vmatmul.mubr.f32.gmra.mxu0 %v106_v27  ;;  %v142_v27 = vld [vmem:[%s9687_s0 + $0x350] sm:$0xff] }
  0xb2   :  { %4428 = vmatprep.mubr.msk.f32.mxu0 %vm189_vm0, %v109_v28 }
  0xb5   :  { %627 = vmatmul.mubr.f32.gmra.mxu0 %v108_v29  ;;  %v3082_v29 = vld [vmem:[%s9689_s2 + $0x8] sm:$0xff] }
  0xb6   :  { %4429 = vmatprep.mubr.msk.f32.mxu0 %vm189_vm0, %v111_v30 }
  0xb9   :  { %632 = vmatmul.mubr.f32.gmra.mxu0 %v110_v31  ;;  %v145_v31 = vld [vmem:[%s9687_s0 + $0x368] sm:$0xff] }
  0xba   :  { %4430 = vmatprep.mubr.msk.f32.mxu0 %vm189_vm0, %v113_v32 }
  0xbd   :  { %637 = vmatmul.mubr.f32.gmra.mxu0 %v112_v33 }
  0xbe   :  { %4431 = vmatprep.mubr.msk.f32.mxu0 %vm189_vm0, %v115_v34 }
  0xc1   :  { %642 = vmatmul.mubr.f32.gmra.mxu0 %v114_v35 }
  0xc2   :  { %4432 = vmatprep.mubr.msk.f32.mxu0 %vm189_vm0, %v117_v36  ;;  %v144_v36 = vld [vmem:[%s9687_s0 + $0x360] sm:$0xff] }
  0xc5   :  { %647 = vmatmul.mubr.f32.gmra.mxu0 %v116_v37 }
  0xc6   :  { %4433 = vmatprep.mubr.msk.f32.mxu0 %vm189_vm0, %v119_v38  ;;  %v147_v38 = vld [vmem:[%s9687_s0 + $0x378] sm:$0xff] }
  0xc9   :  { %652 = vmatmul.mubr.f32.gmra.mxu0 %v118_v39 }
  0xca   :  { %4434 = vmatprep.mubr.msk.f32.mxu0 %vm189_vm0, %v121_v40  ;;  %v146_v40 = vld [vmem:[%s9687_s0 + $0x370] sm:$0xff] }
  0xcd   :  { %657 = vmatmul.mubr.f32.gmra.mxu0 %v120_v41 }
  0xce   :  { %4435 = vmatprep.mubr.msk.f32.mxu0 %vm189_vm0, %v123_v42  ;;  %v149_v42 = vld [vmem:[%s9687_s0 + $0x388] sm:$0xff] }
  0xd1   :  { %662 = vmatmul.mubr.f32.gmra.mxu0 %v122_v43 }
  0xd2   :  { %4436 = vmatprep.mubr.msk.f32.mxu0 %vm189_vm0, %v125_v44 }
  0xd5   :  { %667 = vmatmul.mubr.f32.gmra.mxu0 %v124_v45  ;;  %v148_v45 = vld [vmem:[%s9687_s0 + $0x380] sm:$0xff] }
  0xd6   :  { %4437 = vmatprep.mubr.msk.f32.mxu0 %vm189_vm0, %v127_v46 }
  0xd9   :  { %672 = vmatmul.mubr.f32.gmra.mxu0 %v126_v47  ;;  %v151_v47 = vld [vmem:[%s9687_s0 + $0x398] sm:$0xff] }
  0xda   :  { %4438 = vmatprep.mubr.msk.f32.mxu0 %vm189_vm0, %v129_v48 }
  0xdd   :  { %677 = vmatmul.mubr.f32.gmra.mxu0 %v128_v49 }
  0xde   :  { %4439 = vmatprep.mubr.msk.f32.mxu0 %vm189_vm0, %v131_v50 }
  0xe1   :  { %682 = vmatmul.mubr.f32.gmra.mxu0 %v130_v51  ;;  %v150_v51 = vld [vmem:[%s9687_s0 + $0x390] sm:$0xff] }
  0xe2   :  { %4440 = vmatprep.mubr.msk.f32.mxu0 %vm189_vm0, %v133_v52 }
  0xe5   :  { %v448_v56 = vpop.f32.mrf.mxu0  ;;  %687 = vmatmul.mubr.f32.gmra.mxu0 %v132_v53  ;;  %v153_v53 = vld [vmem:[%s9687_s0 + $0x3a8] sm:$0xff] }
  0xe6   :  { %v449_v58 = vadd.f32 %v5123_v54, %v448_v56  ;;  %4441 = vmatprep.mubr.msk.f32.mxu0 %vm189_vm0, %v135_v55 }
  0xe7   :  { %v450_v60 = vpop.f32.mrf.mxu0 }
  0xe8   :  { %v5136_v62 = vmax.f32 %v449_v58, 0.0  ;;  %v152_v60 = vld [vmem:[%s9687_s0 + $0x3a0] sm:$0xff] }
  0xe9   :  { %v453_v63 = vpop.f32.mrf.mxu0  ;;  %692 = vmatmul.mubr.f32.gmra.mxu0 %v134_v59 }
  0xea   :  { %9953 = vst [vmem:[#allocation5_spill] sm:$0xff] %v5136_v62  ;;  %v454_v2 = vadd.f32 %v5123_v54, %v453_v63  ;;  %1859 = vrot.lane.b32.xlu1 %v5136_v62, %s4639_s23  ;;  %4442 = vmatprep.mubr.msk.f32.mxu0 %vm189_vm0, %v137_v61  ;;  %v9698_v10 = vrot.slane %v5136_v62, 1  ;;  %v9699_v21 = vrot.slane %v5136_v62, 7 }
  0xeb   :  { %v455_v4 = vpop.f32.mrf.mxu0 }
  0xec   :  { %v5147_v5 = vmax.f32 %v454_v2, 0.0  ;;  %v155_v2 = vld [vmem:[%s9687_s0 + $0x3b8] sm:$0xff] }
  0xed   :  { %v458_v7 = vpop.f32.mrf.mxu0  ;;  %697 = vmatmul.mubr.f32.gmra.mxu0 %v136_v3 }
  0xee   :  { %9955 = vst [vmem:[#allocation7_spill] sm:$0xff] %v5147_v5  ;;  %v459_v8 = vadd.f32 %v5123_v54, %v458_v7  ;;  %1861 = vrot.lane.b32.xlu0 %v5147_v5, %s4639_s23  ;;  %1159 = vrot.lane.b32.xlu1 %v5136_v62, %s4640_s28  ;;  %v963_v11 = vrot.slane %v5147_v5, 1  ;;  %v832_v17 = vrot.slane %v5147_v5, 7 }
  0xef   :  { %v460_v12 = vpop.f32.mrf.mxu0  ;;  %4443 = vmatprep.mubr.msk.f32.mxu0 %vm189_vm0, %v139_v6 }
  0xf0   :  { %v5168_v13 = vsel %vm1026_vm1, %v9698_v10, %v963_v11  ;;  %v5173_v15 = vmax.f32 %v459_v8, 0.0  ;;  %v5196_v25 = vsel %vm897_vm2, %v9699_v21, %v832_v17 }
  0xf1   :  { %9956 = vst [vmem:[#allocation8_spill] sm:$0xff] %v5168_v13  ;;  %v463_v16 = vpop.f32.mrf.mxu0  ;;  %702 = vmatmul.mubr.f32.gmra.mxu0 %v138_v9  ;;  %9957 = vst [vmem:[#allocation9_spill] sm:$0xff] %v5196_v25  ;;  %v154_v9 = vld [vmem:[%s9687_s0 + $0x3b0] sm:$0xff] }
  0xf2   :  { %v464_v18 = vadd.f32 %v5123_v54, %v463_v16  ;;  %1161 = vrot.lane.b32.xlu0 %v5147_v5, %s4640_s28  ;;  %2051 = vrot.lane.b32.xlu1 %v5168_v13, %s4641_s13  ;;  %v964_v26 = vrot.slane %v5173_v15, 1  ;;  %v833_v44 = vrot.slane %v5173_v15, 7 }
  0xf3   :  { %v465_v20 = vpop.f32.mrf.mxu0  ;;  %4444 = vmatprep.mubr.msk.f32.mxu0 %vm189_vm0, %v141_v14 }
  0xf4   :  { %v5187_v22 = vmax.f32 %v464_v18, 0.0  ;;  %v5224_v34 = vsel %vm1026_vm1, %v963_v11, %v964_v26  ;;  %v5268_v49 = vsel %vm897_vm2, %v832_v17, %v833_v44  ;;  %v157_v17 = vld [vmem:[%s9687_s0 + $0x3c8] sm:$0xff] }
  0xf5   :  { %v468_v24 = vpop.f32.mrf.mxu0  ;;  %707 = vmatmul.mubr.f32.gmra.mxu0 %v140_v19  ;;  %9958 = vst [vmem:[#allocation10_spill] sm:$0xff] %v5224_v34  ;;  %9959 = vst [vmem:[#allocation11_spill] sm:$0xff] %v5268_v49 }
  0xf6   :  { %1415 = vrot.lane.b32.xlu1 %v5168_v13, %s4642_s17  ;;  %1669 = vrot.lane.b32.xlu0 %v5196_v25, %s4643_s18  ;;  %v965_v28 = vrot.slane %v5187_v22, 1  ;;  %v469_v55 = vadd.f32 %v5123_v54, %v468_v24  ;;  %v834_v58 = vrot.slane %v5187_v22, 7 }
  0xf7   :  { %v470_v30 = vpop.f32.mrf.mxu0  ;;  %4445 = vmatprep.mubr.msk.f32.mxu0 %vm189_vm0, %v143_v23 }
  0xf8   :  { %v5218_v32 = vsel %vm1026_vm1, %v964_v26, %v965_v28  ;;  %v5300_v3 = vmax.f32 %v469_v55, 0.0  ;;  %v5306_v6 = vsel %vm897_vm2, %v833_v44, %v834_v58  ;;  %v156_v26 = vld [vmem:[%s9687_s0 + $0x3c0] sm:$0xff] }
  0xf9   :  { %v5220_v33 = vpop.f32.mrf.mxu0  ;;  %712 = vmatmul.mubr.f32.gmra.mxu0 %v142_v27  ;;  %v3210_v35 = vmul.f32 %v3082_v29, %v5218_v32  ;;  %9960 = vst [vmem:[#allocation12_spill] sm:$0xff] %v5306_v6  ;;  %v10382_v0 = vld [vmem:[#allocation9_spill] sm:$0xff] }
  0xfa   :  { %2435 = vrot.lane.b32.xlu1 %v5173_v15, %s4644_s26  ;;  %2053 = vrot.lane.b32.xlu0 %v5224_v34, %s4641_s13  ;;  %v966_v23 = vrot.slane %v5300_v3, 1 }
  0xfb   :  { %v475_v37 = vpop.f32.mrf.mxu0  ;;  %4446 = vmatprep.mubr.msk.f32.mxu0 %vm189_vm0, %v145_v31  ;;  %4457 = vmatprep.mubr.msk.f32.mxu1 %vm189_vm0, %v3210_v35 }
  0xfd   :  { %v5239_v39 = vpop.f32.mrf.mxu0  ;;  %717 = vmatmul.mubr.f32.gmra.mxu0 %v144_v36 }
  0xfe   :  { %1863 = vrot.lane.b32.xlu1 %v5173_v15, %s4639_s23  ;;  %1417 = vrot.lane.b32.xlu0 %v5224_v34, %s4642_s17 }
  0xff   :  { %v480_v41 = vpop.f32.mrf.mxu0  ;;  %4447 = vmatprep.mubr.msk.f32.mxu0 %vm189_vm0, %v147_v38  ;;  %v5369_v38 = vsel %vm1026_vm1, %v965_v28, %v966_v23  ;;  %v474_v28 = vadd.f32 %v5123_v54, %v5220_v33  ;;  %v160_v33 = vld [vmem:[%s9687_s0 + $0x3e0] sm:$0xff] }
 0x100   :  { %9965 = vst [vmem:[#allocation17_spill] sm:$0xff] %v5369_v38  ;;  %v158_v41 = vld [vmem:[%s9687_s0 + $0x3d0] sm:$0xff] }
 0x101   :  { %v5252_v43 = vpop.f32.mrf.mxu0  ;;  %722 = vmatmul.mubr.f32.gmra.mxu0 %v146_v40 }
 0x102   :  { %1163 = vrot.lane.b32.xlu1 %v5173_v15, %s4640_s28  ;;  %2437 = vrot.lane.b32.xlu0 %v5187_v22, %s4644_s26 }
 0x103   :  { %v485_v46 = vpop.f32.mrf.mxu0  ;;  %4448 = vmatprep.mubr.msk.f32.mxu0 %vm189_vm0, %v149_v42 }
 0x105   :  { %v488_v48 = vpop.f32.mrf.mxu0  ;;  %727 = vmatmul.mubr.f32.gmra.mxu0 %v148_v45 }
 0x106   :  { %v489_v50 = vadd.f32 %v5123_v54, %v488_v48  ;;  %2243 = vrot.lane.b32.xlu1 %v5268_v49, %s4645_s22  ;;  %1865 = vrot.lane.b32.xlu0 %v5187_v22, %s4639_s23 }
 0x107   :  { %v490_v52 = vpop.f32.mrf.mxu0  ;;  %4449 = vmatprep.mubr.msk.f32.mxu0 %vm189_vm0, %v151_v47  ;;  %v161_v47 = vld [vmem:[%s9687_s0 + $0x3e8] sm:$0xff] }
 0x108   :  { %v5283_v56 = vmax.f32 %v489_v50, 0.0 }
 0x109   :  { %v493_v57 = vpop.f32.mrf.mxu0  ;;  %732 = vmatmul.mubr.f32.gmra.mxu0 %v150_v51 }
 0x10a   :  { %v494_v59 = vadd.f32 %v5123_v54, %v493_v57  ;;  %1671 = vrot.lane.b32.xlu1 %v5268_v49, %s4643_s18  ;;  %1165 = vrot.lane.b32.xlu0 %v5187_v22, %s4640_s28  ;;  %v9703_v7 = vrot.slane %v5283_v56, 1  ;;  %v9702_v11 = vrot.slane %v5283_v56, 7 }
 0x10b   :  { %v495_v61 = vpop.f32.mrf.mxu0  ;;  %4450 = vmatprep.mubr.msk.f32.mxu0 %vm189_vm0, %v153_v53 }
 0x10c   :  { %v5295_v63 = vmax.f32 %v494_v59, 0.0  ;;  %v5408_v59 = vmax.f32 %v474_v28, 0.0  ;;  %v163_v61 = vld [vmem:[%s9687_s0 + $0x3f8] sm:$0xff] }
 0x10d   :  { %v498_v4 = vpop.f32.mrf.mxu0  ;;  %737 = vmatmul.mubr.f32.gmra.mxu0 %v152_v60 }
 0x10e   :  { %v499_v8 = vadd.f32 %v5123_v54, %v498_v4  ;;  %2055 = vrot.lane.b32.xlu1 %v5218_v32, %s4641_s13  ;;  %2245 = vrot.lane.b32.xlu0 %v5306_v6, %s4645_s22  ;;  %v971_v12 = vrot.slane %v5295_v63, 1  ;;  %v840_v14 = vrot.slane %v5295_v63, 7  ;;  %v967_v28 = vrot.slane %v5408_v59, 1 }
 0x10f   :  { %v500_v15 = vpop.f32.mrf.mxu0  ;;  %4451 = vmatprep.mubr.msk.f32.mxu0 %vm189_vm0, %v155_v2 }
 0x110   :  { %v5321_v16 = vmax.f32 %v499_v8, 0.0  ;;  %v5330_v18 = vsel %vm1026_vm1, %v9703_v7, %v971_v12  ;;  %v5336_v19 = vsel %vm897_vm2, %v9702_v11, %v840_v14 }
 0x111   :  { %9961 = vst [vmem:[#allocation13_spill] sm:$0xff] %v5330_v18  ;;  %9962 = vst [vmem:[#allocation14_spill] sm:$0xff] %v5336_v19  ;;  %v503_v20 = vpop.f32.mrf.mxu0  ;;  %742 = vmatmul.mubr.f32.gmra.mxu0 %v154_v9  ;;  %v835_v9 = vrot.slane %v5300_v3, 7 }
 0x112   :  { %v504_v24 = vadd.f32 %v5123_v54, %v503_v20  ;;  %1419 = vrot.lane.b32.xlu1 %v5218_v32, %s4642_s17  ;;  %1673 = vrot.lane.b32.xlu0 %v5306_v6, %s4643_s18  ;;  %v972_v27 = vrot.slane %v5321_v16, 1  ;;  %v841_v29 = vrot.slane %v5321_v16, 7  ;;  %v159_v32 = vld [vmem:[%s9687_s0 + $0x3d8] sm:$0xff] }
 0x113   :  { %v505_v30 = vpop.f32.mrf.mxu0  ;;  %4452 = vmatprep.mubr.msk.f32.mxu0 %vm189_vm0, %v157_v17 }
 0x114   :  { %v5350_v31 = vmax.f32 %v504_v24, 0.0  ;;  %v5357_v35 = vsel %vm1026_vm1, %v971_v12, %v972_v27  ;;  %v5361_v36 = vsel %vm897_vm2, %v840_v14, %v841_v29  ;;  %v162_v14 = vld [vmem:[%s9687_s0 + $0x3f0] sm:$0xff]  ;;  %v5449_v30 = vsel %vm897_vm2, %v834_v58, %v835_v9 }
 0x115   :  { %9963 = vst [vmem:[#allocation15_spill] sm:$0xff] %v5357_v35  ;;  %9964 = vst [vmem:[#allocation16_spill] sm:$0xff] %v5361_v36  ;;  %v508_v37 = vpop.f32.mrf.mxu0  ;;  %747 = vmatmul.mubr.f32.gmra.mxu0 %v156_v26 }
 0x116   :  { %v509_v40 = vadd.f32 %v5123_v54, %v508_v37  ;;  %2439 = vrot.lane.b32.xlu1 %v5300_v3, %s4644_s26  ;;  %2057 = vrot.lane.b32.xlu0 %v5369_v38, %s4641_s13  ;;  %v973_v42 = vrot.slane %v5350_v31, 1  ;;  %v842_v44 = vrot.slane %v5350_v31, 7  ;;  %9972 = vst [vmem:[#allocation24_spill] sm:$0xff] %v5449_v30 }
 0x117   :  { %v510_v45 = vpop.f32.mrf.mxu0  ;;  %4453 = vmatprep.mubr.msk.f32.mxu0 %vm189_vm0, %v159_v32 }
 0x118   :  { %v5384_v46 = vmax.f32 %v509_v40, 0.0  ;;  %v5391_v48 = vsel %vm1026_vm1, %v972_v27, %v973_v42  ;;  %v5395_v50 = vsel %vm897_vm2, %v841_v29, %v842_v44 }
 0x119   :  { %9966 = vst [vmem:[#allocation18_spill] sm:$0xff] %v5391_v48  ;;  %9967 = vst [vmem:[#allocation19_spill] sm:$0xff] %v5395_v50  ;;  %v513_v51 = vpop.f32.mrf.mxu0  ;;  %752 = vmatmul.mubr.f32.gmra.mxu0 %v158_v41 }
 0x11a   :  { %v514_v52 = vadd.f32 %v5123_v54, %v513_v51  ;;  %1867 = vrot.lane.b32.xlu1 %v5300_v3, %s4639_s23  ;;  %1421 = vrot.lane.b32.xlu0 %v5369_v38, %s4642_s17  ;;  %v974_v53 = vrot.slane %v5384_v46, 1  ;;  %v843_v55 = vrot.slane %v5384_v46, 7 }
 0x11b   :  { %v515_v57 = vpop.f32.mrf.mxu0  ;;  %4454 = vmatprep.mubr.msk.f32.mxu0 %vm189_vm0, %v161_v47  ;;  %v836_v47 = vrot.slane %v5408_v59, 7 }
 0x11c   :  { %v5410_v60 = vmax.f32 %v514_v52, 0.0  ;;  %v5417_v2 = vsel %vm1026_vm1, %v973_v42, %v974_v53  ;;  %v5421_v4 = vsel %vm897_vm2, %v842_v44, %v843_v55  ;;  %v479_v44 = vadd.f32 %v5123_v54, %v5239_v39 }
 0x11d   :  { %9968 = vst [vmem:[#allocation20_spill] sm:$0xff] %v5417_v2  ;;  %9969 = vst [vmem:[#allocation21_spill] sm:$0xff] %v5421_v4  ;;  %v518_v8 = vpop.f32.mrf.mxu0  ;;  %757 = vmatmul.mubr.f32.gmra.mxu0 %v160_v33 }
 0x11e   :  { %v519_v12 = vadd.f32 %v5123_v54, %v518_v8  ;;  %1167 = vrot.lane.b32.xlu1 %v5300_v3, %s4640_s28  ;;  %2441 = vrot.lane.b32.xlu0 %v5408_v59, %s4644_s26  ;;  %v975_v15 = vrot.slane %v5410_v60, 1  ;;  %v844_v17 = vrot.slane %v5410_v60, 7 }
 0x11f   :  { %v520_v20 = vpop.f32.mrf.mxu0  ;;  %4455 = vmatprep.mubr.msk.f32.mxu0 %vm189_vm0, %v163_v61  ;;  %v773_v61 = vmax.f32 %v479_v44, 0.0  ;;  %v484_v44 = vadd.f32 %v5123_v54, %v5252_v43 }
 0x120   :  { %v5435_v24 = vmax.f32 %v519_v12, 0.0  ;;  %v5439_v26 = vsel %vm1026_vm1, %v974_v53, %v975_v15  ;;  %v5443_v27 = vsel %vm897_vm2, %v843_v55, %v844_v17  ;;  %v5497_v12 = vsel %vm897_vm2, %v835_v9, %v836_v47 }
 0x121   :  { %9970 = vst [vmem:[#allocation22_spill] sm:$0xff] %v5439_v26  ;;  %9971 = vst [vmem:[#allocation23_spill] sm:$0xff] %v5443_v27  ;;  %v523_v29 = vpop.f32.mrf.mxu0  ;;  %762 = vmatmul.mubr.f32.gmra.mxu0 %v162_v14  ;;  %v968_v20 = vrot.slane %v773_v61, 1 }
 0x122   :  { %v524_v32 = vadd.f32 %v5123_v54, %v523_v29  ;;  %2247 = vrot.lane.b32.xlu1 %v5449_v30, %s4645_s22  ;;  %1869 = vrot.lane.b32.xlu0 %v5408_v59, %s4639_s23  ;;  %v976_v37 = vrot.slane %v5435_v24, 1  ;;  %v845_v40 = vrot.slane %v5435_v24, 7  ;;  %9978 = vst [vmem:[#allocation30_spill] sm:$0xff] %v5497_v12 }
 0x123   :  { %v525_v41 = vpop.f32.mrf.mxu0 }
 0x124   :  { %v5458_v42 = vmax.f32 %v524_v32, 0.0  ;;  %v5462_v22 = vsel %vm1026_vm1, %v975_v15, %v976_v37  ;;  %v5466_v58 = vsel %vm897_vm2, %v844_v17, %v845_v40 }
 0x125   :  { %9973 = vst [vmem:[#allocation25_spill] sm:$0xff] %v5462_v22  ;;  %9974 = vst [vmem:[#allocation26_spill] sm:$0xff] %v5466_v58  ;;  %v528_v45 = vpop.f32.mrf.mxu0 }
 0x126   :  { %v529_v51 = vadd.f32 %v5123_v54, %v528_v45  ;;  %1675 = vrot.lane.b32.xlu1 %v5449_v30, %s4643_s18  ;;  %1169 = vrot.lane.b32.xlu0 %v5408_v59, %s4640_s28  ;;  %v977_v52 = vrot.slane %v5458_v42, 1  ;;  %v846_v33 = vrot.slane %v5458_v42, 7  ;;  %v5493_v59 = vsel %vm1026_vm1, %v966_v23, %v967_v28 }
 0x127   :  { %v530_v53 = vpop.f32.mrf.mxu0  ;;  %9977 = vst [vmem:[#allocation29_spill] sm:$0xff] %v5493_v59 }
 0x128   :  { %v5479_v55 = vmax.f32 %v529_v51, 0.0  ;;  %v5483_v39 = vsel %vm1026_vm1, %v976_v37, %v977_v52  ;;  %v5487_v57 = vsel %vm897_vm2, %v845_v40, %v846_v33  ;;  %v5519_v37 = vsel %vm1026_vm1, %v967_v28, %v968_v20 }
 0x129   :  { %9975 = vst [vmem:[#allocation27_spill] sm:$0xff] %v5483_v39  ;;  %9976 = vst [vmem:[#allocation28_spill] sm:$0xff] %v5487_v57  ;;  %v533_v8 = vpop.f32.mrf.mxu0  ;;  %v837_v53 = vrot.slane %v773_v61, 7 }
 0x12a   :  { %2059 = vrot.lane.b32.xlu1 %v5493_v59, %s4641_s13  ;;  %2249 = vrot.lane.b32.xlu0 %v5497_v12, %s4645_s22  ;;  %v978_v14 = vrot.slane %v5479_v55, 1  ;;  %v847_v15 = vrot.slane %v5479_v55, 7  ;;  %9981 = vst [vmem:[#allocation33_spill] sm:$0xff] %v5519_v37  ;;  %v534_v40 = vadd.f32 %v5123_v54, %v533_v8 }
 0x12b   :  { %v535_v17 = vpop.f32.mrf.mxu0 }
 0x12c   :  { %v5507_v3 = vsel %vm1026_vm1, %v977_v52, %v978_v14  ;;  %v5511_v23 = vsel %vm897_vm2, %v846_v33, %v847_v15  ;;  %v5532_v28 = vmax.f32 %v534_v40, 0.0  ;;  %v774_v52 = vmax.f32 %v484_v44, 0.0 }
 0x12d   :  { %9979 = vst [vmem:[#allocation31_spill] sm:$0xff] %v5507_v3  ;;  %9980 = vst [vmem:[#allocation32_spill] sm:$0xff] %v5511_v23  ;;  %v538_v9 = vpop.f32.mrf.mxu0  ;;  %v5544_v40 = vsel %vm897_vm2, %v836_v47, %v837_v53 }
 0x12e   :  { %1423 = vrot.lane.b32.xlu1 %v5493_v59, %s4642_s17  ;;  %1677 = vrot.lane.b32.xlu0 %v5497_v12, %s4643_s18  ;;  %v979_v43 = vrot.slane %v5532_v28, 1  ;;  %v848_v17 = vrot.slane %v5532_v28, 7  ;;  %9982 = vst [vmem:[#allocation34_spill] sm:$0xff] %v5544_v40  ;;  %v539_v44 = vadd.f32 %v5123_v54, %v538_v9  ;;  %v969_v47 = vrot.slane %v774_v52, 1 }
 0x12f   :  { %v540_v29 = vpop.f32.mrf.mxu0  ;;  %v838_v10 = vrot.slane %v774_v52, 7 }
 0x130   :  { %v5560_v21 = vmax.f32 %v539_v44, 0.0  ;;  %v5569_v9 = vsel %vm1026_vm1, %v968_v20, %v969_v47 }
 0x131   :  { %v543_v32 = vpop.f32.mrf.mxu0  ;;  %9985 = vst [vmem:[#allocation37_spill] sm:$0xff] %v5569_v9 }
 0x132   :  { %2443 = vrot.lane.b32.xlu1 %v773_v61, %s4644_s26  ;;  %2061 = vrot.lane.b32.xlu0 %v5519_v37, %s4641_s13  ;;  %v980_v44 = vrot.slane %v5560_v21, 1 }
 0x133   :  { %v545_v41 = vpop.f32.mrf.mxu0 }
 0x134   :  { %v5548_v41 = vsel %vm1026_vm1, %v978_v14, %v979_v43  ;;  %v5583_v1 = vsel %vm1026_vm1, %v979_v43, %v980_v44 }
 0x135   :  { %v5527_v45 = vpop.f32.mrf.mxu0  ;;  %9983 = vst [vmem:[#allocation35_spill] sm:$0xff] %v5548_v41  ;;  %9987 = vst [vmem:[#allocation39_spill] sm:$0xff] %v5583_v1 }
 0x136   :  { %1871 = vrot.lane.b32.xlu1 %v773_v61, %s4639_s23  ;;  %1425 = vrot.lane.b32.xlu0 %v5519_v37, %s4642_s17 }
 0x137   :  { %v550_v51 = vpop.f32.mrf.mxu0 }
 0x139   :  { %v5534_v33 = vpop.f32.mrf.mxu0 }
 0x13a   :  { %1171 = vrot.lane.b32.xlu1 %v773_v61, %s4640_s28  ;;  %2445 = vrot.lane.b32.xlu0 %v774_v52, %s4644_s26  ;;  %v5552_v61 = vsel %vm897_vm2, %v847_v15, %v848_v17 }
 0x13b   :  { %v555_v8 = vpop.f32.mrf.mxu0  ;;  %9984 = vst [vmem:[#allocation36_spill] sm:$0xff] %v5552_v61 }
 0x13d   :  { %v5540_v29 = vpop.f32.mrf.mxu0 }
 0x13e   :  { %2251 = vrot.lane.b32.xlu1 %v5544_v40, %s4645_s22  ;;  %1873 = vrot.lane.b32.xlu0 %v774_v52, %s4639_s23 }
 0x13f   :  { %v560_v51 = vpop.f32.mrf.mxu0 }
 0x140   :  { %v5573_v51 = vsel %vm897_vm2, %v837_v53, %v838_v10 }
 0x141   :  { %v5558_v8 = vpop.f32.mrf.mxu0  ;;  %9986 = vst [vmem:[#allocation38_spill] sm:$0xff] %v5573_v51 }
 0x142   :  { %1679 = vrot.lane.b32.xlu1 %v5544_v40, %s4643_s18  ;;  %1173 = vrot.lane.b32.xlu0 %v774_v52, %s4640_s28  ;;  %v849_v52 = vrot.slane %v5560_v21, 7  ;;  %v9991_v40 = vrot.slane %v5283_v56, 7 }
 0x143   :  { %v565_v14 = vpop.f32.mrf.mxu0 }
 0x144   :  { %v5587_v20 = vsel %vm897_vm2, %v848_v17, %v849_v52  ;;  %v544_v17 = vadd.f32 %v5123_v54, %v543_v32 }
 0x145   :  { %v5565_v15 = vpop.f32.mrf.mxu0  ;;  %9988 = vst [vmem:[#allocation40_spill] sm:$0xff] %v5587_v20 }
 0x146   :  { %2063 = vrot.lane.b32.xlu1 %v5569_v9, %s4641_s13  ;;  %2253 = vrot.lane.b32.xlu0 %v5573_v51, %s4645_s22 }
 0x147   :  { %v570_v14 = vpop.f32.mrf.mxu0 }
 0x148   :  { %v9989_v14 = vrot.slane %v5283_v56, 1 }
 0x149   :  { %v5589_v53 = vpop.f32.mrf.mxu0 }
 0x14a   :  { %1427 = vrot.lane.b32.xlu1 %v5569_v9, %s4642_s17  ;;  %1681 = vrot.lane.b32.xlu0 %v5573_v51, %s4643_s18  ;;  %v5601_v43 = vsel %vm1026_vm1, %v969_v47, %v9989_v14 }
 0x14b   :  { %v575_v11 = vpop.f32.mrf.mxu0  ;;  %9990 = vst [vmem:[#allocation41_spill] sm:$0xff] %v5601_v43 }
 0x14c   :  { %v5614_v11 = vmax.f32 %v544_v17, 0.0  ;;  %v5630_v17 = vsel %vm897_vm2, %v838_v10, %v9991_v40 }
 0x14d   :  { %v5595_v7 = vpop.f32.mrf.mxu0  ;;  %9992 = vst [vmem:[#allocation42_spill] sm:$0xff] %v5630_v17 }
 0x14e   :  { %2447 = vrot.lane.b32.xlu1 %v5283_v56, %s4644_s26  ;;  %2065 = vrot.lane.b32.xlu0 %v5601_v43, %s4641_s13  ;;  %v981_v32 = vrot.slane %v5614_v11, 1  ;;  %v850_v5 = vrot.slane %v5614_v11, 7 }
 0x14f   :  { %v580_v34 = vpop.f32.mrf.mxu0 }
 0x151   :  { %v5608_v13 = vpop.f32.mrf.mxu0 }
 0x152   :  { %1875 = vrot.lane.b32.xlu1 %v5283_v56, %s4639_s23  ;;  %1429 = vrot.lane.b32.xlu0 %v5601_v43, %s4642_s17  ;;  %v5638_v43 = vsel %vm897_vm2, %v849_v52, %v850_v5 }
 0x153   :  { %v585_v47 = vpop.f32.mrf.mxu0  ;;  %9994 = vst [vmem:[#allocation44_spill] sm:$0xff] %v5638_v43 }
 0x154   :  { %v5634_v47 = vsel %vm1026_vm1, %v980_v44, %v981_v32 }
 0x155   :  { %v5616_v14 = vpop.f32.mrf.mxu0  ;;  %9993 = vst [vmem:[#allocation43_spill] sm:$0xff] %v5634_v47 }
 0x156   :  { %1175 = vrot.lane.b32.xlu1 %v5283_v56, %s4640_s28  ;;  %2449 = vrot.lane.b32.xlu0 %v5295_v63, %s4644_s26 }
 0x157   :  { %v590_v34 = vpop.f32.mrf.mxu0 }
 0x158   :  { %v549_v34 = vadd.f32 %v5123_v54, %v5527_v45 }
 0x159   :  { %v5624_v51 = vpop.f32.mrf.mxu0 }
 0x15a   :  { %2255 = vrot.lane.b32.xlu1 %v5630_v17, %s4645_s22  ;;  %1877 = vrot.lane.b32.xlu0 %v5295_v63, %s4639_s23  ;;  %v5650_v44 = vmax.f32 %v549_v34, 0.0 }
 0x15b   :  { %v595_v56 = vpop.f32.mrf.mxu0 }
 0x15c   :  { %v5646_v10 = vpop.permute.xlu1 %1859  ;;  %v982_v34 = vrot.slane %v5650_v44, 1  ;;  %v851_v56 = vrot.slane %v5650_v44, 7 }
 0x15d   :  { %9995 = vst [vmem:[#allocation45_spill] sm:$0xff] %v5646_v10  ;;  %v5648_v40 = vpop.f32.mrf.mxu0 }
 0x15e   :  { %1683 = vrot.lane.b32.xlu1 %v5630_v17, %s4643_s18  ;;  %1177 = vrot.lane.b32.xlu0 %v5295_v63, %s4640_s28  ;;  %v5678_v37 = vsel %vm897_vm2, %v850_v5, %v851_v56  ;;  %v554_v5 = vadd.f32 %v5123_v54, %v5534_v33 }
 0x15f   :  { %v600_v45 = vpop.f32.mrf.mxu0  ;;  %10001 = vst [vmem:[#allocation51_spill] sm:$0xff] %v5678_v37 }
 0x160   :  { %v5656_v52 = vpop.permute.xlu0 %1861  ;;  %v5658_v12 = vpop.permute.xlu1 %1159  ;;  %v5674_v45 = vsel %vm1026_vm1, %v981_v32, %v982_v34 }
 0x161   :  { %9996 = vst [vmem:[#allocation46_spill] sm:$0xff] %v5656_v52  ;;  %9997 = vst [vmem:[#allocation47_spill] sm:$0xff] %v5658_v12  ;;  %v5660_v9 = vpop.f32.mrf.mxu0  ;;  %v5708_v52 = vmax.f32 %v554_v5, 0.0 }
 0x162   :  { %2067 = vrot.lane.b32.xlu1 %v5330_v18, %s4641_s13  ;;  %2257 = vrot.lane.b32.xlu0 %v5336_v19, %s4645_s22  ;;  %10000 = vst [vmem:[#allocation50_spill] sm:$0xff] %v5674_v45 }
 0x163   :  { %v605_v17 = vpop.f32.mrf.mxu0 }
 0x164   :  { %v5668_v30 = vpop.permute.xlu0 %1161  ;;  %v5670_v63 = vpop.permute.xlu1 %2051 }
 0x165   :  { %9998 = vst [vmem:[#allocation48_spill] sm:$0xff] %v5668_v30  ;;  %9999 = vst [vmem:[#allocation49_spill] sm:$0xff] %v5670_v63  ;;  %v5680_v6 = vpop.f32.mrf.mxu0 }
 0x166   :  { %1431 = vrot.lane.b32.xlu1 %v5330_v18, %s4642_s17  ;;  %1685 = vrot.lane.b32.xlu0 %v5336_v19, %s4643_s18 }
 0x167   :  { %v610_v17 = vpop.f32.mrf.mxu0 }
 0x168   :  { %v5686_v59 = vpop.permute.xlu1 %1415  ;;  %v5688_v49 = vpop.permute.xlu0 %1669 }
 0x169   :  { %10002 = vst [vmem:[#allocation52_spill] sm:$0xff] %v5686_v59  ;;  %10003 = vst [vmem:[#allocation53_spill] sm:$0xff] %v5688_v49  ;;  %v5690_v38 = vpop.f32.mrf.mxu0 }
 0x16a   :  { %2451 = vrot.lane.b32.xlu1 %v5321_v16, %s4644_s26  ;;  %2069 = vrot.lane.b32.xlu0 %v5357_v35, %s4641_s13 }
 0x16b   :  { %v615_v32 = vpop.f32.mrf.mxu0 }
 0x16c   :  { %v5698_v18 = vpop.permute.xlu1 %2435  ;;  %v5700_v19 = vpop.permute.xlu0 %2053 }
 0x16d   :  { %10004 = vst [vmem:[#allocation54_spill] sm:$0xff] %v5698_v18  ;;  %10005 = vst [vmem:[#allocation55_spill] sm:$0xff] %v5700_v19  ;;  %v5702_v17 = vpop.f32.mrf.mxu0  ;;  %v983_v19 = vrot.slane %v5708_v52, 1 }
 0x16e   :  { %1879 = vrot.lane.b32.xlu1 %v5321_v16, %s4639_s23  ;;  %1433 = vrot.lane.b32.xlu0 %v5357_v35, %s4642_s17  ;;  %v852_v35 = vrot.slane %v5708_v52, 7 }
 0x16f   :  { %v620_v49 = vpop.f32.mrf.mxu0 }
 0x170   :  { %v5710_v25 = vpop.permute.xlu1 %1863  ;;  %v5712_v30 = vpop.permute.xlu0 %1417 }
 0x171   :  { %10006 = vst [vmem:[#allocation56_spill] sm:$0xff] %v5710_v25  ;;  %10007 = vst [vmem:[#allocation57_spill] sm:$0xff] %v5712_v30  ;;  %v5714_v33 = vpop.f32.mrf.mxu0  ;;  %v5730_v30 = vsel %vm1026_vm1, %v982_v34, %v983_v19 }
 0x172   :  { %1179 = vrot.lane.b32.xlu1 %v5321_v16, %s4640_s28  ;;  %2453 = vrot.lane.b32.xlu0 %v5350_v31, %s4644_s26  ;;  %10010 = vst [vmem:[#allocation60_spill] sm:$0xff] %v5730_v30  ;;  %v5734_v16 = vsel %vm897_vm2, %v851_v56, %v852_v35 }
 0x173   :  { %v625_v32 = vpop.f32.mrf.mxu0  ;;  %10011 = vst [vmem:[#allocation61_spill] sm:$0xff] %v5734_v16 }
 0x174   :  { %v5722_v5 = vpop.permute.xlu1 %1163  ;;  %v5724_v49 = vpop.permute.xlu0 %2437  ;;  %v559_v32 = vadd.f32 %v5123_v54, %v5540_v29 }
 0x175   :  { %10008 = vst [vmem:[#allocation58_spill] sm:$0xff] %v5722_v5  ;;  %10009 = vst [vmem:[#allocation59_spill] sm:$0xff] %v5724_v49  ;;  %v5726_v18 = vpop.f32.mrf.mxu0 }
 0x176   :  { %2259 = vrot.lane.b32.xlu1 %v5361_v36, %s4645_s22  ;;  %1881 = vrot.lane.b32.xlu0 %v5350_v31, %s4639_s23  ;;  %v5748_v25 = vmax.f32 %v559_v32, 0.0 }
 0x177   :  { %v630_v49 = vpop.f32.mrf.mxu0 }
 0x178   :  { %v5742_v5 = vpop.permute.xlu1 %2243  ;;  %v5744_v63 = vpop.permute.xlu0 %1865  ;;  %v984_v32 = vrot.slane %v5748_v25, 1 }
 0x179   :  { %10012 = vst [vmem:[#allocation62_spill] sm:$0xff] %v5742_v5  ;;  %10013 = vst [vmem:[#allocation63_spill] sm:$0xff] %v5744_v63  ;;  %v5746_v34 = vpop.f32.mrf.mxu0 }
 0x17a   :  { %1687 = vrot.lane.b32.xlu1 %v5361_v36, %s4643_s18  ;;  %1181 = vrot.lane.b32.xlu0 %v5350_v31, %s4640_s28  ;;  %v853_v36 = vrot.slane %v5748_v25, 7 }
 0x17b   :  { %v635_v29 = vpop.f32.mrf.mxu0 }
 0x17c   :  { %v5754_v56 = vpop.permute.xlu1 %1671  ;;  %v5756_v10 = vpop.permute.xlu0 %1165  ;;  %v5772_v29 = vsel %vm1026_vm1, %v983_v19, %v984_v32  ;;  %v564_v19 = vadd.f32 %v5123_v54, %v5558_v8 }
 0x17d   :  { %10014 = vst [vmem:[#allocation64_spill] sm:$0xff] %v5754_v56  ;;  %10015 = vst [vmem:[#allocation65_spill] sm:$0xff] %v5756_v10  ;;  %v5758_v49 = vpop.f32.mrf.mxu0  ;;  %v5776_v10 = vsel %vm897_vm2, %v852_v35, %v853_v36 }
 0x17e   :  { %2071 = vrot.lane.b32.xlu1 %v5391_v48, %s4641_s13  ;;  %2261 = vrot.lane.b32.xlu0 %v5395_v50, %s4645_s22  ;;  %10018 = vst [vmem:[#allocation68_spill] sm:$0xff] %v5772_v29  ;;  %10019 = vst [vmem:[#allocation69_spill] sm:$0xff] %v5776_v10 }
 0x17f   :  { %v640_v63 = vpop.f32.mrf.mxu0 }
 0x180   :  { %v5766_v5 = vpop.permute.xlu1 %2055  ;;  %v5768_v31 = vpop.permute.xlu0 %2245 }
 0x181   :  { %10016 = vst [vmem:[#allocation66_spill] sm:$0xff] %v5766_v5  ;;  %10017 = vst [vmem:[#allocation67_spill] sm:$0xff] %v5768_v31  ;;  %v5778_v56 = vpop.f32.mrf.mxu0 }
 0x182   :  { %1435 = vrot.lane.b32.xlu1 %v5391_v48, %s4642_s17  ;;  %1689 = vrot.lane.b32.xlu0 %v5395_v50, %s4643_s18 }
 0x183   :  { %v645_v63 = vpop.f32.mrf.mxu0 }
 0x184   :  { %v5784_v5 = vpop.permute.xlu1 %1419  ;;  %v5786_v31 = vpop.permute.xlu0 %1673 }
 0x185   :  { %10020 = vst [vmem:[#allocation70_spill] sm:$0xff] %v5784_v5  ;;  %10021 = vst [vmem:[#allocation71_spill] sm:$0xff] %v5786_v31  ;;  %v5788_v59 = vpop.f32.mrf.mxu0  ;;  %v5806_v5 = vmax.f32 %v564_v19, 0.0 }
 0x186   :  { %2455 = vrot.lane.b32.xlu1 %v5384_v46, %s4644_s26  ;;  %2073 = vrot.lane.b32.xlu0 %v5417_v2, %s4641_s13 }
 0x187   :  { %v650_v35 = vpop.f32.mrf.mxu0 }
 0x188   :  { %v5796_v48 = vpop.permute.xlu1 %2439  ;;  %v5798_v50 = vpop.permute.xlu0 %2057 }
 0x189   :  { %10022 = vst [vmem:[#allocation72_spill] sm:$0xff] %v5796_v48  ;;  %10023 = vst [vmem:[#allocation73_spill] sm:$0xff] %v5798_v50  ;;  %v5800_v63 = vpop.f32.mrf.mxu0  ;;  %v854_v48 = vrot.slane %v5806_v5, 7 }
 0x18a   :  { %1883 = vrot.lane.b32.xlu1 %v5384_v46, %s4639_s23  ;;  %1437 = vrot.lane.b32.xlu0 %v5417_v2, %s4642_s17  ;;  %v985_v2 = vrot.slane %v5806_v5, 1 }
 0x18b   :  { %v655_v31 = vpop.f32.mrf.mxu0 }
 0x18c   :  { %v5808_v12 = vpop.permute.xlu1 %1867  ;;  %v5810_v62 = vpop.permute.xlu0 %1421 }
 0x18d   :  { %10024 = vst [vmem:[#allocation74_spill] sm:$0xff] %v5808_v12  ;;  %10025 = vst [vmem:[#allocation75_spill] sm:$0xff] %v5810_v62  ;;  %v5812_v8 = vpop.f32.mrf.mxu0  ;;  %v5828_v62 = vsel %vm897_vm2, %v853_v36, %v854_v48 }
 0x18e   :  { %1183 = vrot.lane.b32.xlu1 %v5384_v46, %s4640_s28  ;;  %2457 = vrot.lane.b32.xlu0 %v5410_v60, %s4644_s26  ;;  %10028 = vst [vmem:[#allocation78_spill] sm:$0xff] %v5828_v62  ;;  %v5832_v46 = vsel %vm1026_vm1, %v984_v32, %v985_v2 }
 0x18f   :  { %v660_v35 = vpop.f32.mrf.mxu0  ;;  %10029 = vst [vmem:[#allocation79_spill] sm:$0xff] %v5832_v46 }
 0x190   :  { %v5820_v19 = vpop.permute.xlu1 %1167  ;;  %v5822_v31 = vpop.permute.xlu0 %2441  ;;  %v569_v35 = vadd.f32 %v5123_v54, %v5565_v15 }
 0x191   :  { %10026 = vst [vmem:[#allocation76_spill] sm:$0xff] %v5820_v19  ;;  %10027 = vst [vmem:[#allocation77_spill] sm:$0xff] %v5822_v31  ;;  %v5824_v12 = vpop.f32.mrf.mxu0 }
 0x192   :  { %2263 = vrot.lane.b32.xlu1 %v5421_v4, %s4645_s22  ;;  %1885 = vrot.lane.b32.xlu0 %v5410_v60, %s4639_s23  ;;  %v5846_v62 = vmax.f32 %v569_v35, 0.0 }
 0x193   :  { %v665_v19 = vpop.f32.mrf.mxu0 }
 0x194   :  { %v5840_v31 = vpop.permute.xlu1 %2247  ;;  %v5842_v50 = vpop.permute.xlu0 %1869  ;;  %10032 = vst [vmem:[#allocation82_spill] sm:$0xff] %v5846_v62  ;;  %v986_v35 = vrot.slane %v5846_v62, 1 }
 0x195   :  { %10030 = vst [vmem:[#allocation80_spill] sm:$0xff] %v5840_v31  ;;  %10031 = vst [vmem:[#allocation81_spill] sm:$0xff] %v5842_v50  ;;  %v5844_v36 = vpop.f32.mrf.mxu0 }
 0x196   :  { %1691 = vrot.lane.b32.xlu1 %v5421_v4, %s4643_s18  ;;  %1185 = vrot.lane.b32.xlu0 %v5410_v60, %s4640_s28  ;;  %v855_v4 = vrot.slane %v5846_v62, 7 }
 0x197   :  { %v670_v15 = vpop.f32.mrf.mxu0 }
 0x198   :  { %v5852_v32 = vpop.permute.xlu1 %1675  ;;  %v5854_v46 = vpop.permute.xlu0 %1169  ;;  %v5870_v15 = vsel %vm1026_vm1, %v985_v2, %v986_v35 }
 0x199   :  { %10033 = vst [vmem:[#allocation83_spill] sm:$0xff] %v5852_v32  ;;  %10034 = vst [vmem:[#allocation84_spill] sm:$0xff] %v5854_v46  ;;  %v5856_v19 = vpop.f32.mrf.mxu0  ;;  %v5874_v46 = vsel %vm897_vm2, %v854_v48, %v855_v4 }
 0x19a   :  { %2075 = vrot.lane.b32.xlu1 %v5439_v26, %s4641_s13  ;;  %2265 = vrot.lane.b32.xlu0 %v5443_v27, %s4645_s22  ;;  %10037 = vst [vmem:[#allocation87_spill] sm:$0xff] %v5870_v15  ;;  %10038 = vst [vmem:[#allocation88_spill] sm:$0xff] %v5874_v46 }
 0x19b   :  { %v675_v50 = vpop.f32.mrf.mxu0 }
 0x19c   :  { %v5864_v31 = vpop.permute.xlu1 %2059  ;;  %v5866_v60 = vpop.permute.xlu0 %2249  ;;  %v574_v50 = vadd.f32 %v5123_v54, %v5589_v53 }
 0x19d   :  { %10035 = vst [vmem:[#allocation85_spill] sm:$0xff] %v5864_v31  ;;  %10036 = vst [vmem:[#allocation86_spill] sm:$0xff] %v5866_v60  ;;  %v5876_v32 = vpop.f32.mrf.mxu0 }
 0x19e   :  { %1439 = vrot.lane.b32.xlu1 %v5439_v26, %s4642_s17  ;;  %1693 = vrot.lane.b32.xlu0 %v5443_v27, %s4643_s18  ;;  %v5894_v48 = vmax.f32 %v574_v50, 0.0 }
 0x19f   :  { %v680_v31 = vpop.f32.mrf.mxu0 }
 0x1a0   :  { %v5884_v60 = vpop.permute.xlu1 %1423  ;;  %v5886_v2 = vpop.permute.xlu0 %1677 }
 0x1a1   :  { %10039 = vst [vmem:[#allocation89_spill] sm:$0xff] %v5884_v60  ;;  %10040 = vst [vmem:[#allocation90_spill] sm:$0xff] %v5886_v2  ;;  %v5888_v62 = vpop.f32.mrf.mxu0  ;;  %v856_v60 = vrot.slane %v5894_v48, 7  ;;  %v987_v2 = vrot.slane %v5894_v48, 1 }
 0x1a2   :  { %2459 = vrot.lane.b32.xlu1 %v5435_v24, %s4644_s26  ;;  %2077 = vrot.lane.b32.xlu0 %v5462_v22, %s4641_s13 }
 0x1a3   :  { %v685_v26 = vpop.f32.mrf.mxu0  ;;  %v5920_v15 = vsel %vm1026_vm1, %v986_v35, %v987_v2 }
 0x1a4   :  { %v5896_v27 = vpop.permute.xlu1 %2443  ;;  %v5898_v46 = vpop.permute.xlu0 %2061  ;;  %10046 = vst [vmem:[#allocation96_spill] sm:$0xff] %v5920_v15 }
 0x1a5   :  { %10041 = vst [vmem:[#allocation91_spill] sm:$0xff] %v5896_v27  ;;  %10042 = vst [vmem:[#allocation92_spill] sm:$0xff] %v5898_v46  ;;  %v5900_v53 = vpop.f32.mrf.mxu0  ;;  %v5916_v46 = vsel %vm897_vm2, %v855_v4, %v856_v60 }
 0x1a6   :  { %1887 = vrot.lane.b32.xlu1 %v5435_v24, %s4639_s23  ;;  %1441 = vrot.lane.b32.xlu0 %v5462_v22, %s4642_s17  ;;  %10045 = vst [vmem:[#allocation95_spill] sm:$0xff] %v5916_v46 }
 0x1a7   :  { %v690_v31 = vpop.f32.mrf.mxu0 }
 0x1a8   :  { %v5908_v50 = vpop.permute.xlu1 %1871  ;;  %v5910_v26 = vpop.permute.xlu0 %1425  ;;  %v579_v31 = vadd.f32 %v5123_v54, %v5595_v7 }
 0x1a9   :  { %10043 = vst [vmem:[#allocation93_spill] sm:$0xff] %v5908_v50  ;;  %10044 = vst [vmem:[#allocation94_spill] sm:$0xff] %v5910_v26  ;;  %v5912_v27 = vpop.f32.mrf.mxu0 }
 0x1aa   :  { %1187 = vrot.lane.b32.xlu1 %v5435_v24, %s4640_s28  ;;  %2461 = vrot.lane.b32.xlu0 %v5458_v42, %s4644_s26  ;;  %v5934_v46 = vmax.f32 %v579_v31, 0.0 }
 0x1ab   :  { %v695_v22 = vpop.f32.mrf.mxu0 }
 0x1ac   :  { %v5928_v50 = vpop.permute.xlu1 %1171  ;;  %v5930_v26 = vpop.permute.xlu0 %2445  ;;  %10049 = vst [vmem:[#allocation99_spill] sm:$0xff] %v5934_v46  ;;  %v857_v31 = vrot.slane %v5934_v46, 7 }
 0x1ad   :  { %10047 = vst [vmem:[#allocation97_spill] sm:$0xff] %v5928_v50  ;;  %10048 = vst [vmem:[#allocation98_spill] sm:$0xff] %v5930_v26  ;;  %v5932_v4 = vpop.f32.mrf.mxu0  ;;  %v584_v50 = vadd.f32 %v5123_v54, %v5608_v13  ;;  %v988_v26 = vrot.slane %v5934_v46, 1  ;;  %v589_v46 = vadd.f32 %v5123_v54, %v5616_v14 }
 0x1ae   :  { %2267 = vrot.lane.b32.xlu1 %v5466_v58, %s4645_s22  ;;  %1889 = vrot.lane.b32.xlu0 %v5458_v42, %s4639_s23 }
 0x1af   :  { %v700_v7 = vpop.f32.mrf.mxu0  ;;  %v5964_v13 = vsel %vm1026_vm1, %v987_v2, %v988_v26 }
 0x1b0   :  { %v5940_v24 = vpop.permute.xlu1 %2251  ;;  %v5942_v35 = vpop.permute.xlu0 %1873  ;;  %10055 = vst [vmem:[#allocation105_spill] sm:$0xff] %v5964_v13 }
 0x1b1   :  { %10050 = vst [vmem:[#allocation100_spill] sm:$0xff] %v5940_v24  ;;  %10051 = vst [vmem:[#allocation101_spill] sm:$0xff] %v5942_v35  ;;  %v5944_v22 = vpop.f32.mrf.mxu0  ;;  %v5960_v35 = vsel %vm897_vm2, %v856_v60, %v857_v31 }
 0x1b2   :  { %1695 = vrot.lane.b32.xlu1 %v5466_v58, %s4643_s18  ;;  %1189 = vrot.lane.b32.xlu0 %v5458_v42, %s4640_s28  ;;  %10054 = vst [vmem:[#allocation104_spill] sm:$0xff] %v5960_v35  ;;  %v5968_v42 = vmax.f32 %v584_v50, 0.0  ;;  %v594_v50 = vadd.f32 %v5123_v54, %v5624_v51 }
 0x1b3   :  { %v705_v7 = vpop.f32.mrf.mxu0 }
 0x1b4   :  { %v5954_v15 = vpop.permute.xlu1 %1679  ;;  %v5956_v24 = vpop.permute.xlu0 %1173  ;;  %10056 = vst [vmem:[#allocation106_spill] sm:$0xff] %v5968_v42  ;;  %v858_v14 = vrot.slane %v5968_v42, 7 }
 0x1b5   :  { %10052 = vst [vmem:[#allocation102_spill] sm:$0xff] %v5954_v15  ;;  %10053 = vst [vmem:[#allocation103_spill] sm:$0xff] %v5956_v24  ;;  %v5966_v58 = vpop.f32.mrf.mxu0  ;;  %v5982_v15 = vmax.f32 %v589_v46, 0.0 }
 0x1b6   :  { %2079 = vrot.lane.b32.xlu1 %v5483_v39, %s4641_s13  ;;  %2269 = vrot.lane.b32.xlu0 %v5487_v57, %s4645_s22  ;;  %v5998_v46 = vsel %vm897_vm2, %v857_v31, %v858_v14 }
 0x1b7   :  { %v710_v7 = vpop.f32.mrf.mxu0  ;;  %10059 = vst [vmem:[#allocation109_spill] sm:$0xff] %v5982_v15  ;;  %10062 = vst [vmem:[#allocation112_spill] sm:$0xff] %v5998_v46  ;;  %v859_v31 = vrot.slane %v5982_v15, 7 }
 0x1b8   :  { %v5976_v60 = vpop.permute.xlu1 %2063  ;;  %v5978_v24 = vpop.permute.xlu0 %2253  ;;  %v989_v7 = vrot.slane %v5968_v42, 1  ;;  %v599_v42 = vadd.f32 %v5123_v54, %v5648_v40 }
 0x1b9   :  { %10057 = vst [vmem:[#allocation107_spill] sm:$0xff] %v5976_v60  ;;  %10058 = vst [vmem:[#allocation108_spill] sm:$0xff] %v5978_v24  ;;  %v5980_v2 = vpop.f32.mrf.mxu0 }
 0x1ba   :  { %1443 = vrot.lane.b32.xlu1 %v5483_v39, %s4642_s17  ;;  %1697 = vrot.lane.b32.xlu0 %v5487_v57, %s4643_s18  ;;  %v6002_v51 = vsel %vm1026_vm1, %v988_v26, %v989_v7  ;;  %v6006_v57 = vmax.f32 %v594_v50, 0.0  ;;  %v6022_v50 = vsel %vm897_vm2, %v858_v14, %v859_v31 }
 0x1bb   :  { %v715_v60 = vpop.f32.mrf.mxu0  ;;  %10063 = vst [vmem:[#allocation113_spill] sm:$0xff] %v6002_v51  ;;  %10067 = vst [vmem:[#allocation117_spill] sm:$0xff] %v6022_v50  ;;  %v6030_v51 = vmax.f32 %v599_v42, 0.0 }
 0x1bc   :  { %v5992_v13 = vpop.permute.xlu1 %1427  ;;  %v5994_v24 = vpop.permute.xlu0 %1681  ;;  %10064 = vst [vmem:[#allocation114_spill] sm:$0xff] %v6006_v57  ;;  %v990_v60 = vrot.slane %v5982_v15, 1  ;;  %v860_v14 = vrot.slane %v6006_v57, 7 }
 0x1bd   :  { %10060 = vst [vmem:[#allocation110_spill] sm:$0xff] %v5992_v13  ;;  %10061 = vst [vmem:[#allocation111_spill] sm:$0xff] %v5994_v24  ;;  %v6004_v39 = vpop.f32.mrf.mxu0 }
 0x1be   :  { %2463 = vrot.lane.b32.xlu1 %v5479_v55, %s4644_s26  ;;  %2081 = vrot.lane.b32.xlu0 %v5507_v3, %s4641_s13  ;;  %v6026_v54 = vsel %vm1026_vm1, %v989_v7, %v990_v60  ;;  %10069 = vst [vmem:[#allocation119_spill] sm:$0xff] %v6030_v51  ;;  %v991_v7 = vrot.slane %v6006_v57, 1  ;;  %v6051_v15 = vsel %vm897_vm2, %v859_v31, %v860_v14  ;;  %v861_v31 = vrot.slane %v6030_v51, 7 }
 0x1bf   :  { %v720_v13 = vpop.f32.mrf.mxu0  ;;  %10068 = vst [vmem:[#allocation118_spill] sm:$0xff] %v6026_v54  ;;  %10072 = vst [vmem:[#allocation122_spill] sm:$0xff] %v6051_v15 }
 0x1c0   :  { %v6016_v26 = vpop.permute.xlu1 %2447  ;;  %v6018_v24 = vpop.permute.xlu0 %2065  ;;  %v6035_v13 = vld [vmem:[%s9692_s5] ss:$0 sm:$0xff] }
 0x1c1   :  { %10065 = vst [vmem:[#allocation115_spill] sm:$0xff] %v6016_v26  ;;  %10066 = vst [vmem:[#allocation116_spill] sm:$0xff] %v6018_v24  ;;  %v6028_v40 = vpop.f32.mrf.mxu0  ;;  %v604_v26 = vadd.f32 %v6035_v13, %v5660_v9  ;;  %v6055_v9 = vsel %vm1026_vm1, %v990_v60, %v991_v7  ;;  %v609_v57 = vadd.f32 %v6035_v13, %v5680_v6 }
 0x1c2   :  { %1891 = vrot.lane.b32.xlu1 %v5479_v55, %s4639_s23  ;;  %1445 = vrot.lane.b32.xlu0 %v5507_v3, %s4642_s17  ;;  %10073 = vst [vmem:[#allocation123_spill] sm:$0xff] %v6055_v9 }
 0x1c3   :  { %v725_v42 = vpop.f32.mrf.mxu0  ;;  %v6059_v3 = vmax.f32 %v604_v26, 0.0  ;;  %v6075_v26 = vsel %vm897_vm2, %v860_v14, %v861_v31  ;;  %v6083_v9 = vmax.f32 %v609_v57, 0.0 }
 0x1c4   :  { %v6045_v24 = vpop.permute.xlu1 %1875  ;;  %v6047_v54 = vpop.permute.xlu0 %1429  ;;  %v992_v42 = vrot.slane %v6030_v51, 1  ;;  %10077 = vst [vmem:[#allocation127_spill] sm:$0xff] %v6075_v26  ;;  %v614_v51 = vadd.f32 %v6035_v13, %v5690_v38 }
 0x1c5   :  { %10070 = vst [vmem:[#allocation120_spill] sm:$0xff] %v6045_v24  ;;  %10071 = vst [vmem:[#allocation121_spill] sm:$0xff] %v6047_v54  ;;  %v6057_v50 = vpop.f32.mrf.mxu0  ;;  %v993_v14 = vrot.slane %v6059_v3, 1 }
 0x1c6   :  { %10074 = vst [vmem:[#allocation124_spill] sm:$0xff] %v6059_v3  ;;  %1191 = vrot.lane.b32.xlu1 %v5479_v55, %s4640_s28  ;;  %2465 = vrot.lane.b32.xlu0 %v5532_v28, %s4644_s26  ;;  %v6079_v6 = vsel %vm1026_vm1, %v991_v7, %v992_v42  ;;  %10079 = vst [vmem:[#allocation129_spill] sm:$0xff] %v6083_v9  ;;  %v6107_v26 = vmax.f32 %v614_v51, 0.0 }
 0x1c7   :  { %v730_v24 = vpop.f32.mrf.mxu0  ;;  %10078 = vst [vmem:[#allocation128_spill] sm:$0xff] %v6079_v6  ;;  %v6103_v38 = vsel %vm1026_vm1, %v992_v42, %v993_v14 }
 0x1c8   :  { %v6069_v60 = vpop.permute.xlu1 %1175  ;;  %v6071_v54 = vpop.permute.xlu0 %2449  ;;  %v862_v24 = vrot.slane %v6059_v3, 7  ;;  %10083 = vst [vmem:[#allocation133_spill] sm:$0xff] %v6103_v38  ;;  %10084 = vst [vmem:[#allocation134_spill] sm:$0xff] %v6107_v26  ;;  %v619_v3 = vadd.f32 %v6035_v13, %v5702_v17 }
 0x1c9   :  { %10075 = vst [vmem:[#allocation125_spill] sm:$0xff] %v6069_v60  ;;  %10076 = vst [vmem:[#allocation126_spill] sm:$0xff] %v6071_v54  ;;  %v6081_v55 = vpop.f32.mrf.mxu0 }
 0x1ca   :  { %2271 = vrot.lane.b32.xlu1 %v5511_v23, %s4645_s22  ;;  %1893 = vrot.lane.b32.xlu0 %v5532_v28, %s4639_s23  ;;  %v6099_v57 = vsel %vm897_vm2, %v861_v31, %v862_v24  ;;  %v863_v31 = vrot.slane %v6083_v9, 7 }
 0x1cb   :  { %v735_v60 = vpop.f32.mrf.mxu0  ;;  %10082 = vst [vmem:[#allocation132_spill] sm:$0xff] %v6099_v57 }
 0x1cc   :  { %v6093_v7 = vpop.permute.xlu1 %2255  ;;  %v6095_v54 = vpop.permute.xlu0 %1877  ;;  %v994_v60 = vrot.slane %v6083_v9, 1  ;;  %v6123_v51 = vsel %vm897_vm2, %v862_v24, %v863_v31  ;;  %v624_v9 = vadd.f32 %v6035_v13, %v5714_v33  ;;  %v995_v24 = vrot.slane %v6107_v26, 1 }
 0x1cd   :  { %10080 = vst [vmem:[#allocation130_spill] sm:$0xff] %v6093_v7  ;;  %10081 = vst [vmem:[#allocation131_spill] sm:$0xff] %v6095_v54  ;;  %v6105_v6 = vpop.f32.mrf.mxu0 }
 0x1ce   :  { %1699 = vrot.lane.b32.xlu1 %v5511_v23, %s4643_s18  ;;  %1193 = vrot.lane.b32.xlu0 %v5532_v28, %s4640_s28  ;;  %10087 = vst [vmem:[#allocation137_spill] sm:$0xff] %v6123_v51  ;;  %v6127_v17 = vsel %vm1026_vm1, %v993_v14, %v994_v60  ;;  %v6131_v28 = vmax.f32 %v619_v3, 0.0  ;;  %v6151_v33 = vsel %vm1026_vm1, %v994_v60, %v995_v24  ;;  %v6155_v51 = vmax.f32 %v624_v9, 0.0 }
 0x1cf   :  { %v740_v54 = vpop.f32.mrf.mxu0  ;;  %10088 = vst [vmem:[#allocation138_spill] sm:$0xff] %v6127_v17  ;;  %10093 = vst [vmem:[#allocation143_spill] sm:$0xff] %v6151_v33 }
 0x1d0   :  { %v6117_v42 = vpop.permute.xlu1 %1683  ;;  %v6119_v7 = vpop.permute.xlu0 %1177  ;;  %10089 = vst [vmem:[#allocation139_spill] sm:$0xff] %v6131_v28  ;;  %v864_v54 = vrot.slane %v6107_v26, 7  ;;  %10094 = vst [vmem:[#allocation144_spill] sm:$0xff] %v6155_v51  ;;  %v629_v26 = vadd.f32 %v6035_v13, %v5726_v18 }
 0x1d1   :  { %10085 = vst [vmem:[#allocation135_spill] sm:$0xff] %v6117_v42  ;;  %10086 = vst [vmem:[#allocation136_spill] sm:$0xff] %v6119_v7  ;;  %v6129_v23 = vpop.f32.mrf.mxu0 }
 0x1d2   :  { %2083 = vrot.lane.b32.xlu1 %v5548_v41, %s4641_s13  ;;  %2273 = vrot.lane.b32.xlu0 %v5552_v61, %s4645_s22  ;;  %v6147_v3 = vsel %vm897_vm2, %v863_v31, %v864_v54  ;;  %v996_v31 = vrot.slane %v6131_v28, 1 }
 0x1d3   :  { %v745_v7 = vpop.f32.mrf.mxu0  ;;  %10092 = vst [vmem:[#allocation142_spill] sm:$0xff] %v6147_v3 }
 0x1d4   :  { %v6141_v14 = vpop.permute.xlu1 %2067  ;;  %v6143_v42 = vpop.permute.xlu0 %2257  ;;  %v865_v7 = vrot.slane %v6131_v28, 7  ;;  %v6175_v18 = vsel %vm1026_vm1, %v995_v24, %v996_v31  ;;  %v634_v28 = vadd.f32 %v6035_v13, %v5746_v34 }
 0x1d5   :  { %10090 = vst [vmem:[#allocation140_spill] sm:$0xff] %v6141_v14  ;;  %10091 = vst [vmem:[#allocation141_spill] sm:$0xff] %v6143_v42  ;;  %v6153_v17 = vpop.f32.mrf.mxu0 }
 0x1d6   :  { %1447 = vrot.lane.b32.xlu1 %v5548_v41, %s4642_s17  ;;  %1701 = vrot.lane.b32.xlu0 %v5552_v61, %s4643_s18  ;;  %v6171_v9 = vsel %vm897_vm2, %v864_v54, %v865_v7  ;;  %10098 = vst [vmem:[#allocation148_spill] sm:$0xff] %v6175_v18  ;;  %v6179_v61 = vmax.f32 %v629_v26, 0.0  ;;  %v866_v54 = vrot.slane %v6155_v51, 7 }
 0x1d7   :  { %v750_v14 = vpop.f32.mrf.mxu0  ;;  %10097 = vst [vmem:[#allocation147_spill] sm:$0xff] %v6171_v9  ;;  %v6203_v9 = vmax.f32 %v634_v28, 0.0 }
 0x1d8   :  { %v6165_v60 = vpop.permute.xlu1 %1431  ;;  %v6167_v42 = vpop.permute.xlu0 %1685  ;;  %10099 = vst [vmem:[#allocation149_spill] sm:$0xff] %v6179_v61  ;;  %v997_v14 = vrot.slane %v6155_v51, 1  ;;  %v6195_v26 = vsel %vm897_vm2, %v865_v7, %v866_v54  ;;  %v639_v51 = vadd.f32 %v6035_v13, %v5758_v49  ;;  %v867_v7 = vrot.slane %v6179_v61, 7 }
 0x1d9   :  { %10095 = vst [vmem:[#allocation145_spill] sm:$0xff] %v6165_v60  ;;  %10096 = vst [vmem:[#allocation146_spill] sm:$0xff] %v6167_v42  ;;  %v6177_v41 = vpop.f32.mrf.mxu0 }
 0x1da   :  { %2467 = vrot.lane.b32.xlu1 %v5560_v21, %s4644_s26  ;;  %2085 = vrot.lane.b32.xlu0 %v5583_v1, %s4641_s13  ;;  %10102 = vst [vmem:[#allocation152_spill] sm:$0xff] %v6195_v26  ;;  %v6199_v34 = vsel %vm1026_vm1, %v996_v31, %v997_v14  ;;  %10104 = vst [vmem:[#allocation154_spill] sm:$0xff] %v6203_v9  ;;  %v6219_v28 = vsel %vm897_vm2, %v866_v54, %v867_v7  ;;  %v868_v54 = vrot.slane %v6203_v9, 7 }
 0x1db   :  { %v755_v60 = vpop.f32.mrf.mxu0  ;;  %10103 = vst [vmem:[#allocation153_spill] sm:$0xff] %v6199_v34  ;;  %10107 = vst [vmem:[#allocation157_spill] sm:$0xff] %v6219_v28 }
 0x1dc   :  { %v6189_v24 = vpop.permute.xlu1 %2451  ;;  %v6191_v42 = vpop.permute.xlu0 %2069  ;;  %v998_v60 = vrot.slane %v6179_v61, 1  ;;  %v644_v61 = vadd.f32 %v6035_v13, %v5778_v56 }
 0x1dd   :  { %10100 = vst [vmem:[#allocation150_spill] sm:$0xff] %v6189_v24  ;;  %10101 = vst [vmem:[#allocation151_spill] sm:$0xff] %v6191_v42  ;;  %v6201_v18 = vpop.f32.mrf.mxu0 }
 0x1de   :  { %1895 = vrot.lane.b32.xlu1 %v5560_v21, %s4639_s23  ;;  %1449 = vrot.lane.b32.xlu0 %v5583_v1, %s4642_s17  ;;  %v6223_v49 = vsel %vm1026_vm1, %v997_v14, %v998_v60  ;;  %v6227_v1 = vmax.f32 %v639_v51, 0.0  ;;  %v6243_v51 = vsel %vm897_vm2, %v867_v7, %v868_v54 }
 0x1df   :  { %v760_v24 = vpop.f32.mrf.mxu0  ;;  %10108 = vst [vmem:[#allocation158_spill] sm:$0xff] %v6223_v49  ;;  %10112 = vst [vmem:[#allocation162_spill] sm:$0xff] %v6243_v51  ;;  %v649_v49 = vadd.f32 %v6035_v13, %v5788_v59 }
 0x1e0   :  { %v6213_v31 = vpop.permute.xlu1 %1879  ;;  %v6215_v42 = vpop.permute.xlu0 %1433  ;;  %10109 = vst [vmem:[#allocation159_spill] sm:$0xff] %v6227_v1  ;;  %v999_v24 = vrot.slane %v6203_v9, 1  ;;  %v1000_v7 = vrot.slane %v6227_v1, 1  ;;  %v654_v9 = vadd.f32 %v6035_v13, %v5800_v63 }
 0x1e1   :  { %10105 = vst [vmem:[#allocation155_spill] sm:$0xff] %v6213_v31  ;;  %10106 = vst [vmem:[#allocation156_spill] sm:$0xff] %v6215_v42  ;;  %v6225_v34 = vpop.f32.mrf.mxu0 }
 0x1e2   :  { %1195 = vrot.lane.b32.xlu1 %v5560_v21, %s4640_s28  ;;  %2469 = vrot.lane.b32.xlu0 %v5614_v11, %s4644_s26  ;;  %v6247_v56 = vsel %vm1026_vm1, %v998_v60, %v999_v24  ;;  %v6249_v21 = vmax.f32 %v644_v61, 0.0  ;;  %v6269_v59 = vsel %vm1026_vm1, %v999_v24, %v1000_v7  ;;  %v6271_v60 = vmax.f32 %v649_v49, 0.0 }
 0x1e3   :  { %v765_v31 = vpop.f32.mrf.mxu0  ;;  %10113 = vst [vmem:[#allocation163_spill] sm:$0xff] %v6247_v56  ;;  %10118 = vst [vmem:[#allocation168_spill] sm:$0xff] %v6269_v59  ;;  %v6293_v24 = vmax.f32 %v654_v9, 0.0 }
 0x1e4   :  { %v6237_v14 = vpop.permute.xlu1 %1179  ;;  %v6239_v42 = vpop.permute.xlu0 %2453  ;;  %10114 = vst [vmem:[#allocation164_spill] sm:$0xff] %v6249_v21  ;;  %v869_v31 = vrot.slane %v6227_v1, 7  ;;  %10119 = vst [vmem:[#allocation169_spill] sm:$0xff] %v6271_v60 }
 0x1e5   :  { %10110 = vst [vmem:[#allocation160_spill] sm:$0xff] %v6237_v14  ;;  %10111 = vst [vmem:[#allocation161_spill] sm:$0xff] %v6239_v42 }
 0x1e6   :  { %2275 = vrot.lane.b32.xlu1 %v5587_v20, %s4645_s22  ;;  %1897 = vrot.lane.b32.xlu0 %v5614_v11, %s4639_s23  ;;  %v6265_v61 = vsel %vm897_vm2, %v868_v54, %v869_v31  ;;  %v1001_v54 = vrot.slane %v6249_v21, 1 }
 0x1e7   :  { %10117 = vst [vmem:[#allocation167_spill] sm:$0xff] %v6265_v61 }
 0x1e8   :  { %v6259_v14 = vpop.permute.xlu1 %2259  ;;  %v6261_v42 = vpop.permute.xlu0 %1881  ;;  %v6291_v63 = vsel %vm1026_vm1, %v1000_v7, %v1001_v54 }
 0x1e9   :  { %10115 = vst [vmem:[#allocation165_spill] sm:$0xff] %v6259_v14  ;;  %10116 = vst [vmem:[#allocation166_spill] sm:$0xff] %v6261_v42  ;;  %v870_v42 = vrot.slane %v6249_v21, 7  ;;  %v664_v21 = vadd.f32 %v6035_v13, %v5824_v12 }
 0x1ea   :  { %1703 = vrot.lane.b32.xlu1 %v5587_v20, %s4643_s18  ;;  %1197 = vrot.lane.b32.xlu0 %v5614_v11, %s4640_s28  ;;  %10123 = vst [vmem:[#allocation173_spill] sm:$0xff] %v6291_v63  ;;  %v659_v11 = vadd.f32 %v6035_v13, %v5812_v8  ;;  %v871_v20 = vrot.slane %v6271_v60, 7 }
 0x1eb   :  { %v6287_v49 = vsel %vm897_vm2, %v869_v31, %v870_v42  ;;  %v1002_v31 = vrot.slane %v6271_v60, 1 }
 0x1ec   :  { %v6281_v14 = vpop.permute.xlu1 %1687  ;;  %v6283_v1 = vpop.permute.xlu0 %1181  ;;  %10122 = vst [vmem:[#allocation172_spill] sm:$0xff] %v6287_v49  ;;  %v6309_v9 = vsel %vm897_vm2, %v870_v42, %v871_v20  ;;  %v6315_v7 = vmax.f32 %v659_v11, 0.0  ;;  %v1003_v42 = vrot.slane %v6293_v24, 1  ;;  %v6337_v11 = vmax.f32 %v664_v21, 0.0 }
 0x1ed   :  { %10120 = vst [vmem:[#allocation170_spill] sm:$0xff] %v6281_v14  ;;  %10121 = vst [vmem:[#allocation171_spill] sm:$0xff] %v6283_v1  ;;  %v6313_v8 = vsel %vm1026_vm1, %v1001_v54, %v1002_v31 }
 0x1ee   :  { %2087 = vrot.lane.b32.xlu1 %v5634_v47, %s4641_s13  ;;  %2277 = vrot.lane.b32.xlu0 %v5638_v43, %s4645_s22  ;;  %10126 = vst [vmem:[#allocation176_spill] sm:$0xff] %v6309_v9  ;;  %10127 = vst [vmem:[#allocation177_spill] sm:$0xff] %v6313_v8  ;;  %v6335_v12 = vsel %vm1026_vm1, %v1002_v31, %v1003_v42 }
 0x1ef   :  { %10128 = vst [vmem:[#allocation178_spill] sm:$0xff] %v6315_v7  ;;  %10132 = vst [vmem:[#allocation182_spill] sm:$0xff] %v6335_v12 }
 0x1f0   :  { %v6303_v1 = vpop.permute.xlu1 %2071  ;;  %v6305_v14 = vpop.permute.xlu0 %2261  ;;  %10133 = vst [vmem:[#allocation183_spill] sm:$0xff] %v6337_v11 }
 0x1f1   :  { %10124 = vst [vmem:[#allocation174_spill] sm:$0xff] %v6303_v1  ;;  %10125 = vst [vmem:[#allocation175_spill] sm:$0xff] %v6305_v14  ;;  %v872_v1 = vrot.slane %v6293_v24, 7 }
 0x1f2   :  { %1451 = vrot.lane.b32.xlu1 %v5634_v47, %s4642_s17  ;;  %1705 = vrot.lane.b32.xlu0 %v5638_v43, %s4643_s18  ;;  %v669_v43 = vadd.f32 %v6035_v13, %v5844_v36  ;;  %v873_v47 = vrot.slane %v6315_v7, 7 }
 0x1f3   :  { %v6331_v54 = vsel %vm897_vm2, %v871_v20, %v872_v1  ;;  %v1004_v20 = vrot.slane %v6315_v7, 1 }
 0x1f4   :  { %v6325_v14 = vpop.permute.xlu1 %1435  ;;  %v6327_v60 = vpop.permute.xlu0 %1689  ;;  %10131 = vst [vmem:[#allocation181_spill] sm:$0xff] %v6331_v54  ;;  %v6353_v21 = vsel %vm897_vm2, %v872_v1, %v873_v47  ;;  %v6359_v31 = vmax.f32 %v669_v43, 0.0  ;;  %v674_v1 = vadd.f32 %v6035_v13, %v5856_v19 }
 0x1f5   :  { %10129 = vst [vmem:[#allocation179_spill] sm:$0xff] %v6325_v14  ;;  %10130 = vst [vmem:[#allocation180_spill] sm:$0xff] %v6327_v60  ;;  %v6357_v36 = vsel %vm1026_vm1, %v1003_v42, %v1004_v20 }
 0x1f6   :  { %2471 = vrot.lane.b32.xlu1 %v5650_v44, %s4644_s26  ;;  %2089 = vrot.lane.b32.xlu0 %v5674_v45, %s4641_s13  ;;  %10136 = vst [vmem:[#allocation186_spill] sm:$0xff] %v6353_v21  ;;  %10137 = vst [vmem:[#allocation187_spill] sm:$0xff] %v6357_v36  ;;  %v875_v19 = vrot.slane %v6359_v31, 7 }
 0x1f7   :  { %10138 = vst [vmem:[#allocation188_spill] sm:$0xff] %v6359_v31 }
 0x1f8   :  { %v6347_v14 = vpop.permute.xlu1 %2455  ;;  %v6349_v60 = vpop.permute.xlu0 %2073 }
 0x1f9   :  { %10134 = vst [vmem:[#allocation184_spill] sm:$0xff] %v6347_v14  ;;  %10135 = vst [vmem:[#allocation185_spill] sm:$0xff] %v6349_v60  ;;  %v874_v14 = vrot.slane %v6337_v11, 7  ;;  %v1005_v60 = vrot.slane %v6337_v11, 1 }
 0x1fa   :  { %1899 = vrot.lane.b32.xlu1 %v5650_v44, %s4639_s23  ;;  %1453 = vrot.lane.b32.xlu0 %v5674_v45, %s4642_s17  ;;  %v6386_v45 = vmax.f32 %v674_v1, 0.0  ;;  %v684_v1 = vadd.f32 %v6035_v13, %v5888_v62 }
 0x1fb   :  { %v6375_v43 = vsel %vm897_vm2, %v873_v47, %v874_v14  ;;  %v6379_v42 = vsel %vm1026_vm1, %v1004_v20, %v1005_v60  ;;  %v1006_v47 = vrot.slane %v6359_v31, 1  ;;  %v6397_v20 = vsel %vm897_vm2, %v874_v14, %v875_v19 }
 0x1fc   :  { %v6369_v7 = vpop.permute.xlu1 %1883  ;;  %v6371_v21 = vpop.permute.xlu0 %1437  ;;  %10141 = vst [vmem:[#allocation191_spill] sm:$0xff] %v6375_v43  ;;  %10142 = vst [vmem:[#allocation192_spill] sm:$0xff] %v6379_v42  ;;  %v1007_v14 = vrot.slane %v6386_v45, 1  ;;  %v6429_v62 = vmax.f32 %v684_v1, 0.0  ;;  %v694_v1 = vadd.f32 %v6035_v13, %v5912_v27 }
 0x1fd   :  { %10139 = vst [vmem:[#allocation189_spill] sm:$0xff] %v6369_v7  ;;  %10140 = vst [vmem:[#allocation190_spill] sm:$0xff] %v6371_v21  ;;  %v679_v7 = vadd.f32 %v6035_v13, %v5876_v32 }
 0x1fe   :  { %1199 = vrot.lane.b32.xlu1 %v5650_v44, %s4640_s28  ;;  %2473 = vrot.lane.b32.xlu0 %v5708_v52, %s4644_s26  ;;  %10143 = vst [vmem:[#allocation193_spill] sm:$0xff] %v6386_v45  ;;  %10146 = vst [vmem:[#allocation196_spill] sm:$0xff] %v6397_v20  ;;  %v6401_v44 = vsel %vm1026_vm1, %v1005_v60, %v1006_v47  ;;  %v6473_v27 = vmax.f32 %v694_v1, 0.0  ;;  %v704_v1 = vadd.f32 %v6035_v13, %v5944_v22 }
 0x1ff   :  { %10147 = vst [vmem:[#allocation197_spill] sm:$0xff] %v6401_v44  ;;  %v6407_v32 = vmax.f32 %v679_v7, 0.0  ;;  %v6423_v44 = vsel %vm1026_vm1, %v1006_v47, %v1007_v14  ;;  %10152 = vst [vmem:[#allocation202_spill] sm:$0xff] %v6429_v62  ;;  %v689_v7 = vadd.f32 %v6035_v13, %v5900_v53 }
 0x200   :  { %v6391_v21 = vpop.permute.xlu1 %1183  ;;  %v6393_v11 = vpop.permute.xlu0 %2457  ;;  %10151 = vst [vmem:[#allocation201_spill] sm:$0xff] %v6423_v44  ;;  %10161 = vst [vmem:[#allocation211_spill] sm:$0xff] %v6473_v27  ;;  %v6517_v22 = vmax.f32 %v704_v1, 0.0  ;;  %v714_v1 = vadd.f32 %v6035_v13, %v5980_v2 }
 0x201   :  { %10144 = vst [vmem:[#allocation194_spill] sm:$0xff] %v6391_v21  ;;  %10145 = vst [vmem:[#allocation195_spill] sm:$0xff] %v6393_v11  ;;  %v876_v21 = vrot.slane %v6386_v45, 7  ;;  %v6451_v53 = vmax.f32 %v689_v7, 0.0  ;;  %v699_v7 = vadd.f32 %v6035_v13, %v5932_v4 }
 0x202   :  { %2279 = vrot.lane.b32.xlu1 %v5678_v37, %s4645_s22  ;;  %1901 = vrot.lane.b32.xlu0 %v5708_v52, %s4639_s23  ;;  %10168 = vst [vmem:[#allocation218_spill] sm:$0xff] %v6517_v22  ;;  %v6561_v2 = vmax.f32 %v714_v1, 0.0 }
 0x203   :  { %v6419_v60 = vsel %vm897_vm2, %v875_v19, %v876_v21  ;;  %v1008_v19 = vrot.slane %v6407_v32, 1  ;;  %10157 = vst [vmem:[#allocation207_spill] sm:$0xff] %v6451_v53  ;;  %v6495_v4 = vmax.f32 %v699_v7, 0.0  ;;  %v709_v7 = vadd.f32 %v6035_v13, %v5966_v58 }
 0x204   :  { %v6413_v11 = vpop.permute.xlu1 %2263  ;;  %v6415_v31 = vpop.permute.xlu0 %1885  ;;  %10150 = vst [vmem:[#allocation200_spill] sm:$0xff] %v6419_v60  ;;  %10176 = vst [vmem:[#allocation226_spill] sm:$0xff] %v6561_v2 }
 0x205   :  { %10148 = vst [vmem:[#allocation198_spill] sm:$0xff] %v6413_v11  ;;  %10149 = vst [vmem:[#allocation199_spill] sm:$0xff] %v6415_v31  ;;  %v877_v31 = vrot.slane %v6407_v32, 7  ;;  %v6539_v58 = vmax.f32 %v709_v7, 0.0  ;;  %v719_v7 = vadd.f32 %v6035_v13, %v6004_v39  ;;  %v10180_v39 = vld [vmem:[#allocation78_spill] sm:$0xff] }
 0x206   :  { %1707 = vrot.lane.b32.xlu1 %v5678_v37, %s4643_s18  ;;  %1201 = vrot.lane.b32.xlu0 %v5708_v52, %s4640_s28  ;;  %v6445_v52 = vsel %vm1026_vm1, %v1007_v14, %v1008_v19  ;;  %v878_v37 = vrot.slane %v6429_v62, 7  ;;  %10164 = vst [vmem:[#allocation214_spill] sm:$0xff] %v6495_v4 }
 0x207   :  { %v6441_v47 = vsel %vm897_vm2, %v876_v21, %v877_v31  ;;  %10156 = vst [vmem:[#allocation206_spill] sm:$0xff] %v6445_v52  ;;  %v1009_v21 = vrot.slane %v6429_v62, 1  ;;  %v879_v62 = vrot.slane %v6451_v53, 7  ;;  %10171 = vst [vmem:[#allocation221_spill] sm:$0xff] %v6539_v58  ;;  %v6583_v1 = vmax.f32 %v719_v7, 0.0  ;;  %v10185_v7 = vld [vmem:[#allocation79_spill] sm:$0xff] }
 0x208   :  { %v6435_v11 = vpop.permute.xlu1 %1691  ;;  %v6437_v45 = vpop.permute.xlu0 %1185  ;;  %10155 = vst [vmem:[#allocation205_spill] sm:$0xff] %v6441_v47  ;;  %v6463_v14 = vsel %vm897_vm2, %v877_v31, %v878_v37  ;;  %v1010_v31 = vrot.slane %v6451_v53, 1 }
 0x209   :  { %10153 = vst [vmem:[#allocation203_spill] sm:$0xff] %v6435_v11  ;;  %10154 = vst [vmem:[#allocation204_spill] sm:$0xff] %v6437_v45  ;;  %v6467_v52 = vsel %vm1026_vm1, %v1008_v19, %v1009_v21  ;;  %v6485_v19 = vsel %vm897_vm2, %v878_v37, %v879_v62  ;;  %v1011_v37 = vrot.slane %v6473_v27, 1 }
 0x20a   :  { %2091 = vrot.lane.b32.xlu1 %v5730_v30, %s4641_s13  ;;  %2281 = vrot.lane.b32.xlu0 %v5734_v16, %s4645_s22  ;;  %10159 = vst [vmem:[#allocation209_spill] sm:$0xff] %v6463_v14  ;;  %10160 = vst [vmem:[#allocation210_spill] sm:$0xff] %v6467_v52 }
 0x20b   :  { %10162 = vst [vmem:[#allocation212_spill] sm:$0xff] %v6485_v19  ;;  %10181 = vst [vmem:[#allocation230_spill] sm:$0xff] %v6583_v1 }
 0x20c   :  { %v6457_v45 = vpop.permute.xlu1 %2075  ;;  %v6459_v11 = vpop.permute.xlu0 %2265 }
 0x20d   :  { %10158 = vst [vmem:[#allocation208_spill] sm:$0xff] %v6457_v45 }
 0x20e   :  { %1455 = vrot.lane.b32.xlu1 %v5730_v30, %s4642_s17  ;;  %1709 = vrot.lane.b32.xlu0 %v5734_v16, %s4643_s18  ;;  %v6489_v16 = vsel %vm1026_vm1, %v1009_v21, %v1010_v31  ;;  %v880_v30 = vrot.slane %v6473_v27, 7  ;;  %v881_v27 = vrot.slane %v6495_v4, 7 }
 0x20f   :  { %10163 = vst [vmem:[#allocation213_spill] sm:$0xff] %v6489_v16  ;;  %v6511_v16 = vsel %vm1026_vm1, %v1010_v31, %v1011_v37 }
 0x210   :  { %v6479_v45 = vpop.permute.xlu1 %1439  ;;  %v6481_v14 = vpop.permute.xlu0 %1693  ;;  %v6507_v21 = vsel %vm897_vm2, %v879_v62, %v880_v30  ;;  %10167 = vst [vmem:[#allocation217_spill] sm:$0xff] %v6511_v16  ;;  %v1012_v62 = vrot.slane %v6495_v4, 1  ;;  %v6529_v31 = vsel %vm897_vm2, %v880_v30, %v881_v27  ;;  %v882_v4 = vrot.slane %v6517_v22, 7 }
 0x211   :  { %10166 = vst [vmem:[#allocation216_spill] sm:$0xff] %v6507_v21  ;;  %10169 = vst [vmem:[#allocation219_spill] sm:$0xff] %v6529_v31  ;;  %v1013_v30 = vrot.slane %v6517_v22, 1  ;;  %v883_v22 = vrot.slane %v6539_v58, 7 }
 0x212   :  { %2475 = vrot.lane.b32.xlu1 %v5748_v25, %s4644_s26  ;;  %2093 = vrot.lane.b32.xlu0 %v5772_v29, %s4641_s13 }
 0x214   :  { %v6501_v53 = vpop.permute.xlu1 %2459  ;;  %v6503_v19 = vpop.permute.xlu0 %2077 }
 0x215   :  { %10165 = vst [vmem:[#allocation215_spill] sm:$0xff] %v6501_v53 }
 0x216   :  { %1903 = vrot.lane.b32.xlu1 %v5748_v25, %s4639_s23  ;;  %1457 = vrot.lane.b32.xlu0 %v5772_v29, %s4642_s17  ;;  %v6533_v29 = vsel %vm1026_vm1, %v1011_v37, %v1012_v62  ;;  %v6551_v37 = vsel %vm897_vm2, %v881_v27, %v882_v4  ;;  %v1014_v27 = vrot.slane %v6539_v58, 1  ;;  %v724_v58 = vadd.f32 %v6035_v13, %v6028_v40 }
 0x217   :  { %10170 = vst [vmem:[#allocation220_spill] sm:$0xff] %v6533_v29  ;;  %10174 = vst [vmem:[#allocation224_spill] sm:$0xff] %v6551_v37 }
 0x218   :  { %v6523_v21 = vpop.permute.xlu1 %1887  ;;  %v6525_v53 = vpop.permute.xlu0 %1441  ;;  %v6605_v40 = vmax.f32 %v724_v58, 0.0 }
 0x21a   :  { %1203 = vrot.lane.b32.xlu1 %v5748_v25, %s4640_s28  ;;  %2477 = vrot.lane.b32.xlu0 %v5806_v5, %s4644_s26  ;;  %v6555_v25 = vsel %vm1026_vm1, %v1012_v62, %v1013_v30  ;;  %v6573_v62 = vsel %vm897_vm2, %v882_v4, %v883_v22  ;;  %v1015_v4 = vrot.slane %v6561_v2, 1  ;;  %10186 = vst [vmem:[#allocation234_spill] sm:$0xff] %v6605_v40 }
 0x21b   :  { %10175 = vst [vmem:[#allocation225_spill] sm:$0xff] %v6555_v25  ;;  %10178 = vst [vmem:[#allocation228_spill] sm:$0xff] %v6573_v62  ;;  %v6577_v25 = vsel %vm1026_vm1, %v1013_v30, %v1014_v27 }
 0x21c   :  { %v6545_v31 = vpop.permute.xlu1 %1187  ;;  %v6547_v16 = vpop.permute.xlu0 %2461  ;;  %10179 = vst [vmem:[#allocation229_spill] sm:$0xff] %v6577_v25  ;;  %v6599_v25 = vsel %vm1026_vm1, %v1014_v27, %v1015_v4 }
 0x21d   :  { %10172 = vst [vmem:[#allocation222_spill] sm:$0xff] %v6545_v31  ;;  %10173 = vst [vmem:[#allocation223_spill] sm:$0xff] %v6547_v16 }
 0x21e   :  { %2283 = vrot.lane.b32.xlu1 %v5776_v10, %s4645_s22  ;;  %1905 = vrot.lane.b32.xlu0 %v5806_v5, %s4639_s23  ;;  %10184 = vst [vmem:[#allocation233_spill] sm:$0xff] %v6599_v25 }
 0x220   :  { %v6567_v37 = vpop.permute.xlu1 %2267  ;;  %v6569_v29 = vpop.permute.xlu0 %1889 }
 0x221   :  { %10177 = vst [vmem:[#allocation227_spill] sm:$0xff] %v6569_v29  ;;  %v884_v29 = vrot.slane %v6561_v2, 7  ;;  %v729_v2 = vadd.f32 %v6035_v13, %v6057_v50  ;;  %v10189_v50 = vld [vmem:[#allocation87_spill] sm:$0xff] }
 0x222   :  { %1711 = vrot.lane.b32.xlu1 %v5776_v10, %s4643_s18  ;;  %2285 = vrot.lane.b32.xlu0 %v10180_v39, %s4645_s22  ;;  %v885_v10 = vrot.slane %v6583_v1, 7 }
 0x223   :  { %v6595_v30 = vsel %vm897_vm2, %v883_v22, %v884_v29  ;;  %v1016_v22 = vrot.slane %v6583_v1, 1  ;;  %v6627_v58 = vmax.f32 %v729_v2, 0.0  ;;  %v734_v1 = vadd.f32 %v6035_v13, %v6081_v55  ;;  %v10194_v2 = vld [vmem:[#allocation82_spill] sm:$0xff] }
 0x224   :  { %v6589_v62 = vpop.permute.xlu1 %1695  ;;  %v6591_v31 = vpop.permute.xlu0 %1189  ;;  %10183 = vst [vmem:[#allocation232_spill] sm:$0xff] %v6595_v30  ;;  %v6617_v27 = vsel %vm897_vm2, %v884_v29, %v885_v10  ;;  %v1017_v29 = vrot.slane %v6605_v40, 1 }
 0x225   :  { %10182 = vst [vmem:[#allocation231_spill] sm:$0xff] %v6591_v31  ;;  %10187 = vst [vmem:[#allocation235_spill] sm:$0xff] %v6617_v27  ;;  %v6621_v25 = vsel %vm1026_vm1, %v1015_v4, %v1016_v22  ;;  %v6649_v55 = vmax.f32 %v734_v1, 0.0  ;;  %v10199_v1 = vld [vmem:[#allocation88_spill] sm:$0xff] }
 0x226   :  { %2095 = vrot.lane.b32.xlu1 %v10185_v7, %s4641_s13  ;;  %1713 = vrot.lane.b32.xlu0 %v10180_v39, %s4643_s18  ;;  %10188 = vst [vmem:[#allocation236_spill] sm:$0xff] %v6621_v25  ;;  %10190 = vst [vmem:[#allocation237_spill] sm:$0xff] %v6627_v58  ;;  %v886_v39 = vrot.slane %v6605_v40, 7  ;;  %v6643_v25 = vsel %vm1026_vm1, %v1016_v22, %v1017_v29  ;;  %v739_v40 = vadd.f32 %v6035_v13, %v6105_v6 }
 0x227   :  { %10193 = vst [vmem:[#allocation240_spill] sm:$0xff] %v6643_v25  ;;  %10195 = vst [vmem:[#allocation82_spill] sm:$0xff] %v6649_v55  ;;  %v888_v25 = vrot.slane %v6649_v55, 7 }
 0x228   :  { %v6611_v30 = vpop.permute.xlu1 %2079  ;;  %v6613_v31 = vpop.permute.xlu0 %2269  ;;  %v6639_v4 = vsel %vm897_vm2, %v885_v10, %v886_v39  ;;  %v1018_v10 = vrot.slane %v6627_v58, 1  ;;  %v6671_v6 = vmax.f32 %v739_v40, 0.0 }
 0x229   :  { %10192 = vst [vmem:[#allocation239_spill] sm:$0xff] %v6639_v4 }
 0x22a   :  { %1459 = vrot.lane.b32.xlu1 %v10185_v7, %s4642_s17  ;;  %2097 = vrot.lane.b32.xlu0 %v10189_v50, %s4641_s13  ;;  %v887_v7 = vrot.slane %v6627_v58, 7  ;;  %10200 = vst [vmem:[#allocation244_spill] sm:$0xff] %v6671_v6  ;;  %v744_v58 = vadd.f32 %v6035_v13, %v6129_v23  ;;  %v10205_v23 = vld [vmem:[#allocation95_spill] sm:$0xff] }
 0x22c   :  { %v6633_v27 = vpop.permute.xlu1 %1443  ;;  %v6635_v16 = vpop.permute.xlu0 %1697  ;;  %v6661_v22 = vsel %vm897_vm2, %v886_v39, %v887_v7  ;;  %v1019_v39 = vrot.slane %v6649_v55, 1  ;;  %v6693_v40 = vmax.f32 %v744_v58, 0.0  ;;  %v749_v55 = vadd.f32 %v6035_v13, %v6153_v17 }
 0x22d   :  { %10191 = vst [vmem:[#allocation238_spill] sm:$0xff] %v6633_v27  ;;  %10197 = vst [vmem:[#allocation242_spill] sm:$0xff] %v6661_v22  ;;  %v754_v58 = vadd.f32 %v6035_v13, %v6177_v41 }
 0x22e   :  { %2479 = vrot.lane.b32.xlu1 %v10194_v2, %s4644_s26  ;;  %1205 = vrot.lane.b32.xlu0 %v5806_v5, %s4640_s28  ;;  %v6665_v5 = vsel %vm1026_vm1, %v1017_v29, %v1018_v10  ;;  %v6683_v29 = vsel %vm897_vm2, %v887_v7, %v888_v25  ;;  %10206 = vst [vmem:[#allocation249_spill] sm:$0xff] %v6693_v40  ;;  %v1020_v7 = vrot.slane %v6671_v6, 1  ;;  %v6717_v17 = vmax.f32 %v749_v55, 0.0  ;;  %v10214_v55 = vld [vmem:[#allocation96_spill] sm:$0xff] }
 0x22f   :  { %10198 = vst [vmem:[#allocation243_spill] sm:$0xff] %v6665_v5  ;;  %10203 = vst [vmem:[#allocation247_spill] sm:$0xff] %v6683_v29  ;;  %v6687_v5 = vsel %vm1026_vm1, %v1018_v10, %v1019_v39 }
 0x230   :  { %v6655_v4 = vpop.permute.xlu1 %2463  ;;  %v6657_v27 = vpop.permute.xlu0 %2081  ;;  %10204 = vst [vmem:[#allocation248_spill] sm:$0xff] %v6687_v5  ;;  %v6709_v5 = vsel %vm1026_vm1, %v1019_v39, %v1020_v7  ;;  %10209 = vst [vmem:[#allocation252_spill] sm:$0xff] %v6717_v17 }
 0x231   :  { %10196 = vst [vmem:[#allocation241_spill] sm:$0xff] %v6655_v4  ;;  %10208 = vst [vmem:[#allocation251_spill] sm:$0xff] %v6709_v5  ;;  %v6733_v5 = vmax.f32 %v754_v58, 0.0 }
 0x232   :  { %2287 = vrot.lane.b32.xlu1 %v10199_v1, %s4645_s22  ;;  %2481 = vrot.lane.b32.xlu0 %v5894_v48, %s4644_s26 }
 0x233   :  { %10213 = vst [vmem:[#allocation256_spill] sm:$0xff] %v6733_v5 }
 0x234   :  { %v6677_v22 = vpop.permute.xlu1 %1891  ;;  %v6679_v4 = vpop.permute.xlu0 %1445 }
 0x235   :  { %10201 = vst [vmem:[#allocation245_spill] sm:$0xff] %v6677_v22  ;;  %10202 = vst [vmem:[#allocation246_spill] sm:$0xff] %v6679_v4  ;;  %v889_v22 = vrot.slane %v6671_v6, 7  ;;  %v890_v6 = vrot.slane %v6693_v40, 7 }
 0x236   :  { %1715 = vrot.lane.b32.xlu1 %v10199_v1, %s4643_s18  ;;  %2289 = vrot.lane.b32.xlu0 %v10205_v23, %s4645_s22 }
 0x237   :  { %v6705_v10 = vsel %vm897_vm2, %v888_v25, %v889_v22  ;;  %v1021_v25 = vrot.slane %v6693_v40, 1  ;;  %v6727_v39 = vsel %vm897_vm2, %v889_v22, %v890_v6  ;;  %v891_v40 = vrot.slane %v6717_v17, 7 }
 0x238   :  { %v6699_v29 = vpop.permute.xlu1 %1191  ;;  %v6701_v4 = vpop.permute.xlu0 %2465  ;;  %10207 = vst [vmem:[#allocation250_spill] sm:$0xff] %v6705_v10  ;;  %10211 = vst [vmem:[#allocation254_spill] sm:$0xff] %v6727_v39 }
 0x239   :  { %v6731_v41 = vsel %vm1026_vm1, %v1020_v7, %v1021_v25  ;;  %v6747_v7 = vsel %vm897_vm2, %v890_v6, %v891_v40 }
 0x23a   :  { %1907 = vrot.lane.b32.xlu1 %v10194_v2, %s4639_s23  ;;  %1461 = vrot.lane.b32.xlu0 %v10189_v50, %s4642_s17  ;;  %10212 = vst [vmem:[#allocation255_spill] sm:$0xff] %v6731_v41  ;;  %v9869_v50 = vrot.slane %v6717_v17, 1  ;;  %10216 = vst [vmem:[#allocation258_spill] sm:$0xff] %v6747_v7  ;;  %v9874_v41 = vrot.slane %v6733_v5, 7 }
 0x23c   :  { %v6721_v10 = vpop.permute.xlu1 %2271  ;;  %v6723_v1 = vpop.permute.xlu0 %1893  ;;  %v6753_v58 = vsel %vm1026_vm1, %v1021_v25, %v9869_v50  ;;  %v6768_v6 = vsel %vm897_vm2, %v891_v40, %v9874_v41  ;;  %v10219_v25 = vld [vmem:[#allocation99_spill] sm:$0xff]  ;;  %v10220_v50 = vld [vmem:[#allocation105_spill] sm:$0xff]  ;;  %v10224_v41 = vld [vmem:[#allocation106_spill] sm:$0xff] }
 0x23d   :  { %10210 = vst [vmem:[#allocation253_spill] sm:$0xff] %v6723_v1  ;;  %10217 = vst [vmem:[#allocation259_spill] sm:$0xff] %v6753_v58 }
 0x23e   :  { %2099 = vrot.lane.b32.xlu1 %v10214_v55, %s4641_s13  ;;  %1717 = vrot.lane.b32.xlu0 %v10205_v23, %s4643_s18  ;;  %10218 = vst [vmem:[#allocation260_spill] sm:$0xff] %v6768_v6 }
 0x240   :  { %v6741_v1 = vpop.permute.xlu1 %1699  ;;  %v6743_v22 = vpop.permute.xlu0 %1193 }
 0x241   :  { %10215 = vst [vmem:[#allocation257_spill] sm:$0xff] %v6743_v22 }
 0x242   :  { %2291 = vrot.lane.b32.xlu1 %v5960_v35, %s4645_s22  ;;  %1909 = vrot.lane.b32.xlu0 %v5894_v48, %s4639_s23 }
 0x244   :  { %v6760_v39 = vpop.permute.xlu1 %2083  ;;  %v6762_v23 = vpop.permute.xlu0 %2273 }
 0x246   :  { %2483 = vrot.lane.b32.xlu1 %v10219_v25, %s4644_s26  ;;  %2101 = vrot.lane.b32.xlu0 %v10220_v50, %s4641_s13 }
 0x248   :  { %v6774_v58 = vpop.permute.xlu1 %1447  ;;  %v6776_v17 = vpop.permute.xlu0 %1701 }
 0x249   :  { %10221 = vst [vmem:[#allocation99_spill] sm:$0xff] %v6774_v58 }
 0x24a   :  { %1207 = vrot.lane.b32.xlu1 %v10194_v2, %s4640_s28  ;;  %2293 = vrot.lane.b32.xlu0 %v5998_v46, %s4645_s22 }
 0x24c   :  { %v6782_v7 = vpop.permute.xlu1 %2467  ;;  %v6784_v40 = vpop.permute.xlu0 %2085 }
 0x24d   :  { %10222 = vst [vmem:[#allocation261_spill] sm:$0xff] %v6782_v7  ;;  %10223 = vst [vmem:[#allocation262_spill] sm:$0xff] %v6784_v40  ;;  %v10237_v40 = vld [vmem:[#allocation118_spill] sm:$0xff] }
 0x24e   :  { %1463 = vrot.lane.b32.xlu1 %v10214_v55, %s4642_s17  ;;  %2485 = vrot.lane.b32.xlu0 %v10224_v41, %s4644_s26 }
 0x250   :  { %v6790_v6 = vpop.permute.xlu1 %1895  ;;  %v6792_v22 = vpop.permute.xlu0 %1449 }
 0x251   :  { %10225 = vst [vmem:[#allocation106_spill] sm:$0xff] %v6790_v6  ;;  %10226 = vst [vmem:[#allocation263_spill] sm:$0xff] %v6792_v22  ;;  %v10230_v22 = vld [vmem:[#allocation113_spill] sm:$0xff] }
 0x252   :  { %1719 = vrot.lane.b32.xlu1 %v5960_v35, %s4643_s18  ;;  %1209 = vrot.lane.b32.xlu0 %v5894_v48, %s4640_s28 }
 0x254   :  { %v6798_v2 = vpop.permute.xlu1 %1195  ;;  %v6800_v7 = vpop.permute.xlu0 %2469 }
 0x255   :  { %10227 = vst [vmem:[#allocation264_spill] sm:$0xff] %v6798_v2  ;;  %10228 = vst [vmem:[#allocation265_spill] sm:$0xff] %v6800_v7  ;;  %v10233_v2 = vld [vmem:[#allocation117_spill] sm:$0xff] }
 0x256   :  { %1911 = vrot.lane.b32.xlu1 %v10219_v25, %s4639_s23  ;;  %1465 = vrot.lane.b32.xlu0 %v10220_v50, %s4642_s17 }
 0x258   :  { %v6806_v55 = vpop.permute.xlu1 %2275  ;;  %v6808_v6 = vpop.permute.xlu0 %1897 }
 0x259   :  { %10229 = vst [vmem:[#allocation266_spill] sm:$0xff] %v6808_v6  ;;  %v10236_v6 = vld [vmem:[#allocation109_spill] sm:$0xff] }
 0x25a   :  { %2103 = vrot.lane.b32.xlu1 %v10230_v22, %s4641_s13  ;;  %1721 = vrot.lane.b32.xlu0 %v5998_v46, %s4643_s18 }
 0x25c   :  { %v6814_v48 = vpop.permute.xlu1 %1703  ;;  %v6816_v35 = vpop.permute.xlu0 %1197 }
 0x25d   :  { %10231 = vst [vmem:[#allocation267_spill] sm:$0xff] %v6814_v48  ;;  %10232 = vst [vmem:[#allocation268_spill] sm:$0xff] %v6816_v35 }
 0x25e   :  { %2295 = vrot.lane.b32.xlu1 %v10233_v2, %s4645_s22  ;;  %1913 = vrot.lane.b32.xlu0 %v10224_v41, %s4639_s23 }
 0x260   :  { %v6822_v50 = vpop.permute.xlu1 %2087  ;;  %v6824_v7 = vpop.permute.xlu0 %2277 }
 0x261   :  { %10234 = vst [vmem:[#allocation269_spill] sm:$0xff] %v6822_v50  ;;  %10235 = vst [vmem:[#allocation270_spill] sm:$0xff] %v6824_v7  ;;  %v10241_v7 = vld [vmem:[#allocation114_spill] sm:$0xff] }
 0x262   :  { %2487 = vrot.lane.b32.xlu1 %v10236_v6, %s4644_s26  ;;  %2105 = vrot.lane.b32.xlu0 %v10237_v40, %s4641_s13 }
 0x264   :  { %v6830_v46 = vpop.permute.xlu1 %1451  ;;  %v6832_v48 = vpop.permute.xlu0 %1705 }
 0x265   :  { %10238 = vst [vmem:[#allocation109_spill] sm:$0xff] %v6830_v46 }
 0x266   :  { %1211 = vrot.lane.b32.xlu1 %v10219_v25, %s4640_s28  ;;  %2297 = vrot.lane.b32.xlu0 %v6051_v15, %s4645_s22 }
 0x268   :  { %v6838_v35 = vpop.permute.xlu1 %2471  ;;  %v6840_v50 = vpop.permute.xlu0 %2089 }
 0x269   :  { %10239 = vst [vmem:[#allocation271_spill] sm:$0xff] %v6838_v35  ;;  %10240 = vst [vmem:[#allocation272_spill] sm:$0xff] %v6840_v50  ;;  %v10255_v50 = vld [vmem:[#allocation128_spill] sm:$0xff] }
 0x26a   :  { %1467 = vrot.lane.b32.xlu1 %v10230_v22, %s4642_s17  ;;  %2489 = vrot.lane.b32.xlu0 %v10241_v7, %s4644_s26 }
 0x26c   :  { %v6846_v58 = vpop.permute.xlu1 %1899  ;;  %v6848_v46 = vpop.permute.xlu0 %1453 }
 0x26d   :  { %10242 = vst [vmem:[#allocation114_spill] sm:$0xff] %v6846_v58  ;;  %10243 = vst [vmem:[#allocation273_spill] sm:$0xff] %v6848_v46  ;;  %v10248_v46 = vld [vmem:[#allocation123_spill] sm:$0xff] }
 0x26e   :  { %1723 = vrot.lane.b32.xlu1 %v10233_v2, %s4643_s18  ;;  %1213 = vrot.lane.b32.xlu0 %v10224_v41, %s4640_s28 }
 0x270   :  { %v6854_v25 = vpop.permute.xlu1 %1199  ;;  %v6856_v35 = vpop.permute.xlu0 %2473 }
 0x271   :  { %10244 = vst [vmem:[#allocation274_spill] sm:$0xff] %v6854_v25  ;;  %10245 = vst [vmem:[#allocation275_spill] sm:$0xff] %v6856_v35  ;;  %v10251_v25 = vld [vmem:[#allocation127_spill] sm:$0xff] }
 0x272   :  { %1915 = vrot.lane.b32.xlu1 %v10236_v6, %s4639_s23  ;;  %1469 = vrot.lane.b32.xlu0 %v10237_v40, %s4642_s17 }
 0x274   :  { %v6862_v22 = vpop.permute.xlu1 %2279  ;;  %v6864_v58 = vpop.permute.xlu0 %1901 }
 0x275   :  { %10246 = vst [vmem:[#allocation276_spill] sm:$0xff] %v6862_v22  ;;  %10247 = vst [vmem:[#allocation277_spill] sm:$0xff] %v6864_v58  ;;  %v10254_v58 = vld [vmem:[#allocation119_spill] sm:$0xff] }
 0x276   :  { %2107 = vrot.lane.b32.xlu1 %v10248_v46, %s4641_s13  ;;  %1725 = vrot.lane.b32.xlu0 %v6051_v15, %s4643_s18 }
 0x278   :  { %v6870_v41 = vpop.permute.xlu1 %1707  ;;  %v6872_v2 = vpop.permute.xlu0 %1201 }
 0x279   :  { %10249 = vst [vmem:[#allocation278_spill] sm:$0xff] %v6870_v41  ;;  %10250 = vst [vmem:[#allocation279_spill] sm:$0xff] %v6872_v2 }
 0x27a   :  { %2299 = vrot.lane.b32.xlu1 %v10251_v25, %s4645_s22  ;;  %1917 = vrot.lane.b32.xlu0 %v10241_v7, %s4639_s23 }
 0x27c   :  { %v6878_v40 = vpop.permute.xlu1 %2091  ;;  %v6880_v35 = vpop.permute.xlu0 %2281 }
 0x27d   :  { %10252 = vst [vmem:[#allocation280_spill] sm:$0xff] %v6878_v40  ;;  %10253 = vst [vmem:[#allocation281_spill] sm:$0xff] %v6880_v35  ;;  %v10259_v35 = vld [vmem:[#allocation124_spill] sm:$0xff] }
 0x27e   :  { %2491 = vrot.lane.b32.xlu1 %v10254_v58, %s4644_s26  ;;  %2109 = vrot.lane.b32.xlu0 %v10255_v50, %s4641_s13 }
 0x280   :  { %v6886_v15 = vpop.permute.xlu1 %1455  ;;  %v6888_v41 = vpop.permute.xlu0 %1709 }
 0x281   :  { %10256 = vst [vmem:[#allocation119_spill] sm:$0xff] %v6886_v15 }
 0x282   :  { %1215 = vrot.lane.b32.xlu1 %v10236_v6, %s4640_s28  ;;  %2301 = vrot.lane.b32.xlu0 %v6099_v57, %s4645_s22 }
 0x284   :  { %v6894_v2 = vpop.permute.xlu1 %2475  ;;  %v6896_v40 = vpop.permute.xlu0 %2093 }
 0x285   :  { %10257 = vst [vmem:[#allocation282_spill] sm:$0xff] %v6894_v2  ;;  %10258 = vst [vmem:[#allocation283_spill] sm:$0xff] %v6896_v40 }
 0x286   :  { %1471 = vrot.lane.b32.xlu1 %v10248_v46, %s4642_s17  ;;  %2493 = vrot.lane.b32.xlu0 %v10259_v35, %s4644_s26 }
 0x288   :  { %v6902_v22 = vpop.permute.xlu1 %1903  ;;  %v6904_v15 = vpop.permute.xlu0 %1457 }
 0x289   :  { %10260 = vst [vmem:[#allocation124_spill] sm:$0xff] %v6902_v22  ;;  %10261 = vst [vmem:[#allocation284_spill] sm:$0xff] %v6904_v15  ;;  %v10271_v15 = vld [vmem:[#allocation138_spill] sm:$0xff] }
 0x28a   :  { %1727 = vrot.lane.b32.xlu1 %v10251_v25, %s4643_s18  ;;  %1217 = vrot.lane.b32.xlu0 %v10241_v7, %s4640_s28 }
 0x28c   :  { %v6910_v6 = vpop.permute.xlu1 %1203  ;;  %v6912_v2 = vpop.permute.xlu0 %2477 }
 0x28d   :  { %10262 = vst [vmem:[#allocation285_spill] sm:$0xff] %v6910_v6  ;;  %10263 = vst [vmem:[#allocation286_spill] sm:$0xff] %v6912_v2  ;;  %v10267_v6 = vld [vmem:[#allocation137_spill] sm:$0xff] }
 0x28e   :  { %1919 = vrot.lane.b32.xlu1 %v10254_v58, %s4639_s23  ;;  %1473 = vrot.lane.b32.xlu0 %v10255_v50, %s4642_s17 }
 0x290   :  { %v6918_v46 = vpop.permute.xlu1 %2283  ;;  %v6920_v22 = vpop.permute.xlu0 %1905 }
 0x291   :  { %10264 = vst [vmem:[#allocation287_spill] sm:$0xff] %v6920_v22  ;;  %v10270_v22 = vld [vmem:[#allocation129_spill] sm:$0xff] }
 0x292   :  { %2111 = vrot.lane.b32.xlu1 %v6103_v38, %s4641_s13  ;;  %1729 = vrot.lane.b32.xlu0 %v6099_v57, %s4643_s18 }
 0x294   :  { %v6926_v7 = vpop.permute.xlu1 %1711  ;;  %v6928_v25 = vpop.permute.xlu0 %2285 }
 0x295   :  { %10265 = vst [vmem:[#allocation288_spill] sm:$0xff] %v6926_v7  ;;  %10266 = vst [vmem:[#allocation289_spill] sm:$0xff] %v6928_v25 }
 0x296   :  { %2303 = vrot.lane.b32.xlu1 %v10267_v6, %s4645_s22  ;;  %1921 = vrot.lane.b32.xlu0 %v10259_v35, %s4639_s23 }
 0x298   :  { %v6934_v50 = vpop.permute.xlu1 %2095  ;;  %v6936_v2 = vpop.permute.xlu0 %1713 }
 0x299   :  { %10268 = vst [vmem:[#allocation290_spill] sm:$0xff] %v6934_v50  ;;  %10269 = vst [vmem:[#allocation291_spill] sm:$0xff] %v6936_v2  ;;  %v10276_v2 = vld [vmem:[#allocation134_spill] sm:$0xff] }
 0x29a   :  { %2495 = vrot.lane.b32.xlu1 %v10270_v22, %s4644_s26  ;;  %2113 = vrot.lane.b32.xlu0 %v10271_v15, %s4641_s13 }
 0x29c   :  { %v6942_v57 = vpop.permute.xlu1 %1459  ;;  %v6944_v7 = vpop.permute.xlu0 %2097 }
 0x29d   :  { %10272 = vst [vmem:[#allocation129_spill] sm:$0xff] %v6942_v57  ;;  %10273 = vst [vmem:[#allocation292_spill] sm:$0xff] %v6944_v7 }
 0x29e   :  { %1219 = vrot.lane.b32.xlu1 %v10254_v58, %s4640_s28  ;;  %2305 = vrot.lane.b32.xlu0 %v6147_v3, %s4645_s22 }
 0x2a0   :  { %v6950_v25 = vpop.permute.xlu1 %2479  ;;  %v6952_v50 = vpop.permute.xlu0 %1205 }
 0x2a1   :  { %10274 = vst [vmem:[#allocation293_spill] sm:$0xff] %v6950_v25  ;;  %10275 = vst [vmem:[#allocation294_spill] sm:$0xff] %v6952_v50 }
 0x2a2   :  { %1475 = vrot.lane.b32.xlu1 %v6103_v38, %s4642_s17  ;;  %2497 = vrot.lane.b32.xlu0 %v10276_v2, %s4644_s26  ;;  %v3352_v38 = vld [vmem:[%s9693_s6 + $0x78] sm:$0xff] }
 0x2a3   :  { %3555 = vmatpush1.msra.mxu1 %v3352_v38 }
 0x2a4   :  { %v6958_v40 = vpop.permute.xlu1 %2287  ;;  %v6960_v57 = vpop.permute.xlu0 %2481 }
 0x2a5   :  { %10277 = vst [vmem:[#allocation134_spill] sm:$0xff] %v6958_v40  ;;  %10278 = vst [vmem:[#allocation295_spill] sm:$0xff] %v6960_v57  ;;  %v10283_v57 = vmov 0.0   ;;  %v10317_v40 = vld [vmem:[#allocation149_spill] sm:$0xff] }
 0x2a6   :  { %1731 = vrot.lane.b32.xlu1 %v10267_v6, %s4643_s18  ;;  %1221 = vrot.lane.b32.xlu0 %v10259_v35, %s4640_s28  ;;  %v3351_v6 = vld [vmem:[%s9693_s6 + $0x70] sm:$0xff] }
 0x2a7   :  { %3556 = vmatprep.subr.mxu1 %v10283_v57 }
 0x2a8   :  { %v6966_v58 = vpop.permute.xlu1 %1715  ;;  %v6968_v25 = vpop.permute.xlu0 %2289  ;;  %3557 = vmatpush1.msra.mxu1 %v3351_v6  ;;  %v3349_v6 = vld [vmem:[%s9693_s6 + $0x60] sm:$0xff] }
 0x2a9   :  { %10279 = vst [vmem:[#allocation296_spill] sm:$0xff] %v6966_v58  ;;  %10280 = vst [vmem:[#allocation297_spill] sm:$0xff] %v6968_v25  ;;  %v3350_v58 = vld [vmem:[%s9693_s6 + $0x68] sm:$0xff]  ;;  %3558 = vmatprep.subr.mxu1 %v10283_v57  ;;  %v10290_v25 = vld [vmem:[#allocation148_spill] sm:$0xff] }
 0x2aa   :  { %1923 = vrot.lane.b32.xlu1 %v10270_v22, %s4639_s23  ;;  %1477 = vrot.lane.b32.xlu0 %v10271_v15, %s4642_s17 }
 0x2ab   :  { %3559 = vmatpush1.msra.mxu1 %v3350_v58 }
 0x2ac   :  { %v6980_v35 = vpop.permute.xlu1 %1907  ;;  %v6982_v50 = vpop.permute.xlu0 %1461  ;;  %3560 = vmatprep.subr.mxu1 %v10283_v57 }
 0x2ad   :  { %10281 = vst [vmem:[#allocation298_spill] sm:$0xff] %v6980_v35  ;;  %10282 = vst [vmem:[#allocation299_spill] sm:$0xff] %v6982_v50  ;;  %v10286_v50 = vld [vmem:[#allocation147_spill] sm:$0xff]  ;;  %3561 = vmatpush1.msra.mxu1 %v3349_v6 }
 0x2ae   :  { %2115 = vrot.lane.b32.xlu1 %v6151_v33, %s4641_s13  ;;  %1733 = vrot.lane.b32.xlu0 %v6147_v3, %s4643_s18  ;;  %v3348_v3 = vld [vmem:[%s9693_s6 + $0x58] sm:$0xff] }
 0x2af   :  { %3562 = vmatprep.subr.mxu1 %v10283_v57  ;;  %v10289_v35 = vld [vmem:[#allocation139_spill] sm:$0xff] }
 0x2b0   :  { %v6993_v38 = vpop.permute.xlu1 %2099  ;;  %v6995_v15 = vpop.permute.xlu0 %1717  ;;  %3563 = vmatpush1.msra.mxu1 %v3348_v3  ;;  %v3346_v3 = vld [vmem:[%s9693_s6 + $0x48] sm:$0xff] }
 0x2b1   :  { %10284 = vst [vmem:[#allocation300_spill] sm:$0xff] %v6993_v38  ;;  %10285 = vst [vmem:[#allocation301_spill] sm:$0xff] %v6995_v15  ;;  %v3347_v15 = vld [vmem:[%s9693_s6 + $0x50] sm:$0xff]  ;;  %3564 = vmatprep.subr.mxu1 %v10283_v57 }
 0x2b2   :  { %2307 = vrot.lane.b32.xlu1 %v10286_v50, %s4645_s22  ;;  %1925 = vrot.lane.b32.xlu0 %v10276_v2, %s4639_s23 }
 0x2b3   :  { %3565 = vmatpush1.msra.mxu1 %v3347_v15 }
 0x2b4   :  { %v7008_v38 = vpop.permute.xlu1 %2291  ;;  %v7010_v58 = vpop.permute.xlu0 %1909  ;;  %3566 = vmatprep.subr.mxu1 %v10283_v57 }
 0x2b5   :  { %10287 = vst [vmem:[#allocation302_spill] sm:$0xff] %v7008_v38  ;;  %10288 = vst [vmem:[#allocation303_spill] sm:$0xff] %v7010_v58  ;;  %v3345_v58 = vld [vmem:[%s9693_s6 + $0x40] sm:$0xff]  ;;  %3567 = vmatpush1.msra.mxu1 %v3346_v3 }
 0x2b6   :  { %2499 = vrot.lane.b32.xlu1 %v10289_v35, %s4644_s26  ;;  %2117 = vrot.lane.b32.xlu0 %v10290_v25, %s4641_s13 }
 0x2b7   :  { %3568 = vmatprep.subr.mxu1 %v10283_v57 }
 0x2b8   :  { %v7021_v6 = vpop.permute.xlu1 %2483  ;;  %v7023_v38 = vpop.permute.xlu0 %2101  ;;  %3569 = vmatpush1.msra.mxu1 %v3345_v58  ;;  %v3343_v58 = vld [vmem:[%s9693_s6 + $0x30] sm:$0xff] }
 0x2b9   :  { %10291 = vst [vmem:[#allocation139_spill] sm:$0xff] %v7021_v6  ;;  %10292 = vst [vmem:[#allocation304_spill] sm:$0xff] %v7023_v38  ;;  %v3344_v38 = vld [vmem:[%s9693_s6 + $0x38] sm:$0xff]  ;;  %3570 = vmatprep.subr.mxu1 %v10283_v57 }
 0x2ba   :  { %1223 = vrot.lane.b32.xlu1 %v10270_v22, %s4640_s28  ;;  %2309 = vrot.lane.b32.xlu0 %v6195_v26, %s4645_s22  ;;  %v10295_v22 = vld [vmem:[#allocation144_spill] sm:$0xff] }
 0x2bb   :  { %3571 = vmatpush1.msra.mxu1 %v3344_v38  ;;  %v759_v38 = vadd.f32 %v6035_v13, %v6201_v18 }
 0x2bc   :  { %v7036_v6 = vpop.permute.xlu1 %1207  ;;  %v7038_v15 = vpop.permute.xlu0 %2293  ;;  %3572 = vmatprep.subr.mxu1 %v10283_v57 }
 0x2bd   :  { %10293 = vst [vmem:[#allocation305_spill] sm:$0xff] %v7036_v6  ;;  %10294 = vst [vmem:[#allocation306_spill] sm:$0xff] %v7038_v15  ;;  %3573 = vmatpush1.msra.mxu1 %v3343_v58  ;;  %v7081_v18 = vmax.f32 %v759_v38, 0.0  ;;  %v3339_v38 = vld [vmem:[%s9693_s6 + $0x10] sm:$0xff] }
 0x2be   :  { %1479 = vrot.lane.b32.xlu1 %v6151_v33, %s4642_s17  ;;  %2501 = vrot.lane.b32.xlu0 %v10295_v22, %s4644_s26  ;;  %v3342_v33 = vld [vmem:[%s9693_s6 + $0x28] sm:$0xff] }
 0x2bf   :  { %3574 = vmatprep.subr.mxu1 %v10283_v57  ;;  %10300 = vst [vmem:[#allocation310_spill] sm:$0xff] %v7081_v18  ;;  %v10313_v7 = vrot.slane %v7081_v18, 1 }
 0x2c0   :  { %v7049_v3 = vpop.permute.xlu1 %1463  ;;  %v7051_v6 = vpop.permute.xlu0 %2485  ;;  %3575 = vmatpush1.msra.mxu1 %v3342_v33 }
 0x2c1   :  { %10296 = vst [vmem:[#allocation144_spill] sm:$0xff] %v7049_v3  ;;  %10297 = vst [vmem:[#allocation307_spill] sm:$0xff] %v7051_v6  ;;  %3576 = vmatprep.subr.mxu1 %v10283_v57 }
 0x2c2   :  { %1735 = vrot.lane.b32.xlu1 %v10286_v50, %s4643_s18  ;;  %1225 = vrot.lane.b32.xlu0 %v10276_v2, %s4640_s28  ;;  %v764_v50 = vadd.f32 %v6035_v13, %v6225_v34  ;;  %v3341_v2 = vld [vmem:[%s9693_s6 + $0x20] sm:$0xff]  ;;  %v3340_v13 = vld [vmem:[%s9693_s6 + $0x18] sm:$0xff] }
 0x2c3   :  { %3577 = vmatpush1.msra.mxu1 %v3341_v2  ;;  %v10304_v34 = vld [vmem:[#allocation153_spill] sm:$0xff] }
 0x2c4   :  { %v7066_v6 = vpop.permute.xlu1 %1719  ;;  %v7068_v3 = vpop.permute.xlu0 %1209  ;;  %v7090_v33 = vmax.f32 %v764_v50, 0.0  ;;  %3578 = vmatprep.subr.mxu1 %v10283_v57 }
 0x2c5   :  { %10298 = vst [vmem:[#allocation308_spill] sm:$0xff] %v7066_v6  ;;  %10299 = vst [vmem:[#allocation309_spill] sm:$0xff] %v7068_v3  ;;  %3579 = vmatpush1.msra.mxu1 %v3340_v13 }
 0x2c6   :  { %1927 = vrot.lane.b32.xlu1 %v10289_v35, %s4639_s23  ;;  %1481 = vrot.lane.b32.xlu0 %v10290_v25, %s4642_s17  ;;  %10303 = vst [vmem:[#allocation313_spill] sm:$0xff] %v7090_v33  ;;  %v10311_v15 = vrot.slane %v7090_v33, 7 }
 0x2c7   :  { %3580 = vmatprep.subr.mxu1 %v10283_v57 }
 0x2c8   :  { %v7083_v58 = vpop.permute.xlu1 %1911  ;;  %v7085_v3 = vpop.permute.xlu0 %1465  ;;  %3581 = vmatpush1.msra.mxu1 %v3339_v38  ;;  %v3337_v38 = vld [vmem:[%s9693_s6] sm:$0xff] }
 0x2c9   :  { %10301 = vst [vmem:[#allocation311_spill] sm:$0xff] %v7083_v58  ;;  %10302 = vst [vmem:[#allocation312_spill] sm:$0xff] %v7085_v3  ;;  %v3338_v3 = vld [vmem:[%s9693_s6 + $0x8] sm:$0xff]  ;;  %3582 = vmatprep.subr.mxu1 %v10283_v57 }
 0x2ca   :  { %2119 = vrot.lane.b32.xlu1 %v10304_v34, %s4641_s13  ;;  %1155 = vrot.lane.b32.xlu0 %v7081_v18, %s4640_s28  ;;  %v10309_v58 = vld [vmem:[#allocation5_spill] sm:$0xff] }
 0x2cb   :  { %3583 = vmatpush1.msra.mxu1 %v3338_v3  ;;  %v10310_v6 = vrot.slane %v10309_v58, 7  ;;  %v3354_v3 = vld [vmem:[%s9693_s6 + $0x88] sm:$0xff] }
 0x2cc   :  { %v7100_v2 = vpop.permute.xlu1 %2103  ;;  %v7102_v25 = vpop.permute.xlu0 %1721  ;;  %3584 = vmatprep.subr.mxu1 %v10283_v57 }
 0x2cd   :  { %10305 = vst [vmem:[#allocation314_spill] sm:$0xff] %v7100_v2  ;;  %10306 = vst [vmem:[#allocation315_spill] sm:$0xff] %v7102_v25  ;;  %v1025_v2 = vrot.slane %v7090_v33, 1  ;;  %v7129_v13 = vsel %vm897_vm2, %v10311_v15, %v10310_v6  ;;  %3585 = vmatpush1.msra.mxu1 %v3337_v38 }
 0x2ce   :  { %2311 = vrot.lane.b32.xlu1 %v6219_v28, %s4645_s22  ;;  %1157 = vrot.lane.b32.xlu0 %v7090_v33, %s4640_s28  ;;  %10312 = vst [vmem:[#allocation318_spill] sm:$0xff] %v7129_v13 }
 0x2cf   :  { %3614 = vmatprep.subr.mxu1 %v10283_v57 }
 0x2d0   :  { %v7116_v25 = vpop.permute.xlu1 %2295  ;;  %v7118_v50 = vpop.permute.xlu0 %1913  ;;  %3615 = vmatpush2.msra.mxu1 %v3354_v3 }
 0x2d1   :  { %10307 = vst [vmem:[#allocation316_spill] sm:$0xff] %v7116_v25  ;;  %10308 = vst [vmem:[#allocation317_spill] sm:$0xff] %v7118_v50  ;;  %v7135_v25 = vsel %vm1026_vm1, %v10313_v7, %v1025_v2  ;;  %v10315_v7 = vrot.slane %v10309_v58, 1  ;;  %3616 = vmatprep.subr.mxu1 %v10283_v57 }
 0x2d2   :  { %10314 = vst [vmem:[#allocation319_spill] sm:$0xff] %v7135_v25  ;;  %1667 = vrot.lane.b32.xlu1 %v7129_v13, %s4643_s18  ;;  %1411 = vrot.lane.b32.xlu0 %v7135_v25, %s4642_s17  ;;  %v3353_v25 = vld [vmem:[%s9693_s6 + $0x80] sm:$0xff] }
 0x2d3   :  { %v7154_v50 = vsel %vm1026_vm1, %v1025_v2, %v10315_v7  ;;  %3617 = vmatpush2.msra.mxu1 %v3353_v25  ;;  %v10320_v25 = vld [vmem:[#allocation158_spill] sm:$0xff] }
 0x2d4   :  { %v7145_v6 = vpop.permute.xlu1 %2487  ;;  %v7147_v15 = vpop.permute.xlu0 %2105  ;;  %10316 = vst [vmem:[#allocation320_spill] sm:$0xff] %v7154_v50 }
 0x2d6   :  { %2503 = vrot.lane.b32.xlu1 %v10317_v40, %s4644_s26  ;;  %1413 = vrot.lane.b32.xlu0 %v7154_v50, %s4642_s17 }
 0x2d8   :  { %v7164_v38 = vpop.permute.xlu1 %1211  ;;  %v7166_v58 = vpop.permute.xlu0 %2297 }
 0x2da   :  { %1227 = vrot.lane.b32.xlu1 %v10289_v35, %s4640_s28  ;;  %1737 = vrot.lane.b32.xlu0 %v6195_v26, %s4643_s18 }
 0x2dc   :  { %v7172_v2 = vpop.permute.xlu1 %1467  ;;  %v7174_v3 = vpop.permute.xlu0 %2489 }
 0x2de   :  { %1483 = vrot.lane.b32.xlu1 %v10304_v34, %s4642_s17  ;;  %1929 = vrot.lane.b32.xlu0 %v10295_v22, %s4639_s23 }
 0x2e0   :  { %v7180_v7 = vpop.permute.xlu1 %1723  ;;  %v7182_v57 = vpop.permute.xlu0 %1213 }
 0x2e1   :  { %10318 = vst [vmem:[#allocation149_spill] sm:$0xff] %v7180_v7  ;;  %10319 = vst [vmem:[#allocation321_spill] sm:$0xff] %v7182_v57 }
 0x2e2   :  { %1739 = vrot.lane.b32.xlu1 %v6219_v28, %s4643_s18  ;;  %2121 = vrot.lane.b32.xlu0 %v10320_v25, %s4641_s13  ;;  %v10325_v28 = vld [vmem:[#allocation154_spill] sm:$0xff] }
 0x2e4   :  { %v7188_v35 = vpop.permute.xlu1 %1915  ;;  %v7190_v50 = vpop.permute.xlu0 %1469 }
 0x2e5   :  { %10321 = vst [vmem:[#allocation322_spill] sm:$0xff] %v7188_v35  ;;  %10322 = vst [vmem:[#allocation323_spill] sm:$0xff] %v7190_v50 }
 0x2e6   :  { %1931 = vrot.lane.b32.xlu1 %v10317_v40, %s4639_s23  ;;  %2313 = vrot.lane.b32.xlu0 %v6243_v51, %s4645_s22 }
 0x2e8   :  { %v7196_v26 = vpop.permute.xlu1 %2107  ;;  %v7198_v34 = vpop.permute.xlu0 %1725 }
 0x2e9   :  { %10323 = vst [vmem:[#allocation324_spill] sm:$0xff] %v7196_v26  ;;  %10324 = vst [vmem:[#allocation325_spill] sm:$0xff] %v7198_v34  ;;  %v10328_v34 = vld [vmem:[#allocation159_spill] sm:$0xff] }
 0x2ea   :  { %2123 = vrot.lane.b32.xlu1 %v6247_v56, %s4641_s13  ;;  %2505 = vrot.lane.b32.xlu0 %v10325_v28, %s4644_s26 }
 0x2ec   :  { %v7204_v57 = vpop.permute.xlu1 %2299  ;;  %v7206_v35 = vpop.permute.xlu0 %1917 }
 0x2ed   :  { %10326 = vst [vmem:[#allocation154_spill] sm:$0xff] %v7204_v57  ;;  %10327 = vst [vmem:[#allocation326_spill] sm:$0xff] %v7206_v35 }
 0x2ee   :  { %2315 = vrot.lane.b32.xlu1 %v6265_v61, %s4645_s22  ;;  %1229 = vrot.lane.b32.xlu0 %v10295_v22, %s4640_s28 }
 0x2f0   :  { %v7212_v50 = vpop.permute.xlu1 %2491  ;;  %v7214_v26 = vpop.permute.xlu0 %2109 }
 0x2f2   :  { %2507 = vrot.lane.b32.xlu1 %v10328_v34, %s4644_s26  ;;  %1485 = vrot.lane.b32.xlu0 %v10320_v25, %s4642_s17 }
 0x2f4   :  { %v7220_v7 = vpop.permute.xlu1 %1215  ;;  %v7222_v57 = vpop.permute.xlu0 %2301 }
 0x2f5   :  { %10329 = vst [vmem:[#allocation159_spill] sm:$0xff] %v7220_v7 }
 0x2f6   :  { %1231 = vrot.lane.b32.xlu1 %v10317_v40, %s4640_s28  ;;  %1741 = vrot.lane.b32.xlu0 %v6243_v51, %s4643_s18 }
 0x2f8   :  { %v7228_v22 = vpop.permute.xlu1 %1471  ;;  %v7230_v35 = vpop.permute.xlu0 %2493 }
 0x2f9   :  { %10330 = vst [vmem:[#allocation327_spill] sm:$0xff] %v7230_v35 }
 0x2fa   :  { %1487 = vrot.lane.b32.xlu1 %v6247_v56, %s4642_s17  ;;  %1933 = vrot.lane.b32.xlu0 %v10325_v28, %s4639_s23 }
 0x2fc   :  { %v7236_v25 = vpop.permute.xlu1 %1727  ;;  %v7238_v7 = vpop.permute.xlu0 %1217 }
 0x2fd   :  { %10331 = vst [vmem:[#allocation328_spill] sm:$0xff] %v7236_v25  ;;  %10332 = vst [vmem:[#allocation329_spill] sm:$0xff] %v7238_v7 }
 0x2fe   :  { %1743 = vrot.lane.b32.xlu1 %v6265_v61, %s4643_s18  ;;  %2125 = vrot.lane.b32.xlu0 %v6269_v59, %s4641_s13  ;;  %v10337_v61 = vld [vmem:[#allocation164_spill] sm:$0xff] }
 0x300   :  { %v7244_v40 = vpop.permute.xlu1 %1919  ;;  %v7246_v51 = vpop.permute.xlu0 %1473 }
 0x301   :  { %10333 = vst [vmem:[#allocation330_spill] sm:$0xff] %v7244_v40  ;;  %10334 = vst [vmem:[#allocation331_spill] sm:$0xff] %v7246_v51 }
 0x302   :  { %1935 = vrot.lane.b32.xlu1 %v10328_v34, %s4639_s23  ;;  %2317 = vrot.lane.b32.xlu0 %v6287_v49, %s4645_s22 }
 0x304   :  { %v7252_v56 = vpop.permute.xlu1 %2111  ;;  %v7254_v25 = vpop.permute.xlu0 %1729 }
 0x305   :  { %10335 = vst [vmem:[#allocation332_spill] sm:$0xff] %v7252_v56  ;;  %10336 = vst [vmem:[#allocation333_spill] sm:$0xff] %v7254_v25  ;;  %v10341_v25 = vld [vmem:[#allocation169_spill] sm:$0xff] }
 0x306   :  { %2127 = vrot.lane.b32.xlu1 %v6291_v63, %s4641_s13  ;;  %2509 = vrot.lane.b32.xlu0 %v10337_v61, %s4644_s26 }
 0x308   :  { %v7260_v7 = vpop.permute.xlu1 %2303  ;;  %v7262_v40 = vpop.permute.xlu0 %1921 }
 0x309   :  { %10338 = vst [vmem:[#allocation164_spill] sm:$0xff] %v7260_v7  ;;  %10339 = vst [vmem:[#allocation334_spill] sm:$0xff] %v7262_v40 }
 0x30a   :  { %2319 = vrot.lane.b32.xlu1 %v6309_v9, %s4645_s22  ;;  %1233 = vrot.lane.b32.xlu0 %v10325_v28, %s4640_s28 }
 0x30c   :  { %v7268_v51 = vpop.permute.xlu1 %2495  ;;  %v7270_v56 = vpop.permute.xlu0 %2113 }
 0x30d   :  { %10340 = vst [vmem:[#allocation335_spill] sm:$0xff] %v7270_v56 }
 0x30e   :  { %2511 = vrot.lane.b32.xlu1 %v10341_v25, %s4644_s26  ;;  %1489 = vrot.lane.b32.xlu0 %v6269_v59, %s4642_s17 }
 0x310   :  { %v7276_v35 = vpop.permute.xlu1 %1219  ;;  %v7278_v7 = vpop.permute.xlu0 %2305 }
 0x311   :  { %10342 = vst [vmem:[#allocation169_spill] sm:$0xff] %v7276_v35  ;;  %10343 = vst [vmem:[#allocation336_spill] sm:$0xff] %v7278_v7 }
 0x312   :  { %1235 = vrot.lane.b32.xlu1 %v10328_v34, %s4640_s28  ;;  %1745 = vrot.lane.b32.xlu0 %v6287_v49, %s4643_s18 }
 0x314   :  { %v7284_v28 = vpop.permute.xlu1 %1475  ;;  %v7286_v40 = vpop.permute.xlu0 %2497 }
 0x315   :  { %10344 = vst [vmem:[#allocation337_spill] sm:$0xff] %v7284_v28  ;;  %10345 = vst [vmem:[#allocation338_spill] sm:$0xff] %v7286_v40  ;;  %v10374_v28 = vld [vmem:[#allocation188_spill] sm:$0xff] }
 0x316   :  { %1491 = vrot.lane.b32.xlu1 %v6291_v63, %s4642_s17  ;;  %1937 = vrot.lane.b32.xlu0 %v10337_v61, %s4639_s23 }
 0x318   :  { %v7292_v59 = vpop.permute.xlu1 %1731  ;;  %v7294_v35 = vpop.permute.xlu0 %1221 }
 0x319   :  { %10346 = vst [vmem:[#allocation339_spill] sm:$0xff] %v7292_v59  ;;  %10347 = vst [vmem:[#allocation340_spill] sm:$0xff] %v7294_v35 }
 0x31a   :  { %1747 = vrot.lane.b32.xlu1 %v6309_v9, %s4643_s18  ;;  %2129 = vrot.lane.b32.xlu0 %v6313_v8, %s4641_s13 }
 0x31c   :  { %v7300_v34 = vpop.permute.xlu1 %1923  ;;  %v7302_v49 = vpop.permute.xlu0 %1477 }
 0x31d   :  { %10348 = vst [vmem:[#allocation341_spill] sm:$0xff] %v7300_v34  ;;  %10349 = vst [vmem:[#allocation342_spill] sm:$0xff] %v7302_v49  ;;  %v10354_v49 = vld [vmem:[#allocation186_spill] sm:$0xff] }
 0x31e   :  { %1939 = vrot.lane.b32.xlu1 %v10341_v25, %s4639_s23  ;;  %2321 = vrot.lane.b32.xlu0 %v6331_v54, %s4645_s22 }
 0x320   :  { %v7308_v63 = vpop.permute.xlu1 %2115  ;;  %v7310_v59 = vpop.permute.xlu0 %1733 }
 0x321   :  { %10350 = vst [vmem:[#allocation343_spill] sm:$0xff] %v7308_v63  ;;  %10351 = vst [vmem:[#allocation344_spill] sm:$0xff] %v7310_v59  ;;  %v10357_v59 = vld [vmem:[#allocation178_spill] sm:$0xff] }
 0x322   :  { %2131 = vrot.lane.b32.xlu1 %v6335_v12, %s4641_s13  ;;  %2513 = vrot.lane.b32.xlu0 %v6293_v24, %s4644_s26 }
 0x324   :  { %v7316_v9 = vpop.permute.xlu1 %2307  ;;  %v7318_v35 = vpop.permute.xlu0 %1925 }
 0x325   :  { %10352 = vst [vmem:[#allocation345_spill] sm:$0xff] %v7316_v9  ;;  %10353 = vst [vmem:[#allocation346_spill] sm:$0xff] %v7318_v35 }
 0x326   :  { %2323 = vrot.lane.b32.xlu1 %v10354_v49, %s4645_s22  ;;  %1237 = vrot.lane.b32.xlu0 %v10337_v61, %s4640_s28 }
 0x328   :  { %v7324_v34 = vpop.permute.xlu1 %2499  ;;  %v7326_v63 = vpop.permute.xlu0 %2117 }
 0x329   :  { %10355 = vst [vmem:[#allocation347_spill] sm:$0xff] %v7324_v34  ;;  %10356 = vst [vmem:[#allocation348_spill] sm:$0xff] %v7326_v63 }
 0x32a   :  { %2515 = vrot.lane.b32.xlu1 %v10357_v59, %s4644_s26  ;;  %1493 = vrot.lane.b32.xlu0 %v6313_v8, %s4642_s17 }
 0x32c   :  { %v7332_v40 = vpop.permute.xlu1 %1223  ;;  %v7334_v9 = vpop.permute.xlu0 %2309 }
 0x32d   :  { %10358 = vst [vmem:[#allocation178_spill] sm:$0xff] %v7332_v40  ;;  %10359 = vst [vmem:[#allocation349_spill] sm:$0xff] %v7334_v9  ;;  %v10370_v9 = vld [vmem:[#allocation52_spill] sm:$0xff] }
 0x32e   :  { %1239 = vrot.lane.b32.xlu1 %v10341_v25, %s4640_s28  ;;  %1749 = vrot.lane.b32.xlu0 %v6331_v54, %s4643_s18 }
 0x330   :  { %v7340_v61 = vpop.permute.xlu1 %1479  ;;  %v7342_v35 = vpop.permute.xlu0 %2501 }
 0x331   :  { %10360 = vst [vmem:[#allocation350_spill] sm:$0xff] %v7340_v61  ;;  %10361 = vst [vmem:[#allocation351_spill] sm:$0xff] %v7342_v35 }
 0x332   :  { %1495 = vrot.lane.b32.xlu1 %v6335_v12, %s4642_s17  ;;  %1941 = vrot.lane.b32.xlu0 %v6293_v24, %s4639_s23 }
 0x334   :  { %v7348_v8 = vpop.permute.xlu1 %1735  ;;  %v7350_v40 = vpop.permute.xlu0 %1225 }
 0x335   :  { %10362 = vst [vmem:[#allocation352_spill] sm:$0xff] %v7348_v8  ;;  %10363 = vst [vmem:[#allocation353_spill] sm:$0xff] %v7350_v40  ;;  %v10367_v40 = vld [vmem:[#allocation47_spill] sm:$0xff] }
 0x336   :  { %1751 = vrot.lane.b32.xlu1 %v10354_v49, %s4643_s18  ;;  %2133 = vrot.lane.b32.xlu0 %v6357_v36, %s4641_s13  ;;  %v2629_v49 = vsel %vm189_vm0, %v7129_v13, %v10367_v40  ;;  %v10371_v40 = vrot.slane %v6733_v5, 7 }
 0x338   :  { %v7356_v25 = vpop.permute.xlu1 %1927  ;;  %v7358_v54 = vpop.permute.xlu0 %1481 }
 0x339   :  { %10364 = vst [vmem:[#allocation354_spill] sm:$0xff] %v7356_v25  ;;  %10365 = vst [vmem:[#allocation355_spill] sm:$0xff] %v7358_v54  ;;  %v10368_v25 = vld [vmem:[#allocation183_spill] sm:$0xff]  ;;  %v893_v54 = vrot.slane %v7081_v18, 7  ;;  %v10373_v18 = vld [vmem:[#allocation64_spill] sm:$0xff] }
 0x33a   :  { %1943 = vrot.lane.b32.xlu1 %v10357_v59, %s4639_s23  ;;  %2325 = vrot.lane.b32.xlu0 %v6375_v43, %s4645_s22 }
 0x33b   :  { %v7386_v13 = vsel %vm897_vm2, %v10371_v40, %v893_v54  ;;  %v10375_v40 = vrot.slane %v7090_v33, 7 }
 0x33c   :  { %v7364_v12 = vpop.permute.xlu1 %2119  ;;  %v1156_v8 = vpop.permute.xlu0 %1155  ;;  %10372 = vst [vmem:[#allocation183_spill] sm:$0xff] %v7386_v13 }
 0x33d   :  { %10366 = vst [vmem:[#allocation356_spill] sm:$0xff] %v7364_v12  ;;  %v2694_v12 = vsel %vm2691_vm3, %v2629_v49, %v10370_v9  ;;  %v2627_v63 = vsel %vm189_vm0, %v7386_v13, %v1156_v8  ;;  %v10377_v8 = vld [vmem:[#allocation45_spill] sm:$0xff] }
 0x33e   :  { %2135 = vrot.lane.b32.xlu1 %v6379_v42, %s4641_s13  ;;  %2517 = vrot.lane.b32.xlu0 %v10368_v25, %s4644_s26 }
 0x340   :  { %v7374_v35 = vpop.permute.xlu1 %2311  ;;  %v1158_v61 = vpop.permute.xlu0 %1157 }
 0x341   :  { %10369 = vst [vmem:[#allocation47_spill] sm:$0xff] %v7374_v35  ;;  %v2759_v35 = vsel %vm2756_vm4, %v2694_v12, %v10373_v18  ;;  %v7402_v12 = vsel %vm897_vm2, %v893_v54, %v10375_v40  ;;  %v3081_v54 = vld [vmem:[%s9689_s2] sm:$0xff] }
 0x342   :  { %2327 = vrot.lane.b32.xlu1 %v6397_v20, %s4645_s22  ;;  %1241 = vrot.lane.b32.xlu0 %v6293_v24, %s4640_s28  ;;  %10376 = vst [vmem:[#allocation52_spill] sm:$0xff] %v7402_v12  ;;  %v10381_v40 = vld [vmem:[#allocation48_spill] sm:$0xff] }
 0x344   :  { %v1668_v49 = vpop.permute.xlu1 %1667  ;;  %v1412_v9 = vpop.permute.xlu0 %1411 }
 0x345   :  { %v2692_v34 = vsel %vm2691_vm3, %v2627_v63, %v1412_v9  ;;  %v10378_v63 = vld [vmem:[#allocation56_spill] sm:$0xff] }
 0x346   :  { %v2757_v24 = vsel %vm2756_vm4, %v2692_v34, %v1668_v49  ;;  %2519 = vrot.lane.b32.xlu1 %v10374_v28, %s4644_s26  ;;  %1497 = vrot.lane.b32.xlu0 %v6357_v36, %s4642_s17  ;;  %v2824_v9 = vsel %vm2821_vm5, %v2759_v35, %v10378_v63  ;;  %v2628_v34 = vsel %vm189_vm0, %v7402_v12, %v1158_v61  ;;  %v10379_v49 = vld [vmem:[#allocation49_spill] sm:$0xff]  ;;  %v10388_v12 = vld [vmem:[#allocation46_spill] sm:$0xff] }
 0x347   :  { %v2822_v18 = vsel %vm2821_vm5, %v2757_v24, %v10377_v8  ;;  %v2630_v24 = vsel %vm189_vm0, %v10382_v0, %v10381_v40  ;;  %v10383_v8 = vld [vmem:[#allocation62_spill] sm:$0xff]  ;;  %v10384_v63 = vld [vmem:[#allocation53_spill] sm:$0xff] }
 0x348   :  { %v2887_v13 = vsel %vm2886_vm6, %v2822_v18, %v10379_v49  ;;  %v7412_v5 = vpop.permute.xlu1 %2503  ;;  %v1414_v33 = vpop.permute.xlu0 %1413  ;;  %v3084_v18 = vld [vmem:[%s9689_s2 + $0x18] sm:$0xff]  ;;  %v10385_v40 = vld [vmem:[#allocation54_spill] sm:$0xff] }
 0x349   :  { %10380 = vst [vmem:[#allocation64_spill] sm:$0xff] %v7412_v5  ;;  %v2693_v35 = vsel %vm2691_vm3, %v2628_v34, %v1414_v33  ;;  %v2952_v61 = vsel %vm2951_vm7, %v2887_v13, %v10383_v8  ;;  %v10386_v33 = vld [vmem:[#allocation66_spill] sm:$0xff]  ;;  %v10387_v13 = vld [vmem:[#allocation57_spill] sm:$0xff] }
 0x34a   :  { %v2758_v49 = vsel %vm2756_vm4, %v2693_v35, %v10384_v63  ;;  %1243 = vrot.lane.b32.xlu1 %v10357_v59, %s4640_s28  ;;  %1753 = vrot.lane.b32.xlu0 %v6375_v43, %s4643_s18  ;;  %v3017_v0 = vsel %vm3016_vm8, %v2952_v61, %v10385_v40  ;;  %v2889_v34 = vsel %vm2886_vm6, %v2824_v9, %v10386_v33  ;;  %v10389_v35 = vld [vmem:[#allocation71_spill] sm:$0xff]  ;;  %v10392_v61 = vld [vmem:[#allocation17_spill] sm:$0xff] }
 0x34b   :  { %v2695_v8 = vsel %vm2691_vm3, %v2630_v24, %v10387_v13  ;;  %v2823_v36 = vsel %vm2821_vm5, %v2758_v49, %v10388_v12  ;;  %v3209_v5 = vmul.f32 %v3081_v54, %v3017_v0  ;;  %v10390_v59 = vld [vmem:[#allocation55_spill] sm:$0xff]  ;;  %v3212_v24 = vmul.f32 %v3084_v18, %v10392_v61  ;;  %v10394_v12 = vld [vmem:[#allocation80_spill] sm:$0xff]  ;;  %v10395_v49 = vld [vmem:[#allocation58_spill] sm:$0xff] }
 0x34c   :  { %v2760_v63 = vsel %vm2756_vm4, %v2695_v8, %v10389_v35  ;;  %v2888_v7 = vsel %vm2886_vm6, %v2823_v36, %v10390_v59  ;;  %v7444_v43 = vpop.permute.xlu1 %1227  ;;  %v7446_v56 = vpop.permute.xlu0 %1737  ;;  %v3083_v9 = vld [vmem:[%s9689_s2 + $0x10] sm:$0xff]  ;;  %v2954_v54 = vsel %vm2951_vm7, %v2889_v34, %v10394_v12  ;;  %v3086_v36 = vld [vmem:[%s9689_s2 + $0x28] sm:$0xff] }
 0x34d   :  { %10391 = vst [vmem:[#allocation188_spill] sm:$0xff] %v7444_v43  ;;  %3619 = vmatmul.mubr.f32.vlgmr.msra.gmra.mxu1 %v3209_v5  ;;  %v10393_v40 = vld [vmem:[#allocation67_spill] sm:$0xff]  ;;  %v10398_v18 = vld [vmem:[#allocation70_spill] sm:$0xff]  ;;  %v10400_v61 = vld [vmem:[#allocation73_spill] sm:$0xff] }
 0x34e   :  { %v2953_v0 = vsel %vm2951_vm7, %v2888_v7, %v10393_v40  ;;  %v10396_v33 = vld [vmem:[#allocation11_spill] sm:$0xff]  ;;  %1499 = vrot.lane.b32.xlu1 %v6379_v42, %s4642_s17  ;;  %1945 = vrot.lane.b32.xlu0 %v10368_v25, %s4639_s23 }
 0x34f   :  { %v2631_v13 = vsel %vm189_vm0, %v10396_v33, %v10395_v49  ;;  %v10397_v5 = vld [vmem:[#allocation59_spill] sm:$0xff]  ;;  %4458 = vmatprep.mubr.msk.f32.mxu1 %vm189_vm0, %v3212_v24 }
 0x350   :  { %v3018_v7 = vsel %vm3016_vm8, %v2953_v0, %v10397_v5  ;;  %v2696_v34 = vsel %vm2691_vm3, %v2631_v13, %v10398_v18  ;;  %v10399_v8 = vld [vmem:[#allocation63_spill] sm:$0xff]  ;;  %v7477_v33 = vpop.permute.xlu1 %1483  ;;  %v7479_v42 = vpop.permute.xlu0 %1929  ;;  %v10404_v0 = vld [vmem:[#allocation72_spill] sm:$0xff]  ;;  %v10405_v13 = vld [vmem:[#allocation29_spill] sm:$0xff] }
 0x351   :  { %v2825_v35 = vsel %vm2821_vm5, %v2760_v63, %v10399_v8  ;;  %v3211_v59 = vmul.f32 %v3083_v9, %v3018_v7  ;;  %v10401_v12 = vld [vmem:[#allocation83_spill] sm:$0xff]  ;;  %10402 = vst [vmem:[#allocation45_spill] sm:$0xff] %v7477_v33  ;;  %10403 = vst [vmem:[#allocation56_spill] sm:$0xff] %v7479_v42  ;;  %v3019_v5 = vsel %vm3016_vm8, %v2954_v54, %v10404_v0  ;;  %v3085_v63 = vld [vmem:[%s9689_s2 + $0x20] sm:$0xff] }
 0x352   :  { %v2890_v40 = vsel %vm2886_vm6, %v2825_v35, %v10400_v61  ;;  %v2761_v49 = vsel %vm2756_vm4, %v2696_v34, %v10401_v12  ;;  %v3214_v24 = vmul.f32 %v3086_v36, %v10405_v13  ;;  %v10406_v9 = vld [vmem:[#allocation86_spill] sm:$0xff]  ;;  %v3088_v18 = vld [vmem:[%s9689_s2 + $0x38] sm:$0xff]  ;;  %v10407_v34 = vld [vmem:[#allocation65_spill] sm:$0xff]  ;;  %1755 = vrot.lane.b32.xlu1 %v6397_v20, %s4643_s18 }
 0x353   :  { %v2955_v7 = vsel %vm2951_vm7, %v2890_v40, %v10406_v9  ;;  %3624 = vmatmul.mubr.f32.gmra.mxu1 %v3211_v59  ;;  %v10408_v8 = vld [vmem:[#allocation12_spill] sm:$0xff]  ;;  %v10409_v54 = vld [vmem:[#allocation197_spill] sm:$0xff]  ;;  %v10410_v61 = vld [vmem:[#allocation75_spill] sm:$0xff]  ;;  %v3213_v40 = vmul.f32 %v3085_v63, %v3019_v5 }
 0x354   :  { %v2632_v35 = vsel %vm189_vm0, %v10408_v8, %v10407_v34  ;;  %2137 = vrot.lane.b32.xlu0 %v10409_v54, %s4641_s13  ;;  %v10411_v12 = vld [vmem:[#allocation74_spill] sm:$0xff]  ;;  %4459 = vmatprep.mubr.msk.f32.mxu1 %vm189_vm0, %v3214_v24  ;;  %v10412_v0 = vld [vmem:[#allocation85_spill] sm:$0xff]  ;;  %v7510_v33 = vpop.permute.xlu1 %1739  ;;  %v7512_v43 = vpop.permute.xlu0 %2121  ;;  %v10418_v5 = vld [vmem:[#allocation100_spill] sm:$0xff] }
 0x355   :  { %v2697_v36 = vsel %vm2691_vm3, %v2632_v35, %v10410_v61  ;;  %v2826_v59 = vsel %vm2821_vm5, %v2761_v49, %v10411_v12  ;;  %v10413_v9 = vld [vmem:[#allocation77_spill] sm:$0xff]  ;;  %v10414_v8 = vld [vmem:[#allocation90_spill] sm:$0xff]  ;;  %10415 = vst [vmem:[#allocation49_spill] sm:$0xff] %v7510_v33  ;;  %10416 = vst [vmem:[#allocation48_spill] sm:$0xff] %v7512_v43 }
 0x356   :  { %v2891_v13 = vsel %vm2886_vm6, %v2826_v59, %v10412_v0  ;;  %v3020_v34 = vsel %vm3016_vm8, %v2955_v7, %v10413_v9  ;;  %v2762_v20 = vsel %vm2756_vm4, %v2697_v36, %v10414_v8  ;;  %v3087_v49 = vld [vmem:[%s9689_s2 + $0x30] sm:$0xff]  ;;  %v10417_v35 = vld [vmem:[#allocation33_spill] sm:$0xff]  ;;  %v10419_v61 = vld [vmem:[#allocation76_spill] sm:$0xff]  ;;  %1947 = vrot.lane.b32.xlu1 %v10374_v28, %s4639_s23 }
 0x357   :  { %v3216_v24 = vmul.f32 %v3088_v18, %v10417_v35  ;;  %v2956_v63 = vsel %vm2951_vm7, %v2891_v13, %v10418_v5  ;;  %3629 = vmatmul.mubr.f32.gmra.mxu1 %v3213_v40  ;;  %v3090_v7 = vld [vmem:[%s9689_s2 + $0x48] sm:$0xff]  ;;  %v10420_v36 = vld [vmem:[#allocation24_spill] sm:$0xff]  ;;  %v3215_v13 = vmul.f32 %v3087_v49, %v3020_v34  ;;  %v10424_v35 = vld [vmem:[#allocation91_spill] sm:$0xff] }
 0x358   :  { %v2633_v12 = vsel %vm189_vm0, %v10420_v36, %v10419_v61  ;;  %2329 = vrot.lane.b32.xlu0 %v6419_v60, %s4645_s22  ;;  %v10421_v59 = vld [vmem:[#allocation89_spill] sm:$0xff]  ;;  %v10423_v9 = vld [vmem:[#allocation92_spill] sm:$0xff]  ;;  %v3021_v5 = vsel %vm3016_vm8, %v2956_v63, %v10424_v35  ;;  %v10425_v61 = vld [vmem:[#allocation102_spill] sm:$0xff]  ;;  %v7541_v33 = vpop.permute.xlu1 %1931  ;;  %v7543_v43 = vpop.permute.xlu0 %2313 }
 0x359   :  { %v2698_v18 = vsel %vm2691_vm3, %v2633_v12, %v10421_v59  ;;  %v10422_v0 = vld [vmem:[#allocation81_spill] sm:$0xff]  ;;  %4460 = vmatprep.mubr.msk.f32.mxu1 %vm189_vm0, %v3216_v24  ;;  %10426 = vst [vmem:[#allocation62_spill] sm:$0xff] %v7541_v33  ;;  %10427 = vst [vmem:[#allocation53_spill] sm:$0xff] %v7543_v43  ;;  %v10429_v34 = vld [vmem:[#allocation108_spill] sm:$0xff] }
 0x35a   :  { %v2827_v40 = vsel %vm2821_vm5, %v2762_v20, %v10422_v0  ;;  %v2763_v36 = vsel %vm2756_vm4, %v2698_v18, %v10425_v61  ;;  %v3089_v20 = vld [vmem:[%s9689_s2 + $0x40] sm:$0xff]  ;;  %v3092_v63 = vld [vmem:[%s9689_s2 + $0x58] sm:$0xff]  ;;  %v10431_v18 = vld [vmem:[#allocation30_spill] sm:$0xff]  ;;  %2139 = vrot.lane.b32.xlu1 %v6423_v44, %s4641_s13 }
 0x35b   :  { %v2892_v8 = vsel %vm2886_vm6, %v2827_v40, %v10423_v9  ;;  %v10428_v12 = vld [vmem:[#allocation37_spill] sm:$0xff]  ;;  %3634 = vmatmul.mubr.f32.gmra.mxu1 %v3215_v13  ;;  %v10430_v59 = vld [vmem:[#allocation84_spill] sm:$0xff]  ;;  %v10433_v9 = vld [vmem:[#allocation94_spill] sm:$0xff] }
 0x35c   :  { %v3218_v24 = vmul.f32 %v3090_v7, %v10428_v12  ;;  %v2957_v49 = vsel %vm2951_vm7, %v2892_v8, %v10429_v34  ;;  %v2634_v0 = vsel %vm189_vm0, %v10431_v18, %v10430_v59  ;;  %v10432_v40 = vld [vmem:[#allocation193_spill] sm:$0xff]  ;;  %v3217_v8 = vmul.f32 %v3089_v20, %v3021_v5  ;;  %v10435_v61 = vld [vmem:[#allocation107_spill] sm:$0xff]  ;;  %v10436_v34 = vld [vmem:[#allocation98_spill] sm:$0xff]  ;;  %v7572_v43 = vpop.permute.xlu1 %2123  ;;  %v7574_v42 = vpop.permute.xlu0 %2505 }
 0x35d   :  { %2521 = vrot.lane.b32.xlu0 %v10432_v40, %s4644_s26  ;;  %v2699_v7 = vsel %vm2691_vm3, %v2634_v0, %v10433_v9  ;;  %v10434_v35 = vld [vmem:[#allocation93_spill] sm:$0xff]  ;;  %v3022_v59 = vsel %vm3016_vm8, %v2957_v49, %v10436_v34  ;;  %v10437_v18 = vld [vmem:[#allocation111_spill] sm:$0xff]  ;;  %10438 = vst [vmem:[#allocation54_spill] sm:$0xff] %v7572_v43  ;;  %v10440_v5 = vld [vmem:[#allocation130_spill] sm:$0xff] }
 0x35e   :  { %v2828_v13 = vsel %vm2821_vm5, %v2763_v36, %v10434_v35  ;;  %4461 = vmatprep.mubr.msk.f32.mxu1 %vm189_vm0, %v3218_v24  ;;  %v2764_v33 = vsel %vm2756_vm4, %v2699_v7, %v10437_v18  ;;  %v3091_v36 = vld [vmem:[%s9689_s2 + $0x50] sm:$0xff]  ;;  %v10439_v0 = vld [vmem:[#allocation41_spill] sm:$0xff]  ;;  %2331 = vrot.lane.b32.xlu1 %v6441_v47, %s4645_s22  ;;  %v10445_v34 = vld [vmem:[#allocation116_spill] sm:$0xff] }
 0x35f   :  { %v2893_v12 = vsel %vm2886_vm6, %v2828_v13, %v10435_v61  ;;  %v3220_v24 = vmul.f32 %v3092_v63, %v10439_v0  ;;  %3639 = vmatmul.mubr.f32.gmra.mxu1 %v3217_v8  ;;  %v3094_v49 = vld [vmem:[%s9689_s2 + $0x68] sm:$0xff]  ;;  %v10446_v0 = vld [vmem:[#allocation115_spill] sm:$0xff] }
 0x360   :  { %v2958_v20 = vsel %vm2951_vm7, %v2893_v12, %v10440_v5  ;;  %v10441_v9 = vld [vmem:[#allocation97_spill] sm:$0xff]  ;;  %v10442_v7 = vld [vmem:[#allocation34_spill] sm:$0xff]  ;;  %v3219_v12 = vmul.f32 %v3091_v36, %v3022_v59  ;;  %v7603_v43 = vpop.permute.xlu1 %2315 }
 0x361   :  { %v2635_v35 = vsel %vm189_vm0, %v10442_v7, %v10441_v9  ;;  %1245 = vrot.lane.b32.xlu0 %v10368_v25, %s4640_s28  ;;  %v10443_v13 = vld [vmem:[#allocation110_spill] sm:$0xff]  ;;  %v10444_v61 = vld [vmem:[#allocation101_spill] sm:$0xff]  ;;  %4462 = vmatprep.mubr.msk.f32.mxu1 %vm189_vm0, %v3220_v24  ;;  %v3023_v5 = vsel %vm3016_vm8, %v2958_v20, %v10446_v0  ;;  %v10447_v9 = vld [vmem:[#allocation135_spill] sm:$0xff]  ;;  %10448 = vst [vmem:[#allocation66_spill] sm:$0xff] %v7603_v43  ;;  %v7605_v25 = vpop.permute.xlu0 %1229 }
 0x362   :  { %v2700_v63 = vsel %vm2691_vm3, %v2635_v35, %v10443_v13  ;;  %v2829_v8 = vsel %vm2821_vm5, %v2764_v33, %v10444_v61  ;;  %v3093_v33 = vld [vmem:[%s9689_s2 + $0x60] sm:$0xff]  ;;  %v3096_v20 = vld [vmem:[%s9689_s2 + $0x78] sm:$0xff]  ;;  %2523 = vrot.lane.b32.xlu1 %v6407_v32, %s4644_s26 }
 0x363   :  { %v2894_v18 = vsel %vm2886_vm6, %v2829_v8, %v10445_v34  ;;  %v2765_v7 = vsel %vm2756_vm4, %v2700_v63, %v10447_v9  ;;  %v10449_v35 = vld [vmem:[#allocation13_spill] sm:$0xff]  ;;  %3644 = vmatmul.mubr.f32.gmra.mxu1 %v3219_v12  ;;  %v10451_v13 = vld [vmem:[#allocation103_spill] sm:$0xff]  ;;  %v10452_v63 = vld [vmem:[#allocation38_spill] sm:$0xff] }
 0x364   :  { %v3222_v24 = vmul.f32 %v3094_v49, %v10449_v35  ;;  %v10450_v59 = vld [vmem:[#allocation141_spill] sm:$0xff]  ;;  %v2636_v61 = vsel %vm189_vm0, %v10452_v63, %v10451_v13  ;;  %v10454_v34 = vld [vmem:[#allocation120_spill] sm:$0xff]  ;;  %v10456_v35 = vld [vmem:[#allocation126_spill] sm:$0xff]  ;;  %v7634_v43 = vpop.permute.xlu1 %2507 }
 0x365   :  { %v2959_v36 = vsel %vm2951_vm7, %v2894_v18, %v10450_v59  ;;  %1501 = vrot.lane.b32.xlu0 %v10409_v54, %s4642_s17  ;;  %v10453_v8 = vld [vmem:[#allocation121_spill] sm:$0xff]  ;;  %v2830_v12 = vsel %vm2821_vm5, %v2765_v7, %v10454_v34  ;;  %v3221_v18 = vmul.f32 %v3093_v33, %v3023_v5  ;;  %v10455_v0 = vld [vmem:[#allocation140_spill] sm:$0xff]  ;;  %v10457_v13 = vld [vmem:[#allocation146_spill] sm:$0xff]  ;;  %v7636_v54 = vpop.permute.xlu0 %1485 }
 0x366   :  { %v2701_v49 = vsel %vm2691_vm3, %v2636_v61, %v10453_v8  ;;  %4463 = vmatprep.mubr.msk.f32.mxu1 %vm189_vm0, %v3222_v24  ;;  %v2895_v9 = vsel %vm2886_vm6, %v2830_v12, %v10455_v0  ;;  %v3024_v59 = vsel %vm3016_vm8, %v2959_v36, %v10456_v35  ;;  %v3095_v7 = vld [vmem:[%s9689_s2 + $0x70] sm:$0xff]  ;;  %v10459_v5 = vld [vmem:[#allocation165_spill] sm:$0xff]  ;;  %1247 = vrot.lane.b32.xlu1 %v10374_v28, %s4640_s28 }
 0x367   :  { %v2766_v63 = vsel %vm2756_vm4, %v2701_v49, %v10457_v13  ;;  %v10458_v61 = vld [vmem:[#allocation15_spill] sm:$0xff]  ;;  %v2960_v33 = vsel %vm2951_vm7, %v2895_v9, %v10459_v5  ;;  %3649 = vmatmul.mubr.f32.gmra.mxu1 %v3221_v18  ;;  %v3098_v36 = vld [vmem:[%s9689_s2 + $0x88] sm:$0xff]  ;;  %v3223_v9 = vmul.f32 %v3095_v7, %v3024_v59 }
 0x368   :  { %v3224_v24 = vmul.f32 %v3096_v20, %v10458_v61  ;;  %v10460_v8 = vld [vmem:[#allocation125_spill] sm:$0xff]  ;;  %v10461_v49 = vld [vmem:[#allocation42_spill] sm:$0xff]  ;;  %v10463_v0 = vld [vmem:[#allocation131_spill] sm:$0xff] }
 0x369   :  { %v2637_v34 = vsel %vm189_vm0, %v10461_v49, %v10460_v8  ;;  %1757 = vrot.lane.b32.xlu0 %v6419_v60, %s4643_s18  ;;  %v10462_v12 = vld [vmem:[#allocation145_spill] sm:$0xff]  ;;  %v2831_v18 = vsel %vm2821_vm5, %v2766_v63, %v10463_v0  ;;  %v10464_v35 = vld [vmem:[#allocation151_spill] sm:$0xff]  ;;  %v10465_v61 = vld [vmem:[#allocation150_spill] sm:$0xff]  ;;  %v7665_v49 = vpop.permute.xlu1 %1231  ;;  %v7667_v60 = vpop.permute.xlu0 %1741 }
 0x36a   :  { %v2702_v20 = vsel %vm2691_vm3, %v2637_v34, %v10462_v12  ;;  %4464 = vmatprep.mubr.msk.f32.mxu1 %vm189_vm0, %v3224_v24  ;;  %v2896_v13 = vsel %vm2886_vm6, %v2831_v18, %v10464_v35  ;;  %v3025_v5 = vsel %vm3016_vm8, %v2960_v33, %v10465_v61  ;;  %v10466_v8 = vld [vmem:[#allocation170_spill] sm:$0xff]  ;;  %10467 = vst [vmem:[#allocation57_spill] sm:$0xff] %v7665_v49  ;;  %v3097_v63 = vld [vmem:[%s9689_s2 + $0x80] sm:$0xff]  ;;  %v10469_v59 = vld [vmem:[#allocation175_spill] sm:$0xff] }
 0x36b   :  { %v2767_v28 = vsel %vm2756_vm4, %v2702_v20, %v10466_v8  ;;  %v10468_v34 = vld [vmem:[#allocation18_spill] sm:$0xff]  ;;  %v2961_v7 = vsel %vm2951_vm7, %v2896_v13, %v10469_v59  ;;  %3654 = vmatmul.mubr.f32.gmra.mxu1 %v3223_v9  ;;  %v3100_v33 = vld [vmem:[%s9689_s2 + $0x98] sm:$0xff]  ;;  %1503 = vrot.lane.b32.xlu1 %v6423_v44, %s4642_s17  ;;  %v3225_v13 = vmul.f32 %v3097_v63, %v3025_v5 }
 0x36c   :  { %v3226_v24 = vmul.f32 %v3098_v36, %v10468_v34  ;;  %v10470_v12 = vld [vmem:[#allocation136_spill] sm:$0xff]  ;;  %v10471_v20 = vld [vmem:[#allocation14_spill] sm:$0xff]  ;;  %v10473_v35 = vld [vmem:[#allocation155_spill] sm:$0xff] }
 0x36d   :  { %v2638_v0 = vsel %vm189_vm0, %v10471_v20, %v10470_v12  ;;  %1949 = vrot.lane.b32.xlu0 %v10432_v40, %s4639_s23  ;;  %v10472_v18 = vld [vmem:[#allocation156_spill] sm:$0xff]  ;;  %v2832_v9 = vsel %vm2821_vm5, %v2767_v28, %v10473_v35  ;;  %v10474_v61 = vld [vmem:[#allocation174_spill] sm:$0xff]  ;;  %v10475_v34 = vld [vmem:[#allocation161_spill] sm:$0xff]  ;;  %v7696_v44 = vpop.permute.xlu1 %1487  ;;  %v7698_v49 = vpop.permute.xlu0 %1933 }
 0x36e   :  { %v2703_v36 = vsel %vm2691_vm3, %v2638_v0, %v10472_v18  ;;  %4465 = vmatprep.mubr.msk.f32.mxu1 %vm189_vm0, %v3226_v24  ;;  %v2897_v8 = vsel %vm2886_vm6, %v2832_v9, %v10474_v61  ;;  %v3026_v59 = vsel %vm3016_vm8, %v2961_v7, %v10475_v34  ;;  %v10476_v12 = vld [vmem:[#allocation180_spill] sm:$0xff]  ;;  %10477 = vst [vmem:[#allocation46_spill] sm:$0xff] %v7696_v44  ;;  %10478 = vst [vmem:[#allocation71_spill] sm:$0xff] %v7698_v49  ;;  %v3099_v28 = vld [vmem:[%s9689_s2 + $0x90] sm:$0xff] }
 0x36f   :  { %v2768_v20 = vsel %vm2756_vm4, %v2703_v36, %v10476_v12  ;;  %v10479_v0 = vld [vmem:[#allocation20_spill] sm:$0xff]  ;;  %v10480_v5 = vld [vmem:[#allocation198_spill] sm:$0xff]  ;;  %3659 = vmatmul.mubr.f32.gmra.mxu1 %v3225_v13  ;;  %1759 = vrot.lane.b32.xlu1 %v6441_v47, %s4643_s18  ;;  %v10484_v61 = vld [vmem:[#allocation179_spill] sm:$0xff] }
 0x370   :  { %v3228_v24 = vmul.f32 %v3100_v33, %v10479_v0  ;;  %v2962_v63 = vsel %vm2951_vm7, %v2897_v8, %v10480_v5  ;;  %v3102_v7 = vld [vmem:[%s9689_s2 + $0xa8] sm:$0xff]  ;;  %v10481_v18 = vld [vmem:[#allocation160_spill] sm:$0xff]  ;;  %v3227_v8 = vmul.f32 %v3099_v28, %v3026_v59 }
 0x371   :  { %v10482_v36 = vld [vmem:[#allocation16_spill] sm:$0xff]  ;;  %v10483_v9 = vld [vmem:[#allocation206_spill] sm:$0xff]  ;;  %v10486_v12 = vld [vmem:[#allocation185_spill] sm:$0xff]  ;;  %v7727_v44 = vpop.permute.xlu1 %1743  ;;  %v7729_v49 = vpop.permute.xlu0 %2125 }
 0x372   :  { %v2639_v35 = vsel %vm189_vm0, %v10482_v36, %v10481_v18  ;;  %2141 = vrot.lane.b32.xlu0 %v10483_v9, %s4641_s13  ;;  %v10485_v34 = vld [vmem:[#allocation166_spill] sm:$0xff]  ;;  %4466 = vmatprep.mubr.msk.f32.mxu1 %vm189_vm0, %v3228_v24  ;;  %v10487_v5 = vld [vmem:[#allocation184_spill] sm:$0xff]  ;;  %v10488_v36 = vld [vmem:[#allocation203_spill] sm:$0xff]  ;;  %10489 = vst [vmem:[#allocation55_spill] sm:$0xff] %v7727_v44 }
 0x373   :  { %v2704_v33 = vsel %vm2691_vm3, %v2639_v35, %v10484_v61  ;;  %v2833_v13 = vsel %vm2821_vm5, %v2768_v20, %v10485_v34  ;;  %v3027_v18 = vsel %vm3016_vm8, %v2962_v63, %v10487_v5  ;;  %v3101_v20 = vld [vmem:[%s9689_s2 + $0xa0] sm:$0xff]  ;;  %v10490_v35 = vld [vmem:[#allocation22_spill] sm:$0xff]  ;;  %3664 = vmatmul.mubr.f32.gmra.mxu1 %v3227_v8  ;;  %v3104_v28 = vld [vmem:[%s9689_s2 + $0xb8] sm:$0xff]  ;;  %1951 = vrot.lane.b32.xlu1 %v6407_v32, %s4639_s23 }
 0x374   :  { %v2898_v0 = vsel %vm2886_vm6, %v2833_v13, %v10486_v12  ;;  %v2769_v47 = vsel %vm2756_vm4, %v2704_v33, %v10488_v36  ;;  %v3230_v24 = vmul.f32 %v3102_v7, %v10490_v35  ;;  %v10491_v63 = vld [vmem:[#allocation171_spill] sm:$0xff]  ;;  %v10493_v34 = vld [vmem:[#allocation209_spill] sm:$0xff]  ;;  %v10494_v13 = vld [vmem:[#allocation190_spill] sm:$0xff]  ;;  %v3229_v8 = vmul.f32 %v3101_v20, %v3027_v18 }
 0x375   :  { %v2963_v59 = vsel %vm2951_vm7, %v2898_v0, %v6459_v11  ;;  %v10492_v61 = vld [vmem:[#allocation19_spill] sm:$0xff]  ;;  %v10495_v12 = vld [vmem:[#allocation189_spill] sm:$0xff]  ;;  %v10496_v0 = vld [vmem:[#allocation208_spill] sm:$0xff]  ;;  %v7760_v44 = vpop.permute.xlu0 %2317 }
 0x376   :  { %v2640_v33 = vsel %vm189_vm0, %v10492_v61, %v10491_v63  ;;  %2333 = vrot.lane.b32.xlu0 %v10493_v34, %s4645_s22  ;;  %v2834_v11 = vsel %vm2821_vm5, %v2769_v47, %v10495_v12  ;;  %4467 = vmatprep.mubr.msk.f32.mxu1 %vm189_vm0, %v3230_v24  ;;  %v10497_v36 = vld [vmem:[#allocation195_spill] sm:$0xff]  ;;  %v7758_v61 = vpop.permute.xlu1 %1935  ;;  %v3106_v20 = vld [vmem:[%s9689_s2 + $0xc8] sm:$0xff] }
 0x377   :  { %v2705_v7 = vsel %vm2691_vm3, %v2640_v33, %v10494_v13  ;;  %v2899_v5 = vsel %vm2886_vm6, %v2834_v11, %v10496_v0  ;;  %v3028_v35 = vsel %vm3016_vm8, %v2963_v59, %v10497_v36  ;;  %v3103_v47 = vld [vmem:[%s9689_s2 + $0xb0] sm:$0xff]  ;;  %v10498_v33 = vld [vmem:[#allocation25_spill] sm:$0xff]  ;;  %3669 = vmatmul.mubr.f32.gmra.mxu1 %v3229_v8  ;;  %2143 = vrot.lane.b32.xlu1 %v6467_v52, %s4641_s13 }
 0x378   :  { %v2770_v63 = vsel %vm2756_vm4, %v2705_v7, %v6481_v14  ;;  %v3232_v24 = vmul.f32 %v3104_v28, %v10498_v33  ;;  %v2964_v18 = vsel %vm2951_vm7, %v2899_v5, %v6567_v37  ;;  %v10499_v59 = vld [vmem:[#allocation194_spill] sm:$0xff]  ;;  %v10500_v14 = vld [vmem:[#allocation21_spill] sm:$0xff]  ;;  %v10502_v12 = vld [vmem:[#allocation199_spill] sm:$0xff]  ;;  %v3231_v11 = vmul.f32 %v3103_v47, %v3028_v35 }
 0x379   :  { %v2641_v13 = vsel %vm189_vm0, %v10500_v14, %v10499_v59  ;;  %v10501_v7 = vld [vmem:[#allocation202_spill] sm:$0xff]  ;;  %v2835_v37 = vsel %vm2821_vm5, %v2770_v63, %v10502_v12  ;;  %v10503_v0 = vld [vmem:[#allocation215_spill] sm:$0xff]  ;;  %v7791_v59 = vpop.permute.xlu0 %2509  ;;  %v10505_v47 = vld [vmem:[#allocation204_spill] sm:$0xff] }
 0x37a   :  { %2525 = vrot.lane.b32.xlu0 %v10501_v7, %s4644_s26  ;;  %v2706_v28 = vsel %vm2691_vm3, %v2641_v13, %v6479_v45  ;;  %4468 = vmatprep.mubr.msk.f32.mxu1 %vm189_vm0, %v3232_v24  ;;  %v2900_v8 = vsel %vm2886_vm6, %v2835_v37, %v6503_v19  ;;  %v3029_v5 = vsel %vm3016_vm8, %v2964_v18, %v10503_v0  ;;  %v7789_v33 = vpop.permute.xlu1 %2127  ;;  %v3105_v45 = vld [vmem:[%s9689_s2 + $0xc0] sm:$0xff]  ;;  %v10504_v63 = vld [vmem:[#allocation27_spill] sm:$0xff] }
 0x37b   :  { %v2771_v36 = vsel %vm2756_vm4, %v2706_v28, %v6589_v62  ;;  %v3234_v24 = vmul.f32 %v3106_v20, %v10504_v63  ;;  %v2965_v35 = vsel %vm2951_vm7, %v2900_v8, %v6613_v31  ;;  %3674 = vmatmul.mubr.f32.gmra.mxu1 %v3231_v11  ;;  %v3108_v19 = vld [vmem:[%s9689_s2 + $0xd8] sm:$0xff]  ;;  %v3233_v13 = vmul.f32 %v3105_v45, %v3029_v5 }
 0x37c   :  { %v10506_v62 = vld [vmem:[#allocation23_spill] sm:$0xff]  ;;  %v10507_v14 = vld [vmem:[#allocation212_spill] sm:$0xff]  ;;  %v2836_v31 = vsel %vm2821_vm5, %v2771_v36, %v6523_v21  ;;  %v10510_v36 = vld [vmem:[#allocation222_spill] sm:$0xff] }
 0x37d   :  { %v2642_v18 = vsel %vm189_vm0, %v10506_v62, %v10505_v47  ;;  %2335 = vrot.lane.b32.xlu1 %v10507_v14, %s4645_s22  ;;  %4469 = vmatprep.mubr.msk.f32.mxu1 %vm189_vm0, %v3234_v24  ;;  %v2901_v28 = vsel %vm2886_vm6, %v2836_v31, %v6611_v30  ;;  %v10508_v12 = vld [vmem:[#allocation223_spill] sm:$0xff]  ;;  %v3110_v30 = vld [vmem:[%s9689_s2 + $0xe8] sm:$0xff] }
 0x37e   :  { %1249 = vrot.lane.b32.xlu0 %v10432_v40, %s4640_s28  ;;  %v2707_v20 = vsel %vm2691_vm3, %v2642_v18, %v6525_v53  ;;  %v3030_v37 = vsel %vm3016_vm8, %v2965_v35, %v10508_v12  ;;  %v7820_v8 = vpop.permute.xlu1 %2319  ;;  %v7822_v40 = vpop.permute.xlu0 %1233  ;;  %v3107_v53 = vld [vmem:[%s9689_s2 + $0xd0] sm:$0xff]  ;;  %v2966_v5 = vsel %vm2951_vm7, %v2901_v28, %v6721_v10  ;;  %v10515_v18 = vld [vmem:[#allocation241_spill] sm:$0xff] }
 0x37f   :  { %v2772_v11 = vsel %vm2756_vm4, %v2707_v20, %v6635_v16  ;;  %v10509_v21 = vld [vmem:[#allocation31_spill] sm:$0xff]  ;;  %3679 = vmatmul.mubr.f32.gmra.mxu1 %v3233_v13  ;;  %v10511_v16 = vld [vmem:[#allocation26_spill] sm:$0xff]  ;;  %v3235_v47 = vmul.f32 %v3107_v53, %v3030_v37  ;;  %v3031_v20 = vsel %vm3016_vm8, %v2966_v5, %v10515_v18  ;;  %v3109_v12 = vld [vmem:[%s9689_s2 + $0xe0] sm:$0xff] }
 0x380   :  { %v3236_v0 = vmul.f32 %v3108_v19, %v10509_v21  ;;  %v2643_v45 = vsel %vm189_vm0, %v10511_v16, %v10510_v36  ;;  %v10512_v63 = vld [vmem:[#allocation207_spill] sm:$0xff]  ;;  %v10513_v24 = vld [vmem:[#allocation238_spill] sm:$0xff]  ;;  %v10520_v36 = vld [vmem:[#allocation245_spill] sm:$0xff]  ;;  %v3237_v16 = vmul.f32 %v3109_v12, %v3031_v20 }
 0x381   :  { %2527 = vrot.lane.b32.xlu1 %v10512_v63, %s4644_s26  ;;  %v2708_v35 = vsel %vm2691_vm3, %v2643_v45, %v10513_v24  ;;  %v10514_v19 = vld [vmem:[#allocation227_spill] sm:$0xff]  ;;  %v10519_v5 = vld [vmem:[#allocation246_spill] sm:$0xff]  ;;  %v10524_v12 = vld [vmem:[#allocation253_spill] sm:$0xff] }
 0x382   :  { %1505 = vrot.lane.b32.xlu0 %v10483_v9, %s4642_s17  ;;  %v2837_v10 = vsel %vm2821_vm5, %v2772_v11, %v10514_v19  ;;  %4470 = vmatprep.mubr.msk.f32.mxu1 %vm189_vm0, %v3236_v0  ;;  %v2773_v31 = vsel %vm2756_vm4, %v2708_v35, %v6741_v1  ;;  %v7851_v13 = vpop.permute.xlu1 %2511  ;;  %v7853_v28 = vpop.permute.xlu0 %1489  ;;  %v10516_v11 = vld [vmem:[#allocation35_spill] sm:$0xff]  ;;  %v10518_v1 = vld [vmem:[#allocation28_spill] sm:$0xff] }
 0x383   :  { %v2902_v62 = vsel %vm2886_vm6, %v2837_v10, %v6657_v27  ;;  %v3238_v21 = vmul.f32 %v3110_v30, %v10516_v11  ;;  %3684 = vmatmul.mubr.f32.gmra.mxu1 %v3235_v47  ;;  %v3112_v27 = vld [vmem:[%s9689_s2 + $0xf8] sm:$0xff]  ;;  %v3111_v10 = vld [vmem:[%s9689_s2 + $0xf0] sm:$0xff] }
 0x384   :  { %v2967_v37 = vsel %vm2951_vm7, %v2902_v62, %v6762_v23  ;;  %v10517_v53 = vld [vmem:[#allocation231_spill] sm:$0xff]  ;;  %v2838_v23 = vsel %vm2821_vm5, %v2773_v31, %v10520_v36 }
 0x385   :  { %v2644_v0 = vsel %vm189_vm0, %v10518_v1, %v10517_v53  ;;  %1251 = vrot.lane.b32.xlu1 %v6407_v32, %s4640_s28  ;;  %4471 = vmatprep.mubr.msk.f32.mxu1 %vm189_vm0, %v3238_v21  ;;  %v2903_v45 = vsel %vm2886_vm6, %v2838_v23, %v6760_v39  ;;  %v3032_v24 = vsel %vm3016_vm8, %v2967_v37, %v6701_v4  ;;  %v10521_v47 = vld [vmem:[#allocation39_spill] sm:$0xff]  ;;  %v3114_v4 = vld [vmem:[%s9689_s2 + $0x108] sm:$0xff] }
 0x386   :  { %1761 = vrot.lane.b32.xlu0 %v10493_v34, %s4643_s18  ;;  %v2709_v30 = vsel %vm2691_vm3, %v2644_v0, %v10519_v5  ;;  %v7882_v35 = vpop.permute.xlu1 %1235  ;;  %v7884_v19 = vpop.permute.xlu0 %1745  ;;  %v3240_v62 = vmul.f32 %v3112_v27, %v10521_v47  ;;  %v2968_v18 = vsel %vm2951_vm7, %v2903_v45, %v6806_v55  ;;  %v10523_v20 = vld [vmem:[#allocation99_spill] sm:$0xff]  ;;  %v3239_v11 = vmul.f32 %v3111_v10, %v3032_v24  ;;  %v10525_v21 = vld [vmem:[#allocation262_spill] sm:$0xff]  ;;  %v10526_v27 = vld [vmem:[#allocation261_spill] sm:$0xff] }
 0x387   :  { %v2774_v32 = vsel %vm2756_vm4, %v2709_v30, %v6776_v17  ;;  %3689 = vmatmul.mubr.f32.gmra.mxu1 %v3237_v16  ;;  %v10522_v17 = vld [vmem:[#allocation32_spill] sm:$0xff]  ;;  %v10527_v53 = vld [vmem:[#allocation267_spill] sm:$0xff]  ;;  %v10529_v16 = vld [vmem:[#allocation270_spill] sm:$0xff] }
 0x388   :  { %v2645_v39 = vsel %vm189_vm0, %v10522_v17, %v6699_v29  ;;  %v2839_v55 = vsel %vm2821_vm5, %v2774_v32, %v10524_v12  ;;  %4472 = vmatprep.mubr.msk.f32.mxu1 %vm189_vm0, %v3240_v62  ;;  %v3033_v29 = vsel %vm3016_vm8, %v2968_v18, %v10526_v27  ;;  %v3113_v30 = vld [vmem:[%s9689_s2 + $0x100] sm:$0xff]  ;;  %v10528_v36 = vld [vmem:[#allocation43_spill] sm:$0xff]  ;;  %v10534_v17 = vld [vmem:[#allocation106_spill] sm:$0xff] }
 0x389   :  { %1507 = vrot.lane.b32.xlu1 %v6467_v52, %s4642_s17  ;;  %v2710_v31 = vsel %vm2691_vm3, %v2645_v39, %v10523_v20  ;;  %v2904_v37 = vsel %vm2886_vm6, %v2839_v55, %v10525_v21  ;;  %v3242_v23 = vmul.f32 %v3114_v4, %v10528_v36  ;;  %v3116_v24 = vld [vmem:[%s9689_s2 + $0x118] sm:$0xff]  ;;  %v10530_v32 = vld [vmem:[#allocation257_spill] sm:$0xff]  ;;  %v3241_v20 = vmul.f32 %v3113_v30, %v3033_v29 }
 0x38a   :  { %1953 = vrot.lane.b32.xlu0 %v10501_v7, %s4639_s23  ;;  %v2775_v1 = vsel %vm2756_vm4, %v2710_v31, %v10527_v53  ;;  %v7913_v0 = vpop.permute.xlu1 %1491  ;;  %v7915_v5 = vpop.permute.xlu0 %1937  ;;  %v2969_v45 = vsel %vm2951_vm7, %v2904_v37, %v10529_v16  ;;  %v10531_v10 = vld [vmem:[#allocation36_spill] sm:$0xff]  ;;  %v10532_v62 = vld [vmem:[#allocation213_spill] sm:$0xff]  ;;  %v10533_v18 = vld [vmem:[#allocation263_spill] sm:$0xff] }
 0x38b   :  { %3694 = vmatmul.mubr.f32.gmra.mxu1 %v3239_v11  ;;  %v2646_v47 = vsel %vm189_vm0, %v10531_v10, %v10530_v32  ;;  %v2840_v39 = vsel %vm2821_vm5, %v2775_v1, %v10534_v17  ;;  %v10535_v31 = vld [vmem:[#allocation269_spill] sm:$0xff]  ;;  %v3115_v53 = vld [vmem:[%s9689_s2 + $0x110] sm:$0xff]  ;;  %v10538_v29 = vld [vmem:[#allocation276_spill] sm:$0xff] }
 0x38c   :  { %v2711_v4 = vsel %vm2691_vm3, %v2646_v47, %v10533_v18  ;;  %4473 = vmatprep.mubr.msk.f32.mxu1 %vm189_vm0, %v3242_v23  ;;  %v2905_v12 = vsel %vm2886_vm6, %v2840_v39, %v10535_v31  ;;  %v10536_v55 = vld [vmem:[#allocation265_spill] sm:$0xff]  ;;  %v10537_v1 = vld [vmem:[#allocation50_spill] sm:$0xff]  ;;  %v10539_v16 = vld [vmem:[#allocation264_spill] sm:$0xff] }
 0x38d   :  { %1763 = vrot.lane.b32.xlu1 %v10507_v14, %s4643_s18  ;;  %v3034_v11 = vsel %vm3016_vm8, %v2969_v45, %v10536_v55  ;;  %v2776_v21 = vsel %vm2756_vm4, %v2711_v4, %v6832_v48  ;;  %v3244_v36 = vmul.f32 %v3116_v24, %v10537_v1  ;;  %v2970_v30 = vsel %vm2951_vm7, %v2905_v12, %v10538_v29  ;;  %v3118_v23 = vld [vmem:[%s9689_s2 + $0x128] sm:$0xff]  ;;  %v10540_v48 = vld [vmem:[#allocation40_spill] sm:$0xff] }
 0x38e   :  { %2145 = vrot.lane.b32.xlu0 %v10532_v62, %s4641_s13  ;;  %v7944_v37 = vpop.permute.xlu1 %1747  ;;  %v7946_v27 = vpop.permute.xlu0 %2129  ;;  %v2647_v45 = vsel %vm189_vm0, %v10540_v48, %v10539_v16  ;;  %v10541_v32 = vld [vmem:[#allocation216_spill] sm:$0xff]  ;;  %v10542_v10 = vld [vmem:[#allocation109_spill] sm:$0xff]  ;;  %v10543_v47 = vld [vmem:[#allocation266_spill] sm:$0xff]  ;;  %v3243_v4 = vmul.f32 %v3115_v53, %v3034_v11 }
 0x38f   :  { %3699 = vmatmul.mubr.f32.gmra.mxu1 %v3241_v20  ;;  %v2712_v24 = vsel %vm2691_vm3, %v2647_v45, %v10542_v10  ;;  %v2841_v18 = vsel %vm2821_vm5, %v2776_v21, %v10543_v47  ;;  %v10544_v17 = vld [vmem:[#allocation272_spill] sm:$0xff]  ;;  %v10545_v20 = vld [vmem:[#allocation271_spill] sm:$0xff]  ;;  %v10546_v12 = vld [vmem:[#allocation278_spill] sm:$0xff] }
 0x390   :  { %4474 = vmatprep.mubr.msk.f32.mxu1 %vm189_vm0, %v3244_v36  ;;  %v2906_v39 = vsel %vm2886_vm6, %v2841_v18, %v10544_v17  ;;  %v3035_v31 = vsel %vm3016_vm8, %v2970_v30, %v10545_v20  ;;  %v2777_v55 = vsel %vm2756_vm4, %v2712_v24, %v10546_v12  ;;  %v3117_v21 = vld [vmem:[%s9689_s2 + $0x120] sm:$0xff]  ;;  %v3120_v30 = vld [vmem:[%s9689_s2 + $0x138] sm:$0xff]  ;;  %v10554_v17 = vld [vmem:[#allocation114_spill] sm:$0xff] }
 0x391   :  { %1955 = vrot.lane.b32.xlu1 %v10512_v63, %s4639_s23  ;;  %v10547_v16 = vld [vmem:[#allocation60_spill] sm:$0xff]  ;;  %v10548_v11 = vld [vmem:[#allocation281_spill] sm:$0xff]  ;;  %v10552_v47 = vld [vmem:[#allocation211_spill] sm:$0xff] }
 0x392   :  { %2337 = vrot.lane.b32.xlu0 %v10541_v32, %s4645_s22  ;;  %v7975_v1 = vpop.permute.xlu1 %1939  ;;  %v7977_v29 = vpop.permute.xlu0 %2321  ;;  %v3246_v36 = vmul.f32 %v3118_v23, %v10547_v16  ;;  %v2971_v53 = vsel %vm2951_vm7, %v2906_v39, %v10548_v11  ;;  %v10549_v48 = vld [vmem:[#allocation268_spill] sm:$0xff]  ;;  %v10551_v24 = vld [vmem:[#allocation217_spill] sm:$0xff]  ;;  %v3245_v39 = vmul.f32 %v3117_v21, %v3035_v31  ;;  %v10556_v16 = vld [vmem:[#allocation275_spill] sm:$0xff] }
 0x393   :  { %3704 = vmatmul.mubr.f32.gmra.mxu1 %v3243_v4  ;;  %v10550_v45 = vld [vmem:[#allocation44_spill] sm:$0xff]  ;;  %v10553_v18 = vld [vmem:[#allocation273_spill] sm:$0xff]  ;;  %v2842_v4 = vsel %vm2821_vm5, %v2777_v55, %v10554_v17  ;;  %v3036_v11 = vsel %vm3016_vm8, %v2971_v53, %v10556_v16  ;;  %v3119_v55 = vld [vmem:[%s9689_s2 + $0x130] sm:$0xff] }
 0x394   :  { %v2648_v10 = vsel %vm189_vm0, %v10550_v45, %v10549_v48  ;;  %4475 = vmatprep.mubr.msk.f32.mxu1 %vm189_vm0, %v3246_v36  ;;  %v10555_v20 = vld [vmem:[#allocation280_spill] sm:$0xff]  ;;  %v3122_v21 = vld [vmem:[%s9689_s2 + $0x148] sm:$0xff]  ;;  %v10561_v17 = vld [vmem:[#allocation119_spill] sm:$0xff] }
 0x395   :  { %2147 = vrot.lane.b32.xlu1 %v10551_v24, %s4641_s13  ;;  %v2713_v23 = vsel %vm2691_vm3, %v2648_v10, %v10553_v18  ;;  %v2907_v12 = vsel %vm2886_vm6, %v2842_v4, %v10555_v20  ;;  %v10557_v10 = vld [vmem:[#allocation68_spill] sm:$0xff]  ;;  %v10558_v53 = vld [vmem:[#allocation274_spill] sm:$0xff]  ;;  %v10562_v4 = vld [vmem:[#allocation277_spill] sm:$0xff] }
 0x396   :  { %2529 = vrot.lane.b32.xlu0 %v10552_v47, %s4644_s26  ;;  %v2778_v48 = vsel %vm2756_vm4, %v2713_v23, %v6888_v41  ;;  %v8006_v45 = vpop.permute.xlu1 %2131  ;;  %v8008_v14 = vpop.permute.xlu0 %2513  ;;  %v3248_v36 = vmul.f32 %v3120_v30, %v10557_v10  ;;  %v2972_v31 = vsel %vm2951_vm7, %v2907_v12, %v6918_v46  ;;  %v10559_v41 = vld [vmem:[#allocation51_spill] sm:$0xff]  ;;  %v10564_v16 = vld [vmem:[#allocation282_spill] sm:$0xff] }
 0x397   :  { %3709 = vmatmul.mubr.f32.gmra.mxu1 %v3245_v39  ;;  %v2649_v18 = vsel %vm189_vm0, %v10559_v41, %v10558_v53  ;;  %v10560_v23 = vld [vmem:[#allocation219_spill] sm:$0xff]  ;;  %v2843_v46 = vsel %vm2821_vm5, %v2778_v48, %v10562_v4  ;;  %v3247_v39 = vmul.f32 %v3119_v55, %v3036_v11  ;;  %v3037_v10 = vsel %vm3016_vm8, %v2972_v31, %v10564_v16  ;;  %v10565_v53 = vld [vmem:[#allocation288_spill] sm:$0xff]  ;;  %v10567_v11 = vld [vmem:[#allocation289_spill] sm:$0xff] }
 0x398   :  { %v2714_v30 = vsel %vm2691_vm3, %v2649_v18, %v10561_v17  ;;  %4476 = vmatprep.mubr.msk.f32.mxu1 %vm189_vm0, %v3248_v36  ;;  %v10563_v20 = vld [vmem:[#allocation283_spill] sm:$0xff]  ;;  %v3121_v48 = vld [vmem:[%s9689_s2 + $0x140] sm:$0xff] }
 0x399   :  { %2339 = vrot.lane.b32.xlu1 %v10560_v23, %s4645_s22  ;;  %v2908_v12 = vsel %vm2886_vm6, %v2843_v46, %v10563_v20  ;;  %v2779_v41 = vsel %vm2756_vm4, %v2714_v30, %v10565_v53  ;;  %v10566_v18 = vld [vmem:[#allocation79_spill] sm:$0xff]  ;;  %v10569_v30 = vld [vmem:[#allocation61_spill] sm:$0xff]  ;;  %v10570_v46 = vld [vmem:[#allocation214_spill] sm:$0xff] }
 0x39a   :  { %1253 = vrot.lane.b32.xlu0 %v10501_v7, %s4640_s28  ;;  %v8037_v34 = vpop.permute.xlu1 %2323  ;;  %v8039_v7 = vpop.permute.xlu0 %1237  ;;  %v3250_v36 = vmul.f32 %v3122_v21, %v10566_v18  ;;  %v2973_v55 = vsel %vm2951_vm7, %v2908_v12, %v10567_v11  ;;  %v3124_v31 = vld [vmem:[%s9689_s2 + $0x158] sm:$0xff]  ;;  %v3249_v12 = vmul.f32 %v3121_v48, %v3037_v10  ;;  %v10573_v53 = vld [vmem:[#allocation286_spill] sm:$0xff] }
 0x39b   :  { %3714 = vmatmul.mubr.f32.gmra.mxu1 %v3247_v39  ;;  %v10568_v17 = vld [vmem:[#allocation279_spill] sm:$0xff]  ;;  %v10571_v20 = vld [vmem:[#allocation284_spill] sm:$0xff]  ;;  %v3038_v18 = vsel %vm3016_vm8, %v2973_v55, %v10573_v53  ;;  %v10574_v11 = vld [vmem:[#allocation290_spill] sm:$0xff] }
 0x39c   :  { %v2650_v4 = vsel %vm189_vm0, %v10569_v30, %v10568_v17  ;;  %v10572_v16 = vld [vmem:[#allocation124_spill] sm:$0xff]  ;;  %4477 = vmatprep.mubr.msk.f32.mxu1 %vm189_vm0, %v3250_v36  ;;  %v10575_v30 = vld [vmem:[#allocation291_spill] sm:$0xff]  ;;  %v10577_v10 = vld [vmem:[#allocation134_spill] sm:$0xff] }
 0x39d   :  { %2531 = vrot.lane.b32.xlu1 %v10570_v46, %s4644_s26  ;;  %v2715_v21 = vsel %vm2691_vm3, %v2650_v4, %v10571_v20  ;;  %v2844_v39 = vsel %vm2821_vm5, %v2779_v41, %v10572_v16  ;;  %v3123_v41 = vld [vmem:[%s9689_s2 + $0x150] sm:$0xff]  ;;  %v3126_v55 = vld [vmem:[%s9689_s2 + $0x168] sm:$0xff]  ;;  %v10579_v16 = vld [vmem:[#allocation292_spill] sm:$0xff] }
 0x39e   :  { %1509 = vrot.lane.b32.xlu0 %v10532_v62, %s4642_s17  ;;  %v2909_v17 = vsel %vm2886_vm6, %v2844_v39, %v10574_v11  ;;  %v2780_v52 = vsel %vm2756_vm4, %v2715_v21, %v10575_v30  ;;  %v8068_v9 = vpop.permute.xlu1 %2515  ;;  %v8070_v62 = vpop.permute.xlu0 %1493  ;;  %v10576_v4 = vld [vmem:[#allocation87_spill] sm:$0xff]  ;;  %v10582_v30 = vld [vmem:[#allocation96_spill] sm:$0xff] }
 0x39f   :  { %v3252_v36 = vmul.f32 %v3124_v31, %v10576_v4  ;;  %v2974_v48 = vsel %vm2951_vm7, %v2909_v17, %v10577_v10  ;;  %3719 = vmatmul.mubr.f32.gmra.mxu1 %v3249_v12  ;;  %v10578_v20 = vld [vmem:[#allocation287_spill] sm:$0xff]  ;;  %v3251_v31 = vmul.f32 %v3123_v41, %v3038_v18  ;;  %v10580_v12 = vld [vmem:[#allocation293_spill] sm:$0xff]  ;;  %v3254_v4 = vmul.f32 %v3126_v55, %v10582_v30 }
 0x3a0   :  { %v2845_v21 = vsel %vm2821_vm5, %v2780_v52, %v10578_v20  ;;  %v3039_v53 = vsel %vm3016_vm8, %v2974_v48, %v10580_v12  ;;  %v10583_v52 = vld [vmem:[#allocation297_spill] sm:$0xff]  ;;  %v3128_v18 = vld [vmem:[%s9689_s2 + $0x178] sm:$0xff] }
 0x3a1   :  { %1255 = vrot.lane.b32.xlu1 %v10512_v63, %s4640_s28  ;;  %4478 = vmatprep.mubr.msk.f32.mxu1 %vm189_vm0, %v3252_v36  ;;  %v2910_v39 = vsel %vm2886_vm6, %v2845_v21, %v10579_v16  ;;  %v3125_v63 = vld [vmem:[%s9689_s2 + $0x160] sm:$0xff] }
 0x3a2   :  { %1765 = vrot.lane.b32.xlu0 %v10541_v32, %s4643_s18  ;;  %v8092_v11 = vpop.permute.xlu1 %1239  ;;  %v8094_v17 = vpop.permute.xlu0 %1749  ;;  %v2975_v36 = vsel %vm2951_vm7, %v2910_v39, %v10583_v52  ;;  %v10584_v41 = vld [vmem:[#allocation285_spill] sm:$0xff]  ;;  %v3253_v21 = vmul.f32 %v3125_v63, %v3039_v53  ;;  %v10588_v39 = vld [vmem:[#allocation295_spill] sm:$0xff]  ;;  %v10592_v63 = vld [vmem:[#allocation294_spill] sm:$0xff] }
 0x3a3   :  { %10581 = vst [vmem:[#allocation17_spill] sm:$0xff] %v8092_v11  ;;  %3724 = vmatmul.mubr.f32.gmra.mxu1 %v3251_v31  ;;  %v10585_v10 = vld [vmem:[#allocation69_spill] sm:$0xff]  ;;  %v10587_v31 = vld [vmem:[#allocation296_spill] sm:$0xff]  ;;  %v3040_v12 = vsel %vm3016_vm8, %v2975_v36, %v10588_v39  ;;  %v10593_v36 = vld [vmem:[#allocation78_spill] sm:$0xff] }
 0x3a4   :  { %v2651_v48 = vsel %vm189_vm0, %v10585_v10, %v10584_v41  ;;  %v10586_v20 = vld [vmem:[#allocation129_spill] sm:$0xff]  ;;  %4479 = vmatprep.mubr.msk.f32.mxu1 %vm189_vm0, %v3254_v4  ;;  %v3127_v41 = vld [vmem:[%s9689_s2 + $0x170] sm:$0xff] }
 0x3a5   :  { %1511 = vrot.lane.b32.xlu1 %v10551_v24, %s4642_s17  ;;  %v2716_v55 = vsel %vm2691_vm3, %v2651_v48, %v10586_v20  ;;  %v10590_v10 = vld [vmem:[#allocation105_spill] sm:$0xff]  ;;  %v10591_v48 = vld [vmem:[#allocation298_spill] sm:$0xff]  ;;  %v2652_v20 = vsel %vm189_vm0, %v10593_v36, %v10592_v63  ;;  %v10596_v39 = vld [vmem:[#allocation299_spill] sm:$0xff] }
 0x3a6   :  { %1957 = vrot.lane.b32.xlu0 %v10552_v47, %s4639_s23  ;;  %v2781_v16 = vsel %vm2756_vm4, %v2716_v55, %v10587_v31  ;;  %v8119_v30 = vpop.permute.xlu1 %1495  ;;  %v8121_v52 = vpop.permute.xlu0 %1941  ;;  %v3256_v32 = vmul.f32 %v3128_v18, %v10590_v10  ;;  %v3130_v53 = vld [vmem:[%s9689_s2 + $0x188] sm:$0xff]  ;;  %v10594_v55 = vld [vmem:[#allocation300_spill] sm:$0xff]  ;;  %v10599_v36 = vld [vmem:[#allocation139_spill] sm:$0xff] }
 0x3a7   :  { %10589 = vst [vmem:[#allocation67_spill] sm:$0xff] %v8119_v30  ;;  %v2846_v4 = vsel %vm2821_vm5, %v2781_v16, %v10591_v48  ;;  %3729 = vmatmul.mubr.f32.gmra.mxu1 %v3253_v21  ;;  %v10595_v18 = vld [vmem:[#allocation220_spill] sm:$0xff]  ;;  %v2717_v21 = vsel %vm2691_vm3, %v2652_v20, %v10596_v39  ;;  %v10597_v16 = vld [vmem:[#allocation302_spill] sm:$0xff]  ;;  %v3255_v48 = vmul.f32 %v3127_v41, %v3040_v12  ;;  %v10598_v24 = vld [vmem:[#allocation301_spill] sm:$0xff] }
 0x3a8   :  { %v2911_v31 = vsel %vm2886_vm6, %v2846_v4, %v10594_v55  ;;  %4480 = vmatprep.mubr.msk.f32.mxu1 %vm189_vm0, %v3256_v32  ;;  %v2782_v63 = vsel %vm2756_vm4, %v2717_v21, %v10598_v24  ;;  %v3129_v4 = vld [vmem:[%s9689_s2 + $0x180] sm:$0xff]  ;;  %v3132_v24 = vld [vmem:[%s9689_s2 + $0x198] sm:$0xff] }
 0x3a9   :  { %1767 = vrot.lane.b32.xlu1 %v10560_v23, %s4643_s18  ;;  %v2976_v10 = vsel %vm2951_vm7, %v2911_v31, %v10597_v16  ;;  %v10602_v20 = vld [vmem:[#allocation113_spill] sm:$0xff]  ;;  %v10603_v31 = vld [vmem:[#allocation303_spill] sm:$0xff]  ;;  %v10604_v12 = vld [vmem:[#allocation304_spill] sm:$0xff] }
 0x3aa   :  { %2149 = vrot.lane.b32.xlu0 %v10595_v18, %s4641_s13  ;;  %v3041_v55 = vsel %vm3016_vm8, %v2976_v10, %v10599_v36  ;;  %v8153_v23 = vpop.permute.xlu1 %1751  ;;  %v8155_v30 = vpop.permute.xlu0 %2133  ;;  %v3258_v39 = vmul.f32 %v3130_v53, %v10602_v20  ;;  %v2847_v32 = vsel %vm2821_vm5, %v2782_v63, %v10603_v31  ;;  %v10605_v21 = vld [vmem:[#allocation305_spill] sm:$0xff]  ;;  %v10606_v16 = vld [vmem:[#allocation88_spill] sm:$0xff]  ;;  %v10608_v63 = vld [vmem:[#allocation306_spill] sm:$0xff] }
 0x3ab   :  { %10600 = vst [vmem:[#allocation80_spill] sm:$0xff] %v8153_v23  ;;  %10601 = vst [vmem:[#allocation58_spill] sm:$0xff] %v8155_v30  ;;  %3734 = vmatmul.mubr.f32.gmra.mxu1 %v3255_v48  ;;  %v2912_v41 = vsel %vm2886_vm6, %v2847_v32, %v10604_v12  ;;  %v2653_v10 = vsel %vm189_vm0, %v10606_v16, %v10605_v21  ;;  %v10607_v53 = vld [vmem:[#allocation224_spill] sm:$0xff]  ;;  %v3257_v36 = vmul.f32 %v3129_v4, %v3041_v55  ;;  %v3131_v32 = vld [vmem:[%s9689_s2 + $0x190] sm:$0xff] }
 0x3ac   :  { %v2977_v48 = vsel %vm2951_vm7, %v2912_v41, %v10608_v63  ;;  %v10609_v20 = vld [vmem:[#allocation144_spill] sm:$0xff]  ;;  %4481 = vmatprep.mubr.msk.f32.mxu1 %vm189_vm0, %v3258_v39  ;;  %v10610_v12 = vld [vmem:[#allocation307_spill] sm:$0xff]  ;;  %v10614_v55 = vld [vmem:[#allocation118_spill] sm:$0xff] }
 0x3ad   :  { %1959 = vrot.lane.b32.xlu1 %v10570_v46, %s4639_s23  ;;  %v2718_v31 = vsel %vm2691_vm3, %v2653_v10, %v10609_v20  ;;  %v3042_v21 = vsel %vm3016_vm8, %v2977_v48, %v10610_v12  ;;  %v10611_v16 = vld [vmem:[#allocation308_spill] sm:$0xff]  ;;  %v3260_v41 = vmul.f32 %v3132_v24, %v10614_v55  ;;  %v10615_v63 = vld [vmem:[#allocation311_spill] sm:$0xff]  ;;  %v3134_v39 = vld [vmem:[%s9689_s2 + $0x1a8] sm:$0xff] }
 0x3ae   :  { %2341 = vrot.lane.b32.xlu0 %v10607_v53, %s4645_s22  ;;  %v2783_v23 = vsel %vm2756_vm4, %v2718_v31, %v10611_v16  ;;  %v8184_v30 = vpop.permute.xlu1 %1943  ;;  %v8186_v4 = vpop.permute.xlu0 %2325  ;;  %v10616_v20 = vld [vmem:[#allocation309_spill] sm:$0xff]  ;;  %v10617_v11 = vld [vmem:[#allocation95_spill] sm:$0xff]  ;;  %v10618_v12 = vld [vmem:[#allocation314_spill] sm:$0xff]  ;;  %v3259_v55 = vmul.f32 %v3131_v32, %v3042_v21 }
 0x3af   :  { %10612 = vst [vmem:[#allocation11_spill] sm:$0xff] %v8184_v30  ;;  %10613 = vst [vmem:[#allocation59_spill] sm:$0xff] %v8186_v4  ;;  %v2848_v10 = vsel %vm2821_vm5, %v2783_v23, %v10615_v63  ;;  %3739 = vmatmul.mubr.f32.gmra.mxu1 %v3257_v36  ;;  %v2654_v48 = vsel %vm189_vm0, %v10617_v11, %v10616_v20  ;;  %v10619_v16 = vld [vmem:[#allocation225_spill] sm:$0xff]  ;;  %v10620_v24 = vld [vmem:[#allocation218_spill] sm:$0xff] }
 0x3b0   :  { %v2913_v31 = vsel %vm2886_vm6, %v2848_v10, %v10618_v12  ;;  %v10621_v23 = vld [vmem:[#allocation312_spill] sm:$0xff]  ;;  %4482 = vmatprep.mubr.msk.f32.mxu1 %vm189_vm0, %v3260_v41  ;;  %v10623_v4 = vld [vmem:[#allocation315_spill] sm:$0xff] }
 0x3b1   :  { %2151 = vrot.lane.b32.xlu1 %v10619_v16, %s4641_s13  ;;  %v2719_v36 = vsel %vm2691_vm3, %v2654_v48, %v10621_v23  ;;  %v10622_v63 = vld [vmem:[#allocation316_spill] sm:$0xff]  ;;  %v10624_v21 = vld [vmem:[#allocation123_spill] sm:$0xff]  ;;  %v10625_v23 = vld [vmem:[#allocation317_spill] sm:$0xff] }
 0x3b2   :  { %2533 = vrot.lane.b32.xlu0 %v10620_v24, %s4644_s26  ;;  %v2978_v30 = vsel %vm2951_vm7, %v2913_v31, %v10622_v63  ;;  %v2784_v11 = vsel %vm2756_vm4, %v2719_v36, %v10623_v4  ;;  %v3133_v10 = vld [vmem:[%s9689_s2 + $0x1a0] sm:$0xff]  ;;  %v8215_v12 = vpop.permute.xlu1 %2135  ;;  %v8217_v32 = vpop.permute.xlu0 %2517  ;;  %v3262_v48 = vmul.f32 %v3134_v39, %v10624_v21  ;;  %v3136_v4 = vld [vmem:[%s9689_s2 + $0x1b8] sm:$0xff] }
 0x3b3   :  { %v3043_v20 = vsel %vm3016_vm8, %v2978_v30, %v7145_v6  ;;  %v2849_v31 = vsel %vm2821_vm5, %v2784_v11, %v10625_v23  ;;  %3744 = vmatmul.mubr.f32.gmra.mxu1 %v3259_v55  ;;  %v10626_v36 = vld [vmem:[#allocation104_spill] sm:$0xff]  ;;  %v10628_v11 = vld [vmem:[#allocation149_spill] sm:$0xff]  ;;  %v10630_v23 = vld [vmem:[#allocation322_spill] sm:$0xff] }
 0x3b4   :  { %v2914_v41 = vsel %vm2886_vm6, %v2849_v31, %v7147_v15  ;;  %v2655_v6 = vsel %vm189_vm0, %v10626_v36, %v7164_v38  ;;  %v10627_v30 = vld [vmem:[#allocation228_spill] sm:$0xff]  ;;  %v3261_v39 = vmul.f32 %v3133_v10, %v3043_v20  ;;  %4483 = vmatprep.mubr.msk.f32.mxu1 %vm189_vm0, %v3262_v48  ;;  %v3135_v15 = vld [vmem:[%s9689_s2 + $0x1b0] sm:$0xff]  ;;  %v3138_v48 = vld [vmem:[%s9689_s2 + $0x1c8] sm:$0xff] }
 0x3b5   :  { %2343 = vrot.lane.b32.xlu1 %v10627_v30, %s4645_s22  ;;  %v2979_v55 = vsel %vm2951_vm7, %v2914_v41, %v7166_v58  ;;  %v2720_v63 = vsel %vm2691_vm3, %v2655_v6, %v7172_v2  ;;  %v10629_v58 = vld [vmem:[#allocation128_spill] sm:$0xff]  ;;  %v10631_v31 = vld [vmem:[#allocation321_spill] sm:$0xff] }
 0x3b6   :  { %1257 = vrot.lane.b32.xlu0 %v10552_v47, %s4640_s28  ;;  %v3044_v38 = vsel %vm3016_vm8, %v2979_v55, %v7174_v3  ;;  %v2785_v21 = vsel %vm2756_vm4, %v2720_v63, %v10628_v11  ;;  %v8246_v47 = vpop.permute.xlu1 %2327  ;;  %v8248_v10 = vpop.permute.xlu0 %1241  ;;  %v3264_v20 = vmul.f32 %v3136_v4, %v10629_v58  ;;  %v10632_v41 = vld [vmem:[#allocation112_spill] sm:$0xff]  ;;  %v10634_v55 = vld [vmem:[#allocation221_spill] sm:$0xff]  ;;  %v10635_v63 = vld [vmem:[#allocation323_spill] sm:$0xff] }
 0x3b7   :  { %v2850_v2 = vsel %vm2821_vm5, %v2785_v21, %v10630_v23  ;;  %3749 = vmatmul.mubr.f32.gmra.mxu1 %v3261_v39  ;;  %v2656_v3 = vsel %vm189_vm0, %v10632_v41, %v10631_v31  ;;  %v10633_v36 = vld [vmem:[#allocation324_spill] sm:$0xff]  ;;  %v3263_v4 = vmul.f32 %v3135_v15, %v3044_v38  ;;  %v10636_v11 = vld [vmem:[#allocation154_spill] sm:$0xff]  ;;  %v10637_v58 = vld [vmem:[#allocation325_spill] sm:$0xff] }
 0x3b8   :  { %v2915_v6 = vsel %vm2886_vm6, %v2850_v2, %v10633_v36  ;;  %v2721_v39 = vsel %vm2691_vm3, %v2656_v3, %v10635_v63  ;;  %4484 = vmatprep.mubr.msk.f32.mxu1 %vm189_vm0, %v3264_v20  ;;  %v3137_v2 = vld [vmem:[%s9689_s2 + $0x1c0] sm:$0xff]  ;;  %v10639_v36 = vld [vmem:[#allocation326_spill] sm:$0xff]  ;;  %v3140_v20 = vld [vmem:[%s9689_s2 + $0x1d8] sm:$0xff] }
 0x3b9   :  { %2535 = vrot.lane.b32.xlu1 %v10634_v55, %s4644_s26  ;;  %v2980_v21 = vsel %vm2951_vm7, %v2915_v6, %v10636_v11  ;;  %v2786_v23 = vsel %vm2756_vm4, %v2721_v39, %v10637_v58  ;;  %v10638_v38 = vld [vmem:[#allocation133_spill] sm:$0xff]  ;;  %v10640_v39 = vld [vmem:[#allocation159_spill] sm:$0xff] }
 0x3ba   :  { %1513 = vrot.lane.b32.xlu0 %v10595_v18, %s4642_s17  ;;  %v3045_v31 = vsel %vm3016_vm8, %v2980_v21, %v7212_v50  ;;  %v8277_v41 = vpop.permute.xlu1 %2519  ;;  %v8279_v15 = vpop.permute.xlu0 %1497  ;;  %v3266_v3 = vmul.f32 %v3138_v48, %v10638_v38  ;;  %v2851_v6 = vsel %vm2821_vm5, %v2786_v23, %v10639_v36  ;;  %v10641_v11 = vld [vmem:[#allocation117_spill] sm:$0xff]  ;;  %v10642_v58 = vld [vmem:[#allocation327_spill] sm:$0xff] }
 0x3bb   :  { %3754 = vmatmul.mubr.f32.gmra.mxu1 %v3263_v4  ;;  %v2916_v63 = vsel %vm2886_vm6, %v2851_v6, %v7214_v26  ;;  %v2657_v50 = vsel %vm189_vm0, %v10641_v11, %v10640_v39  ;;  %v3265_v48 = vmul.f32 %v3137_v2, %v3045_v31  ;;  %v3139_v26 = vld [vmem:[%s9689_s2 + $0x1d0] sm:$0xff] }
 0x3bc   :  { %v2981_v4 = vsel %vm2951_vm7, %v2916_v63, %v7222_v57  ;;  %v2722_v21 = vsel %vm2691_vm3, %v2657_v50, %v7228_v22  ;;  %4485 = vmatprep.mubr.msk.f32.mxu1 %vm189_vm0, %v3266_v3  ;;  %v10644_v57 = vld [vmem:[#allocation138_spill] sm:$0xff]  ;;  %v10646_v63 = vld [vmem:[#allocation329_spill] sm:$0xff]  ;;  %v10648_v50 = vld [vmem:[#allocation332_spill] sm:$0xff] }
 0x3bd   :  { %1259 = vrot.lane.b32.xlu1 %v10570_v46, %s4640_s28  ;;  %v3046_v23 = vsel %vm3016_vm8, %v2981_v4, %v10642_v58  ;;  %v10643_v46 = vld [vmem:[#allocation328_spill] sm:$0xff]  ;;  %v3268_v31 = vmul.f32 %v3140_v20, %v10644_v57  ;;  %v10645_v6 = vld [vmem:[#allocation330_spill] sm:$0xff] }
 0x3be   :  { %1769 = vrot.lane.b32.xlu0 %v10607_v53, %s4643_s18  ;;  %v2787_v38 = vsel %vm2756_vm4, %v2722_v21, %v10643_v46  ;;  %v8308_v36 = vpop.permute.xlu1 %1243  ;;  %v8310_v2 = vpop.permute.xlu0 %1753  ;;  %v3142_v3 = vld [vmem:[%s9689_s2 + $0x1e8] sm:$0xff]  ;;  %v3267_v20 = vmul.f32 %v3139_v26, %v3046_v23  ;;  %v10649_v21 = vld [vmem:[#allocation331_spill] sm:$0xff]  ;;  %v10650_v58 = vld [vmem:[#allocation164_spill] sm:$0xff] }
 0x3bf   :  { %v2852_v22 = vsel %vm2821_vm5, %v2787_v38, %v10645_v6  ;;  %3759 = vmatmul.mubr.f32.gmra.mxu1 %v3265_v48  ;;  %v10647_v39 = vld [vmem:[#allocation122_spill] sm:$0xff]  ;;  %v10651_v38 = vld [vmem:[#allocation333_spill] sm:$0xff]  ;;  %v10653_v23 = vld [vmem:[#allocation143_spill] sm:$0xff] }
 0x3c0   :  { %v2658_v11 = vsel %vm189_vm0, %v10647_v39, %v10646_v63  ;;  %v2917_v4 = vsel %vm2886_vm6, %v2852_v22, %v10648_v50  ;;  %4486 = vmatprep.mubr.msk.f32.mxu1 %vm189_vm0, %v3268_v31  ;;  %v3141_v6 = vld [vmem:[%s9689_s2 + $0x1e0] sm:$0xff]  ;;  %v3270_v39 = vmul.f32 %v3142_v3, %v10653_v23  ;;  %v3144_v31 = vld [vmem:[%s9689_s2 + $0x1f8] sm:$0xff] }
 0x3c1   :  { %1515 = vrot.lane.b32.xlu1 %v10619_v16, %s4642_s17  ;;  %v2723_v48 = vsel %vm2691_vm3, %v2658_v11, %v10649_v21  ;;  %v2982_v46 = vsel %vm2951_vm7, %v2917_v4, %v10650_v58  ;;  %v10654_v11 = vld [vmem:[#allocation334_spill] sm:$0xff]  ;;  %v10655_v4 = vld [vmem:[#allocation335_spill] sm:$0xff]  ;;  %v10658_v3 = vld [vmem:[#allocation229_spill] sm:$0xff] }
 0x3c2   :  { %1961 = vrot.lane.b32.xlu0 %v10620_v24, %s4639_s23  ;;  %v2788_v57 = vsel %vm2756_vm4, %v2723_v48, %v10651_v38  ;;  %v3047_v22 = vsel %vm3016_vm8, %v2982_v46, %v7268_v51  ;;  %v8339_v63 = vpop.permute.xlu1 %1499  ;;  %v8341_v26 = vpop.permute.xlu0 %1945  ;;  %v10656_v48 = vld [vmem:[#allocation169_spill] sm:$0xff]  ;;  %v10657_v58 = vld [vmem:[#allocation127_spill] sm:$0xff]  ;;  %v10659_v38 = vld [vmem:[#allocation336_spill] sm:$0xff] }
 0x3c3   :  { %10652 = vst [vmem:[#allocation70_spill] sm:$0xff] %v8339_v63  ;;  %v2853_v50 = vsel %vm2821_vm5, %v2788_v57, %v10654_v11  ;;  %3764 = vmatmul.mubr.f32.gmra.mxu1 %v3267_v20  ;;  %v2659_v51 = vsel %vm189_vm0, %v10657_v58, %v10656_v48  ;;  %v3269_v46 = vmul.f32 %v3141_v6, %v3047_v22  ;;  %v10660_v57 = vld [vmem:[#allocation337_spill] sm:$0xff]  ;;  %v3143_v11 = vld [vmem:[%s9689_s2 + $0x1f0] sm:$0xff]  ;;  %v10665_v22 = vld [vmem:[#allocation148_spill] sm:$0xff] }
 0x3c4   :  { %v2918_v21 = vsel %vm2886_vm6, %v2853_v50, %v10655_v4  ;;  %v2724_v23 = vsel %vm2691_vm3, %v2659_v51, %v10660_v57  ;;  %4487 = vmatprep.mubr.msk.f32.mxu1 %vm189_vm0, %v3270_v39  ;;  %v10661_v50 = vld [vmem:[#allocation338_spill] sm:$0xff]  ;;  %v10662_v48 = vld [vmem:[#allocation339_spill] sm:$0xff]  ;;  %v10667_v57 = vld [vmem:[#allocation340_spill] sm:$0xff] }
 0x3c5   :  { %1771 = vrot.lane.b32.xlu1 %v10627_v30, %s4643_s18  ;;  %v2983_v20 = vsel %vm2951_vm7, %v2918_v21, %v10659_v38  ;;  %v2789_v58 = vsel %vm2756_vm4, %v2724_v23, %v10662_v48  ;;  %v3272_v21 = vmul.f32 %v3144_v31, %v10665_v22  ;;  %v10666_v38 = vld [vmem:[#allocation341_spill] sm:$0xff]  ;;  %v10668_v53 = vld [vmem:[#allocation132_spill] sm:$0xff] }
 0x3c6   :  { %2153 = vrot.lane.b32.xlu0 %v10658_v3, %s4641_s13  ;;  %v3048_v4 = vsel %vm3016_vm8, %v2983_v20, %v10661_v50  ;;  %v8370_v30 = vpop.permute.xlu1 %1755  ;;  %v8372_v6 = vpop.permute.xlu0 %2137  ;;  %v2854_v51 = vsel %vm2821_vm5, %v2789_v58, %v10666_v38  ;;  %v3146_v39 = vld [vmem:[%s9689_s2 + $0x208] sm:$0xff]  ;;  %v2660_v20 = vsel %vm189_vm0, %v10668_v53, %v10667_v57  ;;  %v10669_v50 = vld [vmem:[#allocation343_spill] sm:$0xff]  ;;  %v10670_v31 = vld [vmem:[#allocation232_spill] sm:$0xff] }
 0x3c7   :  { %10663 = vst [vmem:[#allocation63_spill] sm:$0xff] %v8370_v30  ;;  %10664 = vst [vmem:[#allocation73_spill] sm:$0xff] %v8372_v6  ;;  %3769 = vmatmul.mubr.f32.gmra.mxu1 %v3269_v46  ;;  %v2919_v23 = vsel %vm2886_vm6, %v2854_v51, %v10669_v50  ;;  %v3271_v48 = vmul.f32 %v3143_v11, %v3048_v4  ;;  %v10671_v58 = vld [vmem:[#allocation342_spill] sm:$0xff]  ;;  %v10672_v22 = vld [vmem:[#allocation345_spill] sm:$0xff] }
 0x3c8   :  { %v2725_v46 = vsel %vm2691_vm3, %v2660_v20, %v10671_v58  ;;  %v2984_v38 = vsel %vm2951_vm7, %v2919_v23, %v10672_v22  ;;  %4488 = vmatprep.mubr.msk.f32.mxu1 %vm189_vm0, %v3272_v21  ;;  %v10673_v16 = vld [vmem:[#allocation344_spill] sm:$0xff]  ;;  %v10674_v57 = vld [vmem:[#allocation347_spill] sm:$0xff]  ;;  %v10677_v4 = vld [vmem:[#allocation153_spill] sm:$0xff] }
 0x3c9   :  { %1963 = vrot.lane.b32.xlu1 %v10634_v55, %s4639_s23  ;;  %v2790_v53 = vsel %vm2756_vm4, %v2725_v46, %v10673_v16  ;;  %v3145_v51 = vld [vmem:[%s9689_s2 + $0x200] sm:$0xff]  ;;  %v3049_v50 = vsel %vm3016_vm8, %v2984_v38, %v10674_v57  ;;  %v3274_v20 = vmul.f32 %v3146_v39, %v10677_v4  ;;  %v10678_v58 = vld [vmem:[#allocation346_spill] sm:$0xff]  ;;  %v3148_v16 = vld [vmem:[%s9689_s2 + $0x218] sm:$0xff] }
 0x3ca   :  { %2345 = vrot.lane.b32.xlu0 %v10670_v31, %s4645_s22  ;;  %v8401_v18 = vpop.permute.xlu1 %1947  ;;  %v8403_v11 = vpop.permute.xlu0 %2329  ;;  %v2855_v23 = vsel %vm2821_vm5, %v2790_v53, %v10678_v58  ;;  %v10679_v21 = vld [vmem:[#allocation348_spill] sm:$0xff]  ;;  %v10680_v22 = vld [vmem:[#allocation178_spill] sm:$0xff]  ;;  %v10681_v30 = vld [vmem:[#allocation137_spill] sm:$0xff]  ;;  %v3273_v4 = vmul.f32 %v3145_v51, %v3049_v50 }
 0x3cb   :  { %10675 = vst [vmem:[#allocation83_spill] sm:$0xff] %v8401_v18  ;;  %10676 = vst [vmem:[#allocation72_spill] sm:$0xff] %v8403_v11  ;;  %3774 = vmatmul.mubr.f32.gmra.mxu1 %v3271_v48  ;;  %v2920_v46 = vsel %vm2886_vm6, %v2855_v23, %v10679_v21  ;;  %v2661_v38 = vsel %vm189_vm0, %v10681_v30, %v10680_v22  ;;  %v10682_v57 = vld [vmem:[#allocation233_spill] sm:$0xff]  ;;  %v10683_v39 = vld [vmem:[#allocation226_spill] sm:$0xff] }
 0x3cc   :  { %v10684_v53 = vld [vmem:[#allocation349_spill] sm:$0xff]  ;;  %v10685_v58 = vld [vmem:[#allocation350_spill] sm:$0xff]  ;;  %4489 = vmatprep.mubr.msk.f32.mxu1 %vm189_vm0, %v3274_v20  ;;  %v10686_v30 = vld [vmem:[#allocation351_spill] sm:$0xff] }
 0x3cd   :  { %2155 = vrot.lane.b32.xlu1 %v10682_v57, %s4641_s13  ;;  %v2985_v48 = vsel %vm2951_vm7, %v2920_v46, %v10684_v53  ;;  %v2726_v18 = vsel %vm2691_vm3, %v2661_v38, %v10685_v58  ;;  %v3147_v23 = vld [vmem:[%s9689_s2 + $0x210] sm:$0xff]  ;;  %v10687_v22 = vld [vmem:[#allocation352_spill] sm:$0xff]  ;;  %v3150_v20 = vld [vmem:[%s9689_s2 + $0x228] sm:$0xff] }
 0x3ce   :  { %2537 = vrot.lane.b32.xlu0 %v10683_v39, %s4644_s26  ;;  %v3050_v21 = vsel %vm3016_vm8, %v2985_v48, %v10686_v30  ;;  %v2791_v11 = vsel %vm2756_vm4, %v2726_v18, %v10687_v22  ;;  %v8432_v63 = vpop.permute.xlu1 %2139  ;;  %v10689_v50 = vld [vmem:[#allocation158_spill] sm:$0xff]  ;;  %v10691_v58 = vld [vmem:[#allocation353_spill] sm:$0xff]  ;;  %v10693_v30 = vld [vmem:[#allocation356_spill] sm:$0xff] }
 0x3cf   :  { %10688 = vst [vmem:[#allocation29_spill] sm:$0xff] %v8432_v63  ;;  %v8434_v51 = vpop.permute.xlu0 %2521  ;;  %v3276_v46 = vmul.f32 %v3148_v16, %v10689_v50  ;;  %v10690_v53 = vld [vmem:[#allocation354_spill] sm:$0xff]  ;;  %3779 = vmatmul.mubr.f32.gmra.mxu1 %v3273_v4  ;;  %v10694_v22 = vld [vmem:[#allocation235_spill] sm:$0xff]  ;;  %v3275_v16 = vmul.f32 %v3147_v23, %v3050_v21 }
 0x3d0   :  { %v2856_v38 = vsel %vm2821_vm5, %v2791_v11, %v10690_v53  ;;  %v10692_v6 = vld [vmem:[#allocation142_spill] sm:$0xff]  ;;  %v10695_v11 = vld [vmem:[#allocation355_spill] sm:$0xff] }
 0x3d1   :  { %v2662_v48 = vsel %vm189_vm0, %v10692_v6, %v10691_v58  ;;  %v2921_v18 = vsel %vm2886_vm6, %v2856_v38, %v10693_v30  ;;  %2347 = vrot.lane.b32.xlu1 %v10694_v22, %s4645_s22  ;;  %v10696_v50 = vld [vmem:[#allocation47_spill] sm:$0xff]  ;;  %4490 = vmatprep.mubr.msk.f32.mxu1 %vm189_vm0, %v3276_v46  ;;  %v3149_v6 = vld [vmem:[%s9689_s2 + $0x220] sm:$0xff] }
 0x3d2   :  { %1261 = vrot.lane.b32.xlu0 %v10620_v24, %s4640_s28  ;;  %v2727_v4 = vsel %vm2691_vm3, %v2662_v48, %v10695_v11  ;;  %v2986_v53 = vsel %vm2951_vm7, %v2921_v18, %v10696_v50  ;;  %v10697_v38 = vld [vmem:[#allocation64_spill] sm:$0xff]  ;;  %v8463_v24 = vpop.permute.xlu1 %2331  ;;  %v10699_v21 = vld [vmem:[#allocation163_spill] sm:$0xff] }
 0x3d3   :  { %v3051_v58 = vsel %vm3016_vm8, %v2986_v53, %v10697_v38  ;;  %v2792_v30 = vsel %vm2756_vm4, %v2727_v4, %v7446_v56  ;;  %10698 = vst [vmem:[#allocation86_spill] sm:$0xff] %v8463_v24  ;;  %v8465_v23 = vpop.permute.xlu0 %1245  ;;  %v3278_v48 = vmul.f32 %v3150_v20, %v10699_v21  ;;  %v10700_v11 = vld [vmem:[#allocation56_spill] sm:$0xff]  ;;  %3784 = vmatmul.mubr.f32.gmra.mxu1 %v3275_v16  ;;  %v10702_v63 = vld [vmem:[#allocation147_spill] sm:$0xff]  ;;  %v10704_v4 = vld [vmem:[#allocation230_spill] sm:$0xff] }
 0x3d4   :  { %v2857_v18 = vsel %vm2821_vm5, %v2792_v30, %v10700_v11  ;;  %v3152_v46 = vld [vmem:[%s9689_s2 + $0x238] sm:$0xff]  ;;  %v3277_v20 = vmul.f32 %v3149_v6, %v3051_v58  ;;  %v10705_v30 = vld [vmem:[#allocation45_spill] sm:$0xff] }
 0x3d5   :  { %v10701_v50 = vld [vmem:[#allocation188_spill] sm:$0xff]  ;;  %2539 = vrot.lane.b32.xlu1 %v10704_v4, %s4644_s26  ;;  %v10706_v21 = vld [vmem:[#allocation53_spill] sm:$0xff]  ;;  %4491 = vmatprep.mubr.msk.f32.mxu1 %vm189_vm0, %v3278_v48  ;;  %v10710_v48 = vld [vmem:[#allocation54_spill] sm:$0xff] }
 0x3d6   :  { %v2663_v53 = vsel %vm189_vm0, %v10702_v63, %v10701_v50  ;;  %v10703_v38 = vld [vmem:[#allocation48_spill] sm:$0xff]  ;;  %1517 = vrot.lane.b32.xlu0 %v10658_v3, %s4642_s17  ;;  %v10707_v24 = vld [vmem:[#allocation49_spill] sm:$0xff] }
 0x3d7   :  { %v2922_v56 = vsel %vm2886_vm6, %v2857_v18, %v10703_v38  ;;  %v2728_v16 = vsel %vm2691_vm3, %v2663_v53, %v10705_v30  ;;  %v3151_v18 = vld [vmem:[%s9689_s2 + $0x230] sm:$0xff]  ;;  %v8494_v38 = vpop.permute.xlu1 %2523  ;;  %v8496_v6 = vpop.permute.xlu0 %1501  ;;  %v10708_v58 = vld [vmem:[#allocation168_spill] sm:$0xff]  ;;  %3789 = vmatmul.mubr.f32.gmra.mxu1 %v3277_v20 }
 0x3d8   :  { %v2987_v11 = vsel %vm2951_vm7, %v2922_v56, %v10706_v21  ;;  %v2793_v63 = vsel %vm2756_vm4, %v2728_v16, %v10707_v24  ;;  %v3280_v53 = vmul.f32 %v3152_v46, %v10708_v58  ;;  %v10709_v30 = vld [vmem:[#allocation62_spill] sm:$0xff]  ;;  %v10711_v21 = vld [vmem:[#allocation152_spill] sm:$0xff] }
 0x3d9   :  { %v3052_v50 = vsel %vm3016_vm8, %v2987_v11, %v7574_v42  ;;  %v2858_v56 = vsel %vm2821_vm5, %v2793_v63, %v10709_v30  ;;  %v3154_v24 = vld [vmem:[%s9689_s2 + $0x248] sm:$0xff]  ;;  %v2664_v42 = vsel %vm189_vm0, %v10711_v21, %v7605_v25  ;;  %1263 = vrot.lane.b32.xlu1 %v10634_v55, %s4640_s28  ;;  %v3153_v58 = vld [vmem:[%s9689_s2 + $0x240] sm:$0xff] }
 0x3da   :  { %v2923_v16 = vsel %vm2886_vm6, %v2858_v56, %v10710_v48  ;;  %1773 = vrot.lane.b32.xlu0 %v10670_v31, %s4643_s18  ;;  %v3279_v46 = vmul.f32 %v3151_v18, %v3052_v50  ;;  %v10712_v11 = vld [vmem:[#allocation66_spill] sm:$0xff]  ;;  %v2729_v63 = vsel %vm2691_vm3, %v2664_v42, %v7636_v54  ;;  %4492 = vmatprep.mubr.msk.f32.mxu1 %vm189_vm0, %v3280_v53  ;;  %v10713_v50 = vld [vmem:[#allocation173_spill] sm:$0xff]  ;;  %v10714_v48 = vld [vmem:[#allocation71_spill] sm:$0xff] }
 0x3db   :  { %v2988_v20 = vsel %vm2951_vm7, %v2923_v16, %v10712_v11  ;;  %v2794_v55 = vsel %vm2756_vm4, %v2729_v63, %v7667_v60  ;;  %v8525_v30 = vpop.permute.xlu1 %1247  ;;  %v8527_v18 = vpop.permute.xlu0 %1757  ;;  %v3282_v56 = vmul.f32 %v3154_v24, %v10713_v50  ;;  %v3156_v53 = vld [vmem:[%s9689_s2 + $0x258] sm:$0xff]  ;;  %v10715_v16 = vld [vmem:[#allocation57_spill] sm:$0xff]  ;;  %v10717_v42 = vld [vmem:[#allocation46_spill] sm:$0xff] }
 0x3dc   :  { %v3053_v25 = vsel %vm3016_vm8, %v2988_v20, %v7634_v43  ;;  %v2859_v54 = vsel %vm2821_vm5, %v2794_v55, %v10714_v48  ;;  %3794 = vmatmul.mubr.f32.gmra.mxu1 %v3279_v46  ;;  %v10716_v21 = vld [vmem:[#allocation157_spill] sm:$0xff]  ;;  %v10718_v20 = vld [vmem:[#allocation55_spill] sm:$0xff] }
 0x3dd   :  { %v2665_v43 = vsel %vm189_vm0, %v10716_v21, %v10715_v16  ;;  %v2924_v60 = vsel %vm2886_vm6, %v2859_v54, %v7729_v49  ;;  %1519 = vrot.lane.b32.xlu1 %v10682_v57, %s4642_s17  ;;  %v3281_v24 = vmul.f32 %v3153_v58, %v3053_v25  ;;  %4493 = vmatprep.mubr.msk.f32.mxu1 %vm189_vm0, %v3282_v56  ;;  %v3155_v49 = vld [vmem:[%s9689_s2 + $0x250] sm:$0xff]  ;;  %v10719_v25 = vld [vmem:[#allocation177_spill] sm:$0xff] }
 0x3de   :  { %1965 = vrot.lane.b32.xlu0 %v10683_v39, %s4639_s23  ;;  %v2730_v46 = vsel %vm2691_vm3, %v2665_v43, %v10717_v42  ;;  %v2989_v11 = vsel %vm2951_vm7, %v2924_v60, %v7760_v44  ;;  %v3284_v48 = vmul.f32 %v3156_v53, %v10719_v25  ;;  %v3158_v56 = vld [vmem:[%s9689_s2 + $0x268] sm:$0xff]  ;;  %v10721_v53 = vld [vmem:[#allocation236_spill] sm:$0xff] }
 0x3df   :  { %v2795_v63 = vsel %vm2756_vm4, %v2730_v46, %v10718_v20  ;;  %v3054_v55 = vsel %vm3016_vm8, %v2989_v11, %v7791_v59  ;;  %v8556_v50 = vpop.permute.xlu1 %1503  ;;  %v8558_v58 = vpop.permute.xlu0 %1949  ;;  %v10720_v16 = vld [vmem:[#allocation162_spill] sm:$0xff]  ;;  %v3160_v11 = vld [vmem:[%s9689_s2 + $0x278] sm:$0xff] }
 0x3e0   :  { %v2860_v44 = vsel %vm2821_vm5, %v2795_v63, %v7758_v61  ;;  %3799 = vmatmul.mubr.f32.gmra.mxu1 %v3281_v24  ;;  %v2666_v59 = vsel %vm189_vm0, %v10720_v16, %v7822_v40  ;;  %v3283_v21 = vmul.f32 %v3155_v49, %v3054_v55  ;;  %v10723_v20 = vld [vmem:[#allocation167_spill] sm:$0xff]  ;;  %v10726_v16 = vld [vmem:[#allocation172_spill] sm:$0xff] }
 0x3e1   :  { %v2925_v54 = vsel %vm2886_vm6, %v2860_v44, %v7789_v33  ;;  %1775 = vrot.lane.b32.xlu1 %v10694_v22, %s4643_s18  ;;  %v2731_v43 = vsel %vm2691_vm3, %v2666_v59, %v7853_v28  ;;  %4494 = vmatprep.mubr.msk.f32.mxu1 %vm189_vm0, %v3284_v48  ;;  %v3157_v33 = vld [vmem:[%s9689_s2 + $0x260] sm:$0xff]  ;;  %v10724_v63 = vld [vmem:[#allocation239_spill] sm:$0xff] }
 0x3e2   :  { %2157 = vrot.lane.b32.xlu0 %v10721_v53, %s4641_s13  ;;  %v2990_v61 = vsel %vm2951_vm7, %v2925_v54, %v7820_v8  ;;  %v2796_v60 = vsel %vm2756_vm4, %v2731_v43, %v7884_v19  ;;  %v10722_v8 = vld [vmem:[#allocation182_spill] sm:$0xff]  ;;  %v10727_v59 = vld [vmem:[#allocation240_spill] sm:$0xff] }
 0x3e3   :  { %v3055_v40 = vsel %vm3016_vm8, %v2990_v61, %v7851_v13  ;;  %v8587_v24 = vpop.permute.xlu1 %1759  ;;  %v3286_v46 = vmul.f32 %v3158_v56, %v10722_v8  ;;  %v2861_v28 = vsel %vm2821_vm5, %v2796_v60, %v7915_v5  ;;  %v2667_v13 = vsel %vm189_vm0, %v10723_v20, %v7882_v35  ;;  %v10732_v20 = vld [vmem:[#allocation58_spill] sm:$0xff] }
 0x3e4   :  { %v8589_v42 = vpop.permute.xlu0 %2141  ;;  %3804 = vmatmul.mubr.f32.gmra.mxu1 %v3283_v21  ;;  %v2926_v19 = vsel %vm2886_vm6, %v2861_v28, %v7946_v27  ;;  %v3285_v49 = vmul.f32 %v3157_v33, %v3055_v40  ;;  %v2732_v5 = vsel %vm2691_vm3, %v2667_v13, %v7913_v0  ;;  %v3159_v27 = vld [vmem:[%s9689_s2 + $0x270] sm:$0xff]  ;;  %v10730_v28 = vld [vmem:[#allocation17_spill] sm:$0xff] }
 0x3e5   :  { %1967 = vrot.lane.b32.xlu1 %v10704_v4, %s4639_s23  ;;  %v2991_v55 = vsel %vm2951_vm7, %v2926_v19, %v7977_v29  ;;  %4495 = vmatprep.mubr.msk.f32.mxu1 %vm189_vm0, %v3286_v46  ;;  %v2797_v35 = vsel %vm2756_vm4, %v2732_v5, %v7944_v37  ;;  %v10725_v0 = vld [vmem:[#allocation187_spill] sm:$0xff]  ;;  %v3162_v37 = vld [vmem:[%s9689_s2 + $0x288] sm:$0xff] }
 0x3e6   :  { %2349 = vrot.lane.b32.xlu0 %v10724_v63, %s4645_s22  ;;  %v3056_v25 = vsel %vm3016_vm8, %v2991_v55, %v8008_v14  ;;  %v3288_v56 = vmul.f32 %v3160_v11, %v10725_v0  ;;  %v2862_v29 = vsel %vm2821_vm5, %v2797_v35, %v7975_v1  ;;  %v2668_v14 = vsel %vm189_vm0, %v10726_v16, %v8039_v7  ;;  %v10728_v21 = vld [vmem:[#allocation234_spill] sm:$0xff]  ;;  %v3164_v46 = vld [vmem:[%s9689_s2 + $0x298] sm:$0xff] }
 0x3e7   :  { %v8618_v48 = vpop.permute.xlu1 %1951  ;;  %v2927_v54 = vsel %vm2886_vm6, %v2862_v29, %v8006_v45  ;;  %v3287_v61 = vmul.f32 %v3159_v27, %v3056_v25  ;;  %v2733_v43 = vsel %vm2691_vm3, %v2668_v14, %v8070_v62  ;;  %v3161_v45 = vld [vmem:[%s9689_s2 + $0x280] sm:$0xff]  ;;  %v10733_v13 = vld [vmem:[#allocation242_spill] sm:$0xff]  ;;  %v10735_v5 = vld [vmem:[#allocation59_spill] sm:$0xff] }
 0x3e8   :  { %v8620_v44 = vpop.permute.xlu0 %2333  ;;  %3809 = vmatmul.mubr.f32.gmra.mxu1 %v3285_v49  ;;  %v2992_v1 = vsel %vm2951_vm7, %v2927_v54, %v8037_v34  ;;  %v2798_v33 = vsel %vm2756_vm4, %v2733_v43, %v8094_v17  ;;  %v10729_v34 = vld [vmem:[#allocation192_spill] sm:$0xff]  ;;  %v3163_v25 = vld [vmem:[%s9689_s2 + $0x290] sm:$0xff]  ;;  %v10737_v29 = vld [vmem:[#allocation197_spill] sm:$0xff] }
 0x3e9   :  { %2159 = vrot.lane.b32.xlu1 %v10727_v59, %s4641_s13  ;;  %4496 = vmatprep.mubr.msk.f32.mxu1 %vm189_vm0, %v3288_v56  ;;  %v3057_v7 = vsel %vm3016_vm8, %v2992_v1, %v8068_v9  ;;  %v3290_v8 = vmul.f32 %v3162_v37, %v10729_v34  ;;  %v2863_v62 = vsel %vm2821_vm5, %v2798_v33, %v8121_v52  ;;  %v10731_v11 = vld [vmem:[#allocation176_spill] sm:$0xff]  ;;  %v10734_v52 = vld [vmem:[#allocation67_spill] sm:$0xff]  ;;  %v3166_v14 = vld [vmem:[%s9689_s2 + $0x2a8] sm:$0xff] }
 0x3ea   :  { %2541 = vrot.lane.b32.xlu0 %v10728_v21, %s4644_s26  ;;  %v2669_v9 = vsel %vm189_vm0, %v10731_v11, %v10730_v28  ;;  %v2928_v17 = vsel %vm2886_vm6, %v2863_v62, %v10732_v20  ;;  %v3289_v19 = vmul.f32 %v3161_v45, %v3057_v7  ;;  %v10736_v35 = vld [vmem:[#allocation80_spill] sm:$0xff]  ;;  %v3292_v37 = vmul.f32 %v3164_v46, %v10737_v29  ;;  %v10738_v54 = vld [vmem:[#allocation11_spill] sm:$0xff]  ;;  %v10739_v1 = vld [vmem:[#allocation181_spill] sm:$0xff] }
 0x3eb   :  { %v8649_v40 = vpop.permute.xlu1 %2143  ;;  %v2734_v49 = vsel %vm2691_vm3, %v2669_v9, %v10734_v52  ;;  %v2993_v55 = vsel %vm2951_vm7, %v2928_v17, %v10735_v5  ;;  %v10740_v43 = vld [vmem:[#allocation237_spill] sm:$0xff]  ;;  %v3168_v28 = vld [vmem:[%s9689_s2 + $0x2b8] sm:$0xff]  ;;  %v10742_v11 = vld [vmem:[#allocation186_spill] sm:$0xff] }
 0x3ec   :  { %v8651_v60 = vpop.permute.xlu0 %2525  ;;  %3814 = vmatmul.mubr.f32.gmra.mxu1 %v3287_v61  ;;  %v2799_v27 = vsel %vm2756_vm4, %v2734_v49, %v10736_v35  ;;  %v3058_v0 = vsel %vm3016_vm8, %v2993_v55, %v8217_v32  ;;  %v2670_v32 = vsel %vm189_vm0, %v10739_v1, %v8248_v10  ;;  %v10743_v9 = vld [vmem:[#allocation73_spill] sm:$0xff]  ;;  %v10746_v49 = vld [vmem:[#allocation63_spill] sm:$0xff]  ;;  %v10751_v1 = vld [vmem:[#allocation86_spill] sm:$0xff] }
 0x3ed   :  { %2351 = vrot.lane.b32.xlu1 %v10733_v13, %s4645_s22  ;;  %4497 = vmatprep.mubr.msk.f32.mxu1 %vm189_vm0, %v3290_v8  ;;  %v2864_v16 = vsel %vm2821_vm5, %v2799_v27, %v10738_v54  ;;  %v3291_v45 = vmul.f32 %v3163_v25, %v3058_v0  ;;  %v2735_v33 = vsel %vm2691_vm3, %v2670_v32, %v8279_v15  ;;  %v3167_v5 = vld [vmem:[%s9689_s2 + $0x2b0] sm:$0xff]  ;;  %v10749_v54 = vld [vmem:[#allocation29_spill] sm:$0xff] }
 0x3ee   :  { %1265 = vrot.lane.b32.xlu0 %v10683_v39, %s4640_s28  ;;  %v2929_v61 = vsel %vm2886_vm6, %v2864_v16, %v8215_v12  ;;  %v3165_v12 = vld [vmem:[%s9689_s2 + $0x2a0] sm:$0xff]  ;;  %v2800_v34 = vsel %vm2756_vm4, %v2735_v33, %v8310_v2  ;;  %v10747_v27 = vld [vmem:[#allocation206_spill] sm:$0xff]  ;;  %v10748_v0 = vld [vmem:[#allocation83_spill] sm:$0xff] }
 0x3ef   :  { %v8680_v39 = vpop.permute.xlu1 %2335  ;;  %v2994_v7 = vsel %vm2951_vm7, %v2929_v61, %v8246_v47  ;;  %v10741_v47 = vld [vmem:[#allocation201_spill] sm:$0xff]  ;;  %v2865_v15 = vsel %vm2821_vm5, %v2800_v34, %v8341_v26  ;;  %v10744_v26 = vld [vmem:[#allocation70_spill] sm:$0xff]  ;;  %v3296_v25 = vmul.f32 %v3168_v28, %v10747_v27 }
 0x3f0   :  { %v8682_v56 = vpop.permute.xlu0 %1249  ;;  %3819 = vmatmul.mubr.f32.gmra.mxu1 %v3289_v19  ;;  %v3059_v10 = vsel %vm3016_vm8, %v2994_v7, %v8277_v41  ;;  %v3294_v46 = vmul.f32 %v3166_v14, %v10741_v47  ;;  %v2671_v41 = vsel %vm189_vm0, %v10742_v11, %v8308_v36  ;;  %v2930_v2 = vsel %vm2886_vm6, %v2865_v15, %v10743_v9  ;;  %v10745_v19 = vld [vmem:[#allocation72_spill] sm:$0xff]  ;;  %v10750_v14 = vld [vmem:[#allocation191_spill] sm:$0xff]  ;;  %v10752_v34 = vld [vmem:[#allocation210_spill] sm:$0xff] }
 0x3f1   :  { %2543 = vrot.lane.b32.xlu1 %v10740_v43, %s4644_s26  ;;  %4498 = vmatprep.mubr.msk.f32.mxu1 %vm189_vm0, %v3292_v37  ;;  %v3293_v20 = vmul.f32 %v3165_v12, %v3059_v10  ;;  %v2736_v17 = vsel %vm2691_vm3, %v2671_v41, %v10744_v26  ;;  %v2995_v52 = vsel %vm2951_vm7, %v2930_v2, %v10745_v19  ;;  %v3170_v37 = vld [vmem:[%s9689_s2 + $0x2c8] sm:$0xff]  ;;  %v3169_v7 = vld [vmem:[%s9689_s2 + $0x2c0] sm:$0xff] }
 0x3f2   :  { %1521 = vrot.lane.b32.xlu0 %v10721_v53, %s4642_s17  ;;  %v2801_v36 = vsel %vm2756_vm4, %v2736_v17, %v10746_v49  ;;  %v3298_v47 = vmul.f32 %v3170_v37, %v10752_v34  ;;  %v10753_v15 = vld [vmem:[#allocation196_spill] sm:$0xff]  ;;  %v10755_v26 = vld [vmem:[#allocation213_spill] sm:$0xff] }
 0x3f3   :  { %v8711_v8 = vpop.permute.xlu1 %2527  ;;  %v2866_v29 = vsel %vm2821_vm5, %v2801_v36, %v10748_v0  ;;  %v2673_v28 = vsel %vm189_vm0, %v10753_v15, %v8525_v30  ;;  %v10759_v37 = vld [vmem:[#allocation248_spill] sm:$0xff] }
 0x3f4   :  { %v8713_v62 = vpop.permute.xlu0 %1505  ;;  %3824 = vmatmul.mubr.f32.gmra.mxu1 %v3291_v45  ;;  %v2931_v16 = vsel %vm2886_vm6, %v2866_v29, %v10749_v54 }
 0x3f5   :  { %1267 = vrot.lane.b32.xlu1 %v10704_v4, %s4640_s28  ;;  %4499 = vmatprep.mubr.msk.f32.mxu1 %vm189_vm0, %v3294_v46  ;;  %v3060_v4 = vsel %vm3016_vm8, %v2995_v52, %v8434_v51  ;;  %v2672_v51 = vsel %vm189_vm0, %v10750_v14, %v8465_v23  ;;  %v2996_v32 = vsel %vm2951_vm7, %v2931_v16, %v10751_v1 }
 0x3f6   :  { %1777 = vrot.lane.b32.xlu0 %v10724_v63, %s4643_s18  ;;  %v3295_v61 = vmul.f32 %v3167_v5, %v3060_v4  ;;  %v2737_v45 = vsel %vm2691_vm3, %v2672_v51, %v8496_v6  ;;  %v3061_v23 = vsel %vm3016_vm8, %v2996_v32, %v8494_v38  ;;  %v3172_v6 = vld [vmem:[%s9689_s2 + $0x2d8] sm:$0xff] }
 0x3f7   :  { %v8742_v55 = vpop.permute.xlu1 %1251  ;;  %v2802_v33 = vsel %vm2756_vm4, %v2737_v45, %v8527_v18  ;;  %v10754_v18 = vld [vmem:[#allocation243_spill] sm:$0xff]  ;;  %v3297_v11 = vmul.f32 %v3169_v7, %v3061_v23  ;;  %v3300_v17 = vmul.f32 %v3172_v6, %v10755_v26  ;;  %v3178_v45 = vld [vmem:[%s9689_s2 + $0x308] sm:$0xff] }
 0x3f8   :  { %v1762_v35 = vpop.permute.xlu0 %1761  ;;  %3829 = vmatmul.mubr.f32.gmra.mxu1 %v3293_v20  ;;  %v2867_v46 = vsel %vm2821_vm5, %v2802_v33, %v8558_v58  ;;  %v2738_v58 = vsel %vm2691_vm3, %v2673_v28, %v8556_v50  ;;  %v10762_v23 = vld [vmem:[#allocation250_spill] sm:$0xff]  ;;  %v10763_v33 = vld [vmem:[#allocation205_spill] sm:$0xff] }
 0x3f9   :  { %1523 = vrot.lane.b32.xlu1 %v10727_v59, %s4642_s17  ;;  %4500 = vmatprep.mubr.msk.f32.mxu1 %vm189_vm0, %v3296_v25  ;;  %v2932_v38 = vsel %vm2886_vm6, %v2867_v46, %v8589_v42  ;;  %v2803_v30 = vsel %vm2756_vm4, %v2738_v58, %v8587_v24  ;;  %v3171_v42 = vld [vmem:[%s9689_s2 + $0x2d0] sm:$0xff]  ;;  %v10758_v25 = vld [vmem:[#allocation217_spill] sm:$0xff] }
 0x3fa   :  { %1969 = vrot.lane.b32.xlu0 %v10728_v21, %s4639_s23  ;;  %v2997_v41 = vsel %vm2951_vm7, %v2932_v38, %v8620_v44  ;;  %v2868_v50 = vsel %vm2821_vm5, %v2803_v30, %v8618_v48  ;;  %v3174_v44 = vld [vmem:[%s9689_s2 + $0x2e8] sm:$0xff]  ;;  %v10757_v48 = vld [vmem:[#allocation200_spill] sm:$0xff] }
 0x3fb   :  { %v1508_v12 = vpop.permute.xlu1 %1507  ;;  %v3062_v9 = vsel %vm3016_vm8, %v2997_v41, %v8651_v60  ;;  %v2933_v24 = vsel %vm2886_vm6, %v2868_v50, %v8649_v40  ;;  %v10756_v60 = vld [vmem:[#allocation247_spill] sm:$0xff]  ;;  %v2674_v49 = vsel %vm189_vm0, %v10757_v48, %v8682_v56  ;;  %v3173_v40 = vld [vmem:[%s9689_s2 + $0x2e0] sm:$0xff] }
 0x3fc   :  { %v1954_v10 = vpop.permute.xlu0 %1953  ;;  %3834 = vmatmul.mubr.f32.gmra.mxu1 %v3295_v61  ;;  %v3299_v19 = vmul.f32 %v3171_v42, %v3062_v9  ;;  %v2998_v52 = vsel %vm2951_vm7, %v2933_v24, %v8680_v39  ;;  %v2739_v5 = vsel %vm2691_vm3, %v2674_v49, %v8713_v62  ;;  %v3302_v39 = vmul.f32 %v3174_v44, %v10758_v25  ;;  %v3176_v56 = vld [vmem:[%s9689_s2 + $0x2f8] sm:$0xff]  ;;  %v10764_v6 = vld [vmem:[#allocation225_spill] sm:$0xff] }
 0x3fd   :  { %1779 = vrot.lane.b32.xlu1 %v10733_v13, %s4643_s18  ;;  %4501 = vmatprep.mubr.msk.f32.mxu1 %vm189_vm0, %v3298_v47  ;;  %v3063_v36 = vsel %vm3016_vm8, %v2998_v52, %v8711_v8  ;;  %v2804_v0 = vsel %vm2756_vm4, %v2739_v5, %v1762_v35  ;;  %v10760_v8 = vld [vmem:[#allocation82_spill] sm:$0xff]  ;;  %v10761_v61 = vld [vmem:[#allocation220_spill] sm:$0xff]  ;;  %v3306_v15 = vmul.f32 %v3178_v45, %v10764_v6 }
 0x3fe   :  { %2161 = vrot.lane.b32.xlu0 %v10754_v18, %s4641_s13  ;;  %v2869_v29 = vsel %vm2821_vm5, %v2804_v0, %v1954_v10  ;;  %v3301_v62 = vmul.f32 %v3173_v40, %v3063_v36  ;;  %v3175_v35 = vld [vmem:[%s9689_s2 + $0x2f0] sm:$0xff]  ;;  %v3304_v1 = vmul.f32 %v3176_v56, %v10761_v61  ;;  %v2675_v10 = vsel %vm189_vm0, %v10763_v33, %v8742_v55  ;;  %v3177_v55 = vld [vmem:[%s9689_s2 + $0x300] sm:$0xff] }
 0x3ff   :  { %v1764_v2 = vpop.permute.xlu1 %1763  ;;  %v2740_v34 = vsel %vm2691_vm3, %v2675_v10, %v1508_v12  ;;  %v3180_v12 = vld [vmem:[%s9689_s2 + $0x318] sm:$0xff]  ;;  %v10767_v5 = vld [vmem:[#allocation254_spill] sm:$0xff] }
 0x400   :  { %v2146_v20 = vpop.permute.xlu0 %2145  ;;  %3839 = vmatmul.mubr.f32.gmra.mxu1 %v3297_v11  ;;  %v2805_v28 = vsel %vm2756_vm4, %v2740_v34, %v1764_v2  ;;  %v10765_v11 = vld [vmem:[#allocation244_spill] sm:$0xff]  ;;  %v3179_v61 = vld [vmem:[%s9689_s2 + $0x310] sm:$0xff] }
 0x401   :  { %1971 = vrot.lane.b32.xlu1 %v10740_v43, %s4639_s23  ;;  %4502 = vmatprep.mubr.msk.f32.mxu1 %vm189_vm0, %v3300_v17  ;;  %v2934_v54 = vsel %vm2886_vm6, %v2869_v29, %v2146_v20  ;;  %v3308_v20 = vmul.f32 %v3180_v12, %v10658_v3  ;;  %v10766_v3 = vld [vmem:[#allocation251_spill] sm:$0xff]  ;;  %v10772_v6 = vld [vmem:[#allocation212_spill] sm:$0xff] }
 0x402   :  { %2353 = vrot.lane.b32.xlu0 %v10756_v60, %s4645_s22 }
 0x403   :  { %v1956_v4 = vpop.permute.xlu1 %1955 }
 0x404   :  { %v2338_v27 = vpop.permute.xlu0 %2337  ;;  %3844 = vmatmul.mubr.f32.gmra.mxu1 %v3299_v19  ;;  %v2870_v38 = vsel %vm2821_vm5, %v2805_v28, %v1956_v4  ;;  %v10768_v4 = vld [vmem:[#allocation209_spill] sm:$0xff] }
 0x405   :  { %2163 = vrot.lane.b32.xlu1 %v10759_v37, %s4641_s13  ;;  %4503 = vmatprep.mubr.msk.f32.mxu1 %vm189_vm0, %v3302_v39  ;;  %v2999_v16 = vsel %vm2951_vm7, %v2934_v54, %v2338_v27 }
 0x406   :  { %2545 = vrot.lane.b32.xlu0 %v10760_v8, %s4644_s26 }
 0x407   :  { %v2148_v14 = vpop.permute.xlu1 %2147 }
 0x408   :  { %v2530_v51 = vpop.permute.xlu0 %2529  ;;  %3849 = vmatmul.mubr.f32.gmra.mxu1 %v3301_v62 }
 0x409   :  { %v3064_v32 = vsel %vm3016_vm8, %v2999_v16, %v2530_v51  ;;  %2355 = vrot.lane.b32.xlu1 %v10762_v23, %s4645_s22  ;;  %4504 = vmatprep.mubr.msk.f32.mxu1 %vm189_vm0, %v3304_v1  ;;  %v10770_v16 = vld [vmem:[#allocation249_spill] sm:$0xff] }
 0x40a   :  { %v3303_v7 = vmul.f32 %v3175_v35, %v3064_v32  ;;  %1269 = vrot.lane.b32.xlu0 %v10728_v21, %s4640_s28  ;;  %v2935_v21 = vsel %vm2886_vm6, %v2870_v38, %v2148_v14  ;;  %v10769_v35 = vld [vmem:[#allocation255_spill] sm:$0xff]  ;;  %v3182_v1 = vld [vmem:[%s9689_s2 + $0x328] sm:$0xff] }
 0x40b   :  { %v2340_v47 = vpop.permute.xlu1 %2339 }
 0x40c   :  { %v1254_v46 = vpop.permute.xlu0 %1253  ;;  %3854 = vmatmul.mubr.f32.gmra.mxu1 %v3303_v7  ;;  %v3000_v58 = vsel %vm2951_vm7, %v2935_v21, %v2340_v47  ;;  %v10771_v47 = vld [vmem:[#allocation258_spill] sm:$0xff] }
 0x40d   :  { %2547 = vrot.lane.b32.xlu1 %v10765_v11, %s4644_s26  ;;  %4505 = vmatprep.mubr.msk.f32.mxu1 %vm189_vm0, %v3306_v15  ;;  %v8870_v9 = vpop.f32.mrf.mxu1  ;;  %v2676_v27 = vsel %vm189_vm0, %v10768_v4, %v1254_v46  ;;  %v3310_v46 = vmul.f32 %v3182_v1, %v10682_v57  ;;  %v10777_v1 = vld [vmem:[#allocation216_spill] sm:$0xff] }
 0x40e   :  { %1525 = vrot.lane.b32.xlu0 %v10754_v18, %s4642_s17 }
 0x40f   :  { %v2532_v41 = vpop.permute.xlu1 %2531  ;;  %v3622_v26 = vpop.f32.mrf.mxu1 }
 0x410   :  { %v1510_v30 = vpop.permute.xlu0 %1509  ;;  %v3065_v42 = vsel %vm3016_vm8, %v3000_v58, %v2532_v41 }
 0x411   :  { %v3305_v2 = vmul.f32 %v3177_v55, %v3065_v42  ;;  %1271 = vrot.lane.b32.xlu1 %v10740_v43, %s4640_s28  ;;  %v2741_v39 = vsel %vm2691_vm3, %v2676_v27, %v1510_v30  ;;  %v3181_v42 = vld [vmem:[%s9689_s2 + $0x320] sm:$0xff] }
 0x412   :  { %1781 = vrot.lane.b32.xlu0 %v10756_v60, %s4643_s18 }
 0x413   :  { %v1256_v17 = vpop.permute.xlu1 %1255  ;;  %3859 = vmatmul.mubr.f32.gmra.mxu1 %v3305_v2  ;;  %v8877_v44 = vpop.f32.mrf.mxu1  ;;  %v3184_v2 = vld [vmem:[%s9689_s2 + $0x338] sm:$0xff] }
 0x414   :  { %v1766_v50 = vpop.permute.xlu0 %1765  ;;  %4506 = vmatprep.mubr.msk.f32.mxu1 %vm189_vm0, %v3308_v20  ;;  %v2677_v15 = vsel %vm189_vm0, %v10772_v6, %v1256_v17 }
 0x415   :  { %1527 = vrot.lane.b32.xlu1 %v10759_v37, %s4642_s17  ;;  %v3627_v43 = vpop.f32.mrf.mxu1  ;;  %v2806_v29 = vsel %vm2756_vm4, %v2741_v39, %v1766_v50 }
 0x416   :  { %1973 = vrot.lane.b32.xlu0 %v10760_v8, %s4639_s23 }
 0x417   :  { %v1512_v24 = vpop.permute.xlu1 %1511  ;;  %v8884_v52 = vpop.f32.mrf.mxu1 }
 0x418   :  { %v1958_v19 = vpop.permute.xlu0 %1957  ;;  %v2742_v38 = vsel %vm2691_vm3, %v2677_v15, %v1512_v24 }
 0x419   :  { %1783 = vrot.lane.b32.xlu1 %v10762_v23, %s4643_s18  ;;  %v3632_v48 = vpop.f32.mrf.mxu1  ;;  %v2871_v54 = vsel %vm2821_vm5, %v2806_v29, %v1958_v19  ;;  %v3312_v19 = vmul.f32 %v3184_v2, %v10721_v53  ;;  %v10774_v53 = vld [vmem:[#allocation259_spill] sm:$0xff] }
 0x41a   :  { %2165 = vrot.lane.b32.xlu0 %v10766_v3, %s4641_s13 }
 0x41b   :  { %v1768_v49 = vpop.permute.xlu1 %1767  ;;  %v8890_v36 = vpop.f32.mrf.mxu1 }
 0x41c   :  { %v2150_v40 = vpop.permute.xlu0 %2149  ;;  %v2807_v12 = vsel %vm2756_vm4, %v2742_v38, %v1768_v49 }
 0x41d   :  { %1975 = vrot.lane.b32.xlu1 %v10765_v11, %s4639_s23  ;;  %v3637_v25 = vpop.f32.mrf.mxu1  ;;  %v2936_v14 = vsel %vm2886_vm6, %v2871_v54, %v2150_v40 }
 0x41e   :  { %2357 = vrot.lane.b32.xlu0 %v10767_v5, %s4645_s22 }
 0x41f   :  { %v1960_v0 = vpop.permute.xlu1 %1959  ;;  %v8900_v62 = vpop.f32.mrf.mxu1 }
 0x420   :  { %v2342_v56 = vpop.permute.xlu0 %2341  ;;  %v2872_v41 = vsel %vm2821_vm5, %v2807_v12, %v1960_v0 }
 0x421   :  { %2167 = vrot.lane.b32.xlu1 %v10769_v35, %s4641_s13  ;;  %v3642_v51 = vpop.f32.mrf.mxu1  ;;  %v3001_v32 = vsel %vm2951_vm7, %v2936_v14, %v2342_v56  ;;  %v10775_v14 = vld [vmem:[#allocation256_spill] sm:$0xff] }
 0x422   :  { %2549 = vrot.lane.b32.xlu0 %v10770_v16, %s4644_s26  ;;  %v1023_v51 = vrot.slane %v10775_v14, 1 }
 0x423   :  { %v2152_v45 = vpop.permute.xlu1 %2151  ;;  %v8916_v10 = vpop.f32.mrf.mxu1 }
 0x424   :  { %v2534_v7 = vpop.permute.xlu0 %2533  ;;  %v2937_v57 = vsel %vm2886_vm6, %v2872_v41, %v2152_v45  ;;  %v3183_v41 = vld [vmem:[%s9689_s2 + $0x330] sm:$0xff] }
 0x425   :  { %v3066_v33 = vsel %vm3016_vm8, %v3001_v32, %v2534_v7  ;;  %2359 = vrot.lane.b32.xlu1 %v10771_v47, %s4645_s22  ;;  %v3647_v28 = vpop.f32.mrf.mxu1 }
 0x426   :  { %v3307_v34 = vmul.f32 %v3179_v61, %v3066_v33  ;;  %1273 = vrot.lane.b32.xlu0 %v10760_v8, %s4640_s28  ;;  %v10773_v8 = vld [vmem:[#allocation252_spill] sm:$0xff] }
 0x427   :  { %v2344_v21 = vpop.permute.xlu1 %2343  ;;  %v8927_v58 = vpop.f32.mrf.mxu1  ;;  %v10776_v61 = vld [vmem:[#allocation260_spill] sm:$0xff]  ;;  %v10778_v15 = vrot.slane %v10773_v8, 1 }
 0x428   :  { %v1258_v55 = vpop.permute.xlu0 %1257  ;;  %3864 = vmatmul.mubr.f32.gmra.mxu1 %v3307_v34  ;;  %v3002_v20 = vsel %vm2951_vm7, %v2937_v57, %v2344_v21  ;;  %v3186_v57 = vld [vmem:[%s9689_s2 + $0x348] sm:$0xff] }
 0x429   :  { %4507 = vmatprep.mubr.msk.f32.mxu1 %vm189_vm0, %v3310_v46  ;;  %2551 = vrot.lane.b32.xlu1 %v10773_v8, %s4644_s26  ;;  %v3652_v30 = vpop.f32.mrf.mxu1  ;;  %v2678_v32 = vsel %vm189_vm0, %v10777_v1, %v1258_v55  ;;  %v8983_v38 = vsel %vm1026_vm1, %v10778_v15, %v1023_v51 }
 0x42a   :  { %1529 = vrot.lane.b32.xlu0 %v10766_v3, %s4642_s17 }
 0x42b   :  { %v2536_v26 = vpop.permute.xlu1 %2535  ;;  %v8944_v43 = vpop.f32.mrf.mxu1 }
 0x42c   :  { %v1514_v17 = vpop.permute.xlu0 %1513  ;;  %v3067_v50 = vsel %vm3016_vm8, %v3002_v20, %v2536_v26 }
 0x42d   :  { %v3309_v24 = vmul.f32 %v3181_v42, %v3067_v50  ;;  %1275 = vrot.lane.b32.xlu1 %v10765_v11, %s4640_s28  ;;  %v3657_v48 = vpop.f32.mrf.mxu1  ;;  %v2743_v7 = vsel %vm2691_vm3, %v2678_v32, %v1514_v17  ;;  %v10780_v50 = vld [vmem:[#allocation183_spill] sm:$0xff] }
 0x42e   :  { %1785 = vrot.lane.b32.xlu0 %v10767_v5, %s4643_s18 }
 0x42f   :  { %v1260_v49 = vpop.permute.xlu1 %1259  ;;  %3869 = vmatmul.mubr.f32.gmra.mxu1 %v3309_v24  ;;  %v8951_v4 = vpop.f32.mrf.mxu1  ;;  %v3314_v24 = vmul.f32 %v3186_v57, %v10727_v59 }
 0x430   :  { %v1770_v40 = vpop.permute.xlu0 %1769  ;;  %4508 = vmatprep.mubr.msk.f32.mxu1 %vm189_vm0, %v3312_v19  ;;  %v10781_v19 = vld [vmem:[#allocation219_spill] sm:$0xff] }
 0x431   :  { %1531 = vrot.lane.b32.xlu1 %v10769_v35, %s4642_s17  ;;  %v3662_v11 = vpop.f32.mrf.mxu1  ;;  %v2808_v46 = vsel %vm2756_vm4, %v2743_v7, %v1770_v40  ;;  %v2679_v48 = vsel %vm189_vm0, %v10781_v19, %v1260_v49 }
 0x432   :  { %1977 = vrot.lane.b32.xlu0 %v10770_v16, %s4639_s23 }
 0x433   :  { %v1516_v27 = vpop.permute.xlu1 %1515  ;;  %v8958_v39 = vpop.f32.mrf.mxu1 }
 0x434   :  { %v1962_v25 = vpop.permute.xlu0 %1961  ;;  %v2744_v11 = vsel %vm2691_vm3, %v2679_v48, %v1516_v27  ;;  %v3185_v27 = vld [vmem:[%s9689_s2 + $0x340] sm:$0xff] }
 0x435   :  { %1787 = vrot.lane.b32.xlu1 %v10771_v47, %s4643_s18  ;;  %v3667_v0 = vpop.f32.mrf.mxu1  ;;  %v2873_v21 = vsel %vm2821_vm5, %v2808_v46, %v1962_v25 }
 0x436   :  { %2169 = vrot.lane.b32.xlu0 %v10774_v53, %s4641_s13 }
 0x437   :  { %v1772_v56 = vpop.permute.xlu1 %1771  ;;  %v8964_v54 = vpop.f32.mrf.mxu1 }
 0x438   :  { %v2154_v29 = vpop.permute.xlu0 %2153 }
 0x439   :  { %1979 = vrot.lane.b32.xlu1 %v10773_v8, %s4639_s23  ;;  %v3672_v45 = vpop.f32.mrf.mxu1  ;;  %v2938_v55 = vsel %vm2886_vm6, %v2873_v21, %v2154_v29  ;;  %v2809_v29 = vsel %vm2756_vm4, %v2744_v11, %v1772_v56  ;;  %v3188_v56 = vld [vmem:[%s9689_s2 + $0x358] sm:$0xff] }
 0x43a   :  { %2361 = vrot.lane.b32.xlu0 %v10776_v61, %s4645_s22  ;;  %v3316_v21 = vmul.f32 %v3188_v56, %v10754_v18  ;;  %v10785_v11 = vld [vmem:[#allocation224_spill] sm:$0xff]  ;;  %v10786_v56 = vld [vmem:[#allocation319_spill] sm:$0xff] }
 0x43b   :  { %v1964_v33 = vpop.permute.xlu1 %1963  ;;  %v8975_v6 = vpop.f32.mrf.mxu1 }
 0x43c   :  { %v2346_v34 = vpop.permute.xlu0 %2345  ;;  %v2874_v32 = vsel %vm2821_vm5, %v2809_v29, %v1964_v33 }
 0x43d   :  { %2171 = vrot.lane.b32.xlu1 %v8983_v38, %s4641_s13  ;;  %v3677_v12 = vpop.f32.mrf.mxu1  ;;  %v3003_v30 = vsel %vm2951_vm7, %v2938_v55, %v2346_v34 }
 0x43e   :  { %2553 = vrot.lane.b32.xlu0 %v10775_v14, %s4644_s26 }
 0x43f   :  { %v2156_v42 = vpop.permute.xlu1 %2155  ;;  %v8999_v26 = vpop.f32.mrf.mxu1 }
 0x440   :  { %v2538_v2 = vpop.permute.xlu0 %2537  ;;  %v2939_v59 = vsel %vm2886_vm6, %v2874_v32, %v2156_v42 }
 0x441   :  { %v3068_v20 = vsel %vm3016_vm8, %v3003_v30, %v2538_v2  ;;  %2363 = vrot.lane.b32.xlu1 %v10780_v50, %s4645_s22  ;;  %v3682_v40 = vpop.f32.mrf.mxu1 }
 0x442   :  { %v3311_v17 = vmul.f32 %v3183_v41, %v3068_v20  ;;  %1277 = vrot.lane.b32.xlu0 %v10770_v16, %s4640_s28  ;;  %v10782_v16 = vld [vmem:[#allocation310_spill] sm:$0xff]  ;;  %v10784_v40 = vld [vmem:[#allocation52_spill] sm:$0xff] }
 0x443   :  { %v2348_v25 = vpop.permute.xlu1 %2347  ;;  %v9010_v1 = vpop.f32.mrf.mxu1  ;;  %v10783_v18 = vrot.slane %v10782_v16, 1 }
 0x444   :  { %v1262_v0 = vpop.permute.xlu0 %1261  ;;  %3874 = vmatmul.mubr.f32.gmra.mxu1 %v3311_v17  ;;  %v3004_v45 = vsel %vm2951_vm7, %v2939_v59, %v2348_v25 }
 0x445   :  { %4509 = vmatprep.mubr.msk.f32.mxu1 %vm189_vm0, %v3314_v24  ;;  %2555 = vrot.lane.b32.xlu1 %v10782_v16, %s4644_s26  ;;  %v3687_v49 = vpop.f32.mrf.mxu1  ;;  %v9049_v20 = vsel %vm1026_vm1, %v1023_v51, %v10783_v18  ;;  %v2680_v51 = vsel %vm189_vm0, %v10785_v11, %v1262_v0 }
 0x446   :  { %1533 = vrot.lane.b32.xlu0 %v10774_v53, %s4642_s17 }
 0x447   :  { %v2540_v7 = vpop.permute.xlu1 %2539  ;;  %v9027_v46 = vpop.f32.mrf.mxu1 }
 0x448   :  { %v1518_v33 = vpop.permute.xlu0 %1517  ;;  %v3069_v34 = vsel %vm3016_vm8, %v3004_v45, %v2540_v7  ;;  %v3187_v7 = vld [vmem:[%s9689_s2 + $0x350] sm:$0xff] }
 0x449   :  { %v3313_v15 = vmul.f32 %v3185_v27, %v3069_v34  ;;  %1279 = vrot.lane.b32.xlu1 %v10773_v8, %s4640_s28  ;;  %v3692_v55 = vpop.f32.mrf.mxu1 }
 0x44a   :  { %1789 = vrot.lane.b32.xlu0 %v10776_v61, %s4643_s18  ;;  %v3952_v61 = vld [vmem:[%s9688_s1 + $0x68] sm:$0xff] }
 0x44b   :  { %v1264_v12 = vpop.permute.xlu1 %1263  ;;  %3879 = vmatmul.mubr.f32.gmra.mxu1 %v3313_v15  ;;  %v9034_v57 = vpop.f32.mrf.mxu1 }
 0x44c   :  { %v1774_v41 = vpop.permute.xlu0 %1773  ;;  %4510 = vmatprep.mubr.msk.f32.mxu1 %vm189_vm0, %v3316_v21 }
 0x44d   :  { %1535 = vrot.lane.b32.xlu1 %v8983_v38, %s4642_s17  ;;  %v3697_v8 = vpop.f32.mrf.mxu1 }
 0x44e   :  { %1981 = vrot.lane.b32.xlu0 %v10775_v14, %s4639_s23 }
 0x44f   :  { %v1520_v30 = vpop.permute.xlu1 %1519  ;;  %v9041_v2 = vpop.f32.mrf.mxu1 }
 0x450   :  { %v1966_v42 = vpop.permute.xlu0 %1965 }
 0x451   :  { %1791 = vrot.lane.b32.xlu1 %v10780_v50, %s4643_s18  ;;  %v3702_v17 = vpop.f32.mrf.mxu1  ;;  %v2745_v50 = vsel %vm2691_vm3, %v2680_v51, %v1518_v33  ;;  %v3190_v33 = vld [vmem:[%s9689_s2 + $0x368] sm:$0xff] }
 0x452   :  { %2173 = vrot.lane.b32.xlu0 %v9049_v20, %s4641_s13  ;;  %v2810_v59 = vsel %vm2756_vm4, %v2745_v50, %v1774_v41  ;;  %v3318_v18 = vmul.f32 %v3190_v33, %v10759_v37  ;;  %v10789_v17 = vld [vmem:[#allocation228_spill] sm:$0xff] }
 0x453   :  { %v1776_v24 = vpop.permute.xlu1 %1775  ;;  %v9055_v48 = vpop.f32.mrf.mxu1  ;;  %v2875_v27 = vsel %vm2821_vm5, %v2810_v59, %v1966_v42  ;;  %v10788_v42 = vld [vmem:[#allocation318_spill] sm:$0xff] }
 0x454   :  { %v2158_v19 = vpop.permute.xlu0 %2157 }
 0x455   :  { %1983 = vrot.lane.b32.xlu1 %v10782_v16, %s4639_s23  ;;  %v3707_v25 = vpop.f32.mrf.mxu1  ;;  %v10787_v16 = vld [vmem:[#allocation313_spill] sm:$0xff]  ;;  %v2940_v45 = vsel %vm2886_vm6, %v2875_v27, %v2158_v19  ;;  %v2681_v19 = vsel %vm189_vm0, %v10789_v17, %v1264_v12  ;;  %v10792_v17 = vld [vmem:[#allocation7_spill] sm:$0xff] }
 0x456   :  { %2365 = vrot.lane.b32.xlu0 %v10784_v40, %s4645_s22  ;;  %v2746_v51 = vsel %vm2691_vm3, %v2681_v19, %v1520_v30  ;;  %v3189_v30 = vld [vmem:[%s9689_s2 + $0x360] sm:$0xff] }
 0x457   :  { %v1968_v29 = vpop.permute.xlu1 %1967  ;;  %v9065_v49 = vpop.f32.mrf.mxu1 }
 0x458   :  { %v2350_v32 = vpop.permute.xlu0 %2349 }
 0x459   :  { %2175 = vrot.lane.b32.xlu1 %v10786_v56, %s4641_s13  ;;  %v3712_v0 = vpop.f32.mrf.mxu1  ;;  %v3005_v34 = vsel %vm2951_vm7, %v2940_v45, %v2350_v32  ;;  %v2811_v32 = vsel %vm2756_vm4, %v2746_v51, %v1776_v24  ;;  %v3192_v24 = vld [vmem:[%s9689_s2 + $0x378] sm:$0xff] }
 0x45a   :  { %2557 = vrot.lane.b32.xlu0 %v10787_v16, %s4644_s26  ;;  %v2876_v27 = vsel %vm2821_vm5, %v2811_v32, %v1968_v29 }
 0x45b   :  { %v2160_v15 = vpop.permute.xlu1 %2159  ;;  %v9081_v41 = vpop.f32.mrf.mxu1 }
 0x45c   :  { %v2542_v21 = vpop.permute.xlu0 %2541  ;;  %v2941_v37 = vsel %vm2886_vm6, %v2876_v27, %v2160_v15  ;;  %v10791_v15 = vld [vmem:[#allocation320_spill] sm:$0xff] }
 0x45d   :  { %v3070_v55 = vsel %vm3016_vm8, %v3005_v34, %v2542_v21  ;;  %2367 = vrot.lane.b32.xlu1 %v10788_v42, %s4645_s22  ;;  %v3717_v11 = vpop.f32.mrf.mxu1  ;;  %v3320_v21 = vmul.f32 %v3192_v24, %v10766_v3  ;;  %v10793_v3 = vld [vmem:[#allocation9_spill] sm:$0xff] }
 0x45e   :  { %v3315_v8 = vmul.f32 %v3187_v7, %v3070_v55  ;;  %1281 = vrot.lane.b32.xlu0 %v10775_v14, %s4640_s28  ;;  %v10790_v14 = vld [vmem:[#allocation5_spill] sm:$0xff] }
 0x45f   :  { %v2352_v25 = vpop.permute.xlu1 %2351  ;;  %v9092_v59 = vpop.f32.mrf.mxu1 }
 0x460   :  { %v1266_v50 = vpop.permute.xlu0 %1265  ;;  %3884 = vmatmul.mubr.f32.gmra.mxu1 %v3315_v8  ;;  %v3006_v45 = vsel %vm2951_vm7, %v2941_v37, %v2352_v25 }
 0x461   :  { %4511 = vmatprep.mubr.msk.f32.mxu1 %vm189_vm0, %v3318_v18  ;;  %2559 = vrot.lane.b32.xlu1 %v10790_v14, %s4644_s26  ;;  %v3722_v12 = vpop.f32.mrf.mxu1  ;;  %v2682_v37 = vsel %vm189_vm0, %v10670_v31, %v1266_v50  ;;  %v3194_v31 = vld [vmem:[%s9689_s2 + $0x388] sm:$0xff] }
 0x462   :  { %1537 = vrot.lane.b32.xlu0 %v9049_v20, %s4642_s17 }
 0x463   :  { %v2544_v29 = vpop.permute.xlu1 %2543  ;;  %v9109_v33 = vpop.f32.mrf.mxu1 }
 0x464   :  { %v1522_v0 = vpop.permute.xlu0 %1521  ;;  %v3071_v7 = vsel %vm3016_vm8, %v3006_v45, %v2544_v29 }
 0x465   :  { %v3317_v34 = vmul.f32 %v3189_v30, %v3071_v7  ;;  %2177 = vrot.lane.b32.xlu1 %v10791_v15, %s4641_s13  ;;  %v3727_v55 = vpop.f32.mrf.mxu1  ;;  %v2747_v30 = vsel %vm2691_vm3, %v2682_v37, %v1522_v0 }
 0x466   :  { %1793 = vrot.lane.b32.xlu0 %v10784_v40, %s4643_s18  ;;  %v3191_v55 = vld [vmem:[%s9689_s2 + $0x370] sm:$0xff] }
 0x467   :  { %v1268_v8 = vpop.permute.xlu1 %1267  ;;  %3889 = vmatmul.mubr.f32.gmra.mxu1 %v3317_v34  ;;  %v9116_v18 = vpop.f32.mrf.mxu1 }
 0x468   :  { %v1778_v42 = vpop.permute.xlu0 %1777  ;;  %4512 = vmatprep.mubr.msk.f32.mxu1 %vm189_vm0, %v3320_v21 }
 0x469   :  { %2561 = vrot.lane.b32.xlu1 %v10792_v17, %s4644_s26  ;;  %v3732_v19 = vpop.f32.mrf.mxu1  ;;  %v2812_v45 = vsel %vm2756_vm4, %v2747_v30, %v1778_v42 }
 0x46a   :  { %1985 = vrot.lane.b32.xlu0 %v10787_v16, %s4639_s23 }
 0x46b   :  { %v1524_v11 = vpop.permute.xlu1 %1523  ;;  %v9123_v40 = vpop.f32.mrf.mxu1 }
 0x46c   :  { %v1970_v51 = vpop.permute.xlu0 %1969 }
 0x46d   :  { %v3737_v25 = vpop.f32.mrf.mxu1  ;;  %v2877_v7 = vsel %vm2821_vm5, %v2812_v45, %v1970_v51 }
 0x46e   :  { %2369 = vrot.lane.b32.xlu0 %v10793_v3, %s4645_s22  ;;  %v3322_v3 = vmul.f32 %v3194_v31, %v10769_v35  ;;  %v2683_v25 = vsel %vm189_vm0, %v10694_v22, %v1268_v8  ;;  %v3193_v22 = vld [vmem:[%s9689_s2 + $0x380] sm:$0xff]  ;;  %v3196_v35 = vld [vmem:[%s9689_s2 + $0x398] sm:$0xff] }
 0x46f   :  { %v1780_v32 = vpop.permute.xlu1 %1779  ;;  %v9127_v14 = vpop.f32.mrf.mxu1  ;;  %v2748_v37 = vsel %vm2691_vm3, %v2683_v25, %v1524_v11 }
 0x470   :  { %v2162_v27 = vpop.permute.xlu0 %2161 }
 0x471   :  { %v3742_v12 = vpop.f32.mrf.mxu1  ;;  %v2942_v34 = vsel %vm2886_vm6, %v2877_v7, %v2162_v27 }
 0x473   :  { %v1972_v16 = vpop.permute.xlu1 %1971  ;;  %v9133_v29 = vpop.f32.mrf.mxu1 }
 0x474   :  { %v2354_v24 = vpop.permute.xlu0 %2353 }
 0x475   :  { %v3747_v21 = vpop.f32.mrf.mxu1  ;;  %v3007_v50 = vsel %vm2951_vm7, %v2942_v34, %v2354_v24  ;;  %v2813_v24 = vsel %vm2756_vm4, %v2748_v37, %v1780_v32 }
 0x476   :  { %v2878_v7 = vsel %vm2821_vm5, %v2813_v24, %v1972_v16  ;;  %v3324_v16 = vmul.f32 %v3196_v35, %v10774_v53 }
 0x477   :  { %v2164_v0 = vpop.permute.xlu1 %2163  ;;  %v9145_v19 = vpop.f32.mrf.mxu1 }
 0x478   :  { %v2546_v17 = vpop.permute.xlu0 %2545  ;;  %v2943_v34 = vsel %vm2886_vm6, %v2878_v7, %v2164_v0  ;;  %v3954_v7 = vld [vmem:[%s9688_s1 + $0x78] sm:$0xff] }
 0x479   :  { %v3072_v42 = vsel %vm3016_vm8, %v3007_v50, %v2546_v17  ;;  %v3752_v27 = vpop.f32.mrf.mxu1 }
 0x47a   :  { %v3319_v51 = vmul.f32 %v3191_v55, %v3072_v42 }
 0x47b   :  { %v2356_v12 = vpop.permute.xlu1 %2355  ;;  %v3755_v45 = vpop.f32.mrf.mxu1 }
 0x47c   :  { %v1270_v30 = vpop.permute.xlu0 %1269  ;;  %3894 = vmatmul.mubr.f32.gmra.mxu1 %v3319_v51  ;;  %v3008_v8 = vsel %vm2951_vm7, %v2943_v34, %v2356_v12  ;;  %v9172_v12 = vld [vmem:[%s9694_s7] ss:$0 sm:$0xff] }
 0x47d   :  { %4513 = vmatprep.mubr.msk.f32.mxu1 %vm189_vm0, %v3322_v3  ;;  %v3757_v21 = vpop.f32.mrf.mxu1  ;;  %v3696_v53 = vadd.f32 %v9172_v12, %v9034_v57  ;;  %v3691_v35 = vadd.f32 %v9172_v12, %v9027_v46  ;;  %v3970_v57 = vld [vmem:[%s9688_s1 + $0xf8] sm:$0xff] }
 0x47f   :  { %v2548_v11 = vpop.permute.xlu1 %2547  ;;  %v3760_v31 = vpop.f32.mrf.mxu1 }
 0x480   :  { %v1526_v32 = vpop.permute.xlu0 %1525  ;;  %v3073_v55 = vsel %vm3016_vm8, %v3008_v8, %v2548_v11  ;;  %v3969_v8 = vld [vmem:[%s9688_s1 + $0xf0] sm:$0xff] }
 0x481   :  { %v3321_v50 = vmul.f32 %v3193_v22, %v3073_v55  ;;  %v3762_v0 = vpop.f32.mrf.mxu1  ;;  %v3198_v55 = vld [vmem:[%s9689_s2 + $0x3a8] sm:$0xff] }
 0x482   :  { %v3686_v0 = vadd.f32 %v9172_v12, %v9010_v1 }
 0x483   :  { %v9164_v17 = vpop.permute.xlu1 %1271  ;;  %3899 = vmatmul.mubr.f32.gmra.mxu1 %v3321_v50  ;;  %v3765_v51 = vpop.f32.mrf.mxu1  ;;  %v3953_v50 = vld [vmem:[%s9688_s1 + $0x70] sm:$0xff] }
 0x484   :  { %v1782_v42 = vpop.permute.xlu0 %1781  ;;  %4514 = vmatprep.mubr.msk.f32.mxu1 %vm189_vm0, %v3324_v16  ;;  %v3766_v16 = vadd.f32 %v9172_v12, %v3765_v51 }
 0x485   :  { %v3767_v3 = vpop.f32.mrf.mxu1 }
 0x486   :  { %v4018_v3 = vadd.f32 %v3954_v7, %v3696_v53  ;;  %v4017_v7 = vadd.f32 %v3953_v50, %v3691_v35  ;;  %v4016_v35 = vadd.f32 %v3952_v61, %v3686_v0 }
 0x487   :  { %v9167_v25 = vpop.permute.xlu1 %1527  ;;  %v3770_v37 = vpop.f32.mrf.mxu1 }
 0x488   :  { %v1974_v27 = vpop.permute.xlu0 %1973  ;;  %v3771_v34 = vadd.f32 %v9172_v12, %v3770_v37  ;;  %v2684_v37 = vsel %vm189_vm0, %v10724_v63, %v1270_v30  ;;  %v3326_v63 = vmul.f32 %v3198_v55, %v8983_v38  ;;  %v3681_v30 = vadd.f32 %v9172_v12, %v8999_v26 }
 0x489   :  { %v3772_v24 = vpop.f32.mrf.mxu1  ;;  %v2749_v51 = vsel %vm2691_vm3, %v2684_v37, %v1526_v32  ;;  %v3676_v26 = vadd.f32 %v9172_v12, %v8975_v6  ;;  %v4082_v55 = vmax.f32 %v4018_v3, 0.0  ;;  %v3751_v6 = vadd.f32 %v9172_v12, %v9145_v19 }
 0x48a   :  { %v3968_v24 = vld [vmem:[%s9688_s1 + $0xe8] sm:$0xff]  ;;  %v4033_v47 = vadd.f32 %v3969_v8, %v3771_v34  ;;  %v2814_v15 = vsel %vm2756_vm4, %v2749_v51, %v1782_v42  ;;  %v3756_v34 = vadd.f32 %v9172_v12, %v3755_v45  ;;  %v3966_v42 = vld [vmem:[%s9688_s1 + $0xd8] sm:$0xff]  ;;  %v3195_v45 = vld [vmem:[%s9689_s2 + $0x390] sm:$0xff]  ;;  %v4081_v37 = vmax.f32 %v4017_v7, 0.0 }
 0x48b   :  { %v9180_v21 = vpop.permute.xlu1 %1783  ;;  %v3775_v11 = vpop.f32.mrf.mxu1  ;;  %v4032_v8 = vadd.f32 %v3968_v24, %v3766_v16  ;;  %v2879_v38 = vsel %vm2821_vm5, %v2814_v15, %v1974_v27  ;;  %v3965_v24 = vld [vmem:[%s9688_s1 + $0xd0] sm:$0xff]  ;;  %v3746_v19 = vadd.f32 %v9172_v12, %v9133_v29  ;;  %v3948_v29 = vld [vmem:[%s9688_s1 + $0x48] sm:$0xff] }
 0x48c   :  { %v2166_v22 = vpop.permute.xlu0 %2165  ;;  %v3776_v46 = vadd.f32 %v9172_v12, %v3775_v11  ;;  %v3761_v11 = vadd.f32 %v9172_v12, %v3760_v31  ;;  %v3951_v31 = vld [vmem:[%s9688_s1 + $0x60] sm:$0xff]  ;;  %v4097_v15 = vmax.f32 %v4033_v47, 0.0  ;;  %v3949_v47 = vld [vmem:[%s9688_s1 + $0x50] sm:$0xff] }
 0x48d   :  { %v3777_v28 = vpop.f32.mrf.mxu1  ;;  %v2944_v50 = vsel %vm2886_vm6, %v2879_v38, %v2166_v22  ;;  %v3671_v22 = vadd.f32 %v9172_v12, %v8964_v54  ;;  %v4015_v3 = vadd.f32 %v3951_v31, %v3681_v30  ;;  %v4096_v54 = vmax.f32 %v4032_v8, 0.0  ;;  %v3964_v31 = vld [vmem:[%s9688_s1 + $0xc8] sm:$0xff] }
 0x48e   :  { %v4034_v5 = vadd.f32 %v3970_v57, %v3776_v46  ;;  %v3967_v28 = vld [vmem:[%s9688_s1 + $0xe0] sm:$0xff]  ;;  %v3666_v30 = vadd.f32 %v9172_v12, %v8958_v39  ;;  %v4029_v39 = vadd.f32 %v3965_v24, %v3751_v6 }
 0x48f   :  { %v9210_v1 = vpop.permute.xlu1 %1975  ;;  %v9219_v32 = vpop.f32.mrf.mxu1  ;;  %v4031_v61 = vadd.f32 %v3967_v28, %v3761_v11  ;;  %v4030_v11 = vadd.f32 %v3966_v42, %v3756_v34  ;;  %v4080_v28 = vmax.f32 %v4016_v35, 0.0  ;;  %v3741_v34 = vadd.f32 %v9172_v12, %v9127_v14 }
 0x490   :  { %v2358_v53 = vpop.permute.xlu0 %2357  ;;  %v4098_v57 = vmax.f32 %v4034_v5, 0.0  ;;  %v3950_v5 = vld [vmem:[%s9688_s1 + $0x58] sm:$0xff]  ;;  %v4093_v24 = vmax.f32 %v4029_v39, 0.0 }
 0x491   :  { %v3782_v46 = vpop.f32.mrf.mxu1  ;;  %v3009_v27 = vsel %vm2951_vm7, %v2944_v50, %v2358_v53  ;;  %v4014_v7 = vadd.f32 %v3950_v5, %v3676_v26  ;;  %v4095_v8 = vmax.f32 %v4031_v61, 0.0  ;;  %v4079_v50 = vmax.f32 %v4015_v3, 0.0 }
 0x492   :  { %4523 = vmatprep.subr.mxu0 %v4098_v57  ;;  %v2685_v57 = vsel %vm189_vm0, %v10733_v13, %v9164_v17  ;;  %v3661_v13 = vadd.f32 %v9172_v12, %v8951_v4  ;;  %v4013_v17 = vadd.f32 %v3949_v47, %v3671_v22  ;;  %v3963_v46 = vld [vmem:[%s9688_s1 + $0xc0] sm:$0xff]  ;;  %v3736_v4 = vadd.f32 %v9172_v12, %v9123_v40 }
 0x493   :  { %v2168_v16 = vpop.permute.xlu1 %2167  ;;  %v9247_v38 = vpop.f32.mrf.mxu1  ;;  %4524 = vmatpush3.msra.mxu0 %v4082_v55  ;;  %v2750_v26 = vsel %vm2691_vm3, %v2685_v57, %v9167_v25  ;;  %v3947_v25 = vld [vmem:[%s9688_s1 + $0x40] sm:$0xff]  ;;  %v4028_v5 = vadd.f32 %v3964_v31, %v3746_v19  ;;  %v4094_v6 = vmax.f32 %v4030_v11, 0.0  ;;  %v3731_v3 = vadd.f32 %v9172_v12, %v9116_v18 }
 0x494   :  { %v2550_v0 = vpop.permute.xlu0 %2549  ;;  %4525 = vmatprep.subr.mxu0 %v4097_v15  ;;  %v2815_v14 = vsel %vm2756_vm4, %v2750_v26, %v9180_v21  ;;  %v3656_v21 = vadd.f32 %v9172_v12, %v8944_v43  ;;  %v4012_v15 = vadd.f32 %v3948_v29, %v3666_v30  ;;  %v3197_v40 = vld [vmem:[%s9689_s2 + $0x3a0] sm:$0xff]  ;;  %v3200_v43 = vld [vmem:[%s9689_s2 + $0x3b8] sm:$0xff]  ;;  %v3651_v19 = vadd.f32 %v9172_v12, %v8927_v58 }
 0x495   :  { %v3074_v51 = vsel %vm3016_vm8, %v3009_v27, %v2550_v0  ;;  %v3787_v55 = vpop.f32.mrf.mxu1  ;;  %4526 = vmatpush3.msra.mxu0 %v4081_v37  ;;  %v2880_v61 = vsel %vm2821_vm5, %v2815_v14, %v9210_v1  ;;  %v4078_v27 = vmax.f32 %v4014_v7, 0.0  ;;  %v3946_v1 = vld [vmem:[%s9688_s1 + $0x38] sm:$0xff]  ;;  %v4027_v37 = vadd.f32 %v3963_v46, %v3741_v34  ;;  %v3945_v7 = vld [vmem:[%s9688_s1 + $0x30] sm:$0xff] }
 0x496   :  { %v3323_v53 = vmul.f32 %v3195_v45, %v3074_v51  ;;  %4527 = vmatprep.subr.mxu0 %v4096_v54  ;;  %v2945_v0 = vsel %vm2886_vm6, %v2880_v61, %v2168_v16  ;;  %v4011_v11 = vadd.f32 %v3947_v25, %v3661_v13  ;;  %v4077_v54 = vmax.f32 %v4013_v17, 0.0  ;;  %v3959_v25 = vld [vmem:[%s9688_s1 + $0xa0] sm:$0xff] }
 0x497   :  { %v2360_v35 = vpop.permute.xlu1 %2359  ;;  %v9278_v45 = vpop.f32.mrf.mxu1  ;;  %4528 = vmatpush3.msra.mxu0 %v4080_v28  ;;  %v3726_v28 = vadd.f32 %v9172_v12, %v9109_v33  ;;  %v4092_v58 = vmax.f32 %v4028_v5, 0.0  ;;  %v3646_v55 = vadd.f32 %v9172_v12, %v8916_v10  ;;  %v4010_v29 = vadd.f32 %v3946_v1, %v3656_v21  ;;  %v3944_v33 = vld [vmem:[%s9688_s1 + $0x28] sm:$0xff] }
 0x498   :  { %v9269_v42 = vpop.permute.xlu0 %1273  ;;  %3904 = vmatmul.mubr.f32.gmra.mxu1 %v3323_v53  ;;  %4529 = vmatprep.subr.mxu0 %v4095_v8  ;;  %v3010_v16 = vsel %vm2951_vm7, %v2945_v0, %v2360_v35  ;;  %v3961_v53 = vld [vmem:[%s9688_s1 + $0xb0] sm:$0xff]  ;;  %v4076_v34 = vmax.f32 %v4012_v15, 0.0  ;;  %v3328_v39 = vmul.f32 %v3200_v43, %v9049_v20  ;;  %v3960_v8 = vld [vmem:[%s9688_s1 + $0xa8] sm:$0xff]  ;;  %v3721_v35 = vadd.f32 %v9172_v12, %v9092_v59  ;;  %v3943_v59 = vld [vmem:[%s9688_s1 + $0x20] sm:$0xff] }
 0x499   :  { %4515 = vmatprep.mubr.msk.f32.mxu1 %vm189_vm0, %v3326_v63  ;;  %v3962_v63 = vld [vmem:[%s9688_s1 + $0xb8] sm:$0xff]  ;;  %v3792_v22 = vpop.f32.mrf.mxu1  ;;  %4530 = vmatpush3.msra.mxu0 %v4079_v50  ;;  %v4025_v13 = vadd.f32 %v3961_v53, %v3731_v3  ;;  %v4091_v17 = vmax.f32 %v4027_v37, 0.0  ;;  %v3641_v20 = vadd.f32 %v9172_v12, %v8900_v62  ;;  %v4009_v46 = vadd.f32 %v3945_v7, %v3651_v19 }
 0x49a   :  { %4531 = vmatprep.subr.mxu0 %v4094_v6  ;;  %v4026_v31 = vadd.f32 %v3962_v63, %v3736_v4  ;;  %v4075_v14 = vmax.f32 %v4011_v11, 0.0  ;;  %v3716_v5 = vadd.f32 %v9172_v12, %v9081_v41  ;;  %v4024_v6 = vadd.f32 %v3960_v8, %v3726_v28  ;;  %v3942_v0 = vld [vmem:[%s9688_s1 + $0x18] sm:$0xff]  ;;  %v3940_v28 = vld [vmem:[%s9688_s1 + $0x8] sm:$0xff] }
 0x49b   :  { %v2552_v51 = vpop.permute.xlu1 %2551  ;;  %4532 = vmatpush3.msra.mxu0 %v4078_v27  ;;  %v3636_v61 = vadd.f32 %v9172_v12, %v8890_v36  ;;  %v4008_v21 = vadd.f32 %v3944_v33, %v3646_v55  ;;  %v4074_v15 = vmax.f32 %v4010_v29, 0.0  ;;  %v3958_v27 = vld [vmem:[%s9688_s1 + $0x98] sm:$0xff]  ;;  %v3711_v41 = vadd.f32 %v9172_v12, %v9065_v49  ;;  %v3941_v49 = vld [vmem:[%s9688_s1 + $0x10] sm:$0xff] }
 0x49c   :  { %v9306_v47 = vpop.permute.xlu0 %1529  ;;  %v3075_v30 = vsel %vm3016_vm8, %v3010_v16, %v2552_v51  ;;  %v9314_v18 = vpop.f32.mrf.mxu1  ;;  %4533 = vmatprep.subr.mxu0 %v4093_v24  ;;  %v4090_v62 = vmax.f32 %v4026_v31, 0.0  ;;  %v4023_v22 = vadd.f32 %v3959_v25, %v3721_v35  ;;  %v3631_v43 = vadd.f32 %v9172_v12, %v8884_v52  ;;  %v3957_v24 = vld [vmem:[%s9688_s1 + $0x90] sm:$0xff] }
 0x49d   :  { %v3325_v57 = vmul.f32 %v3197_v40, %v3075_v30  ;;  %4534 = vmatpush3.msra.mxu0 %v4077_v54  ;;  %v4089_v40 = vmax.f32 %v4025_v13, 0.0  ;;  %v4007_v3 = vadd.f32 %v3943_v59, %v3641_v20  ;;  %v4073_v37 = vmax.f32 %v4009_v46, 0.0  ;;  %v3956_v30 = vld [vmem:[%s9688_s1 + $0x88] sm:$0xff] }
 0x49e   :  { %v3797_v26 = vpop.f32.mrf.mxu1  ;;  %4535 = vmatprep.subr.mxu0 %v4092_v58  ;;  %v3706_v51 = vadd.f32 %v9172_v12, %v9055_v48  ;;  %v4022_v19 = vadd.f32 %v3958_v27, %v3716_v5  ;;  %v4088_v11 = vmax.f32 %v4024_v6, 0.0  ;;  %v3626_v52 = vadd.f32 %v9172_v12, %v8877_v44 }
 0x49f   :  { %v9332_v10 = vpop.permute.xlu1 %1275  ;;  %3909 = vmatmul.mubr.f32.gmra.mxu1 %v3325_v57  ;;  %4536 = vmatpush3.msra.mxu0 %v4076_v34  ;;  %v4006_v54 = vadd.f32 %v3942_v0, %v3636_v61  ;;  %v4072_v53 = vmax.f32 %v4008_v21, 0.0  ;;  %v3701_v48 = vadd.f32 %v9172_v12, %v9041_v2  ;;  %v4021_v31 = vadd.f32 %v3957_v24, %v3711_v41  ;;  %v3939_v2 = vld [vmem:[%s9688_s1] sm:$0xff] }
 0x4a0   :  { %v9334_v50 = vpop.permute.xlu0 %1785  ;;  %v9341_v4 = vpop.f32.mrf.mxu1  ;;  %4516 = vmatprep.mubr.msk.f32.mxu1 %vm189_vm0, %v3328_v39  ;;  %4537 = vmatprep.subr.mxu0 %v4091_v17  ;;  %v4087_v58 = vmax.f32 %v4023_v22, 0.0  ;;  %v3621_v44 = vadd.f32 %v9172_v12, %v8870_v9  ;;  %v4005_v29 = vadd.f32 %v3941_v49, %v3631_v43  ;;  %v4071_v34 = vmax.f32 %v4007_v3, 0.0  ;;  %v3955_v39 = vld [vmem:[%s9688_s1 + $0x80] sm:$0xff] }
 0x4a1   :  { %4538 = vmatpush3.msra.mxu0 %v4075_v14  ;;  %v4020_v26 = vadd.f32 %v3956_v30, %v3706_v51  ;;  %v4086_v33 = vmax.f32 %v4022_v19, 0.0  ;;  %v4004_v35 = vadd.f32 %v3940_v28, %v3626_v52  ;;  %v4070_v13 = vmax.f32 %v4006_v54, 0.0  ;;  %v3204_v30 = vld [vmem:[%s9689_s2 + $0x3d8] sm:$0xff] }
 0x4a2   :  { %v3802_v63 = vpop.f32.mrf.mxu1  ;;  %4539 = vmatprep.subr.mxu0 %v4090_v62  ;;  %v2686_v9 = vsel %vm189_vm0, %v10756_v60, %v9269_v42  ;;  %v4019_v20 = vadd.f32 %v3955_v39, %v3701_v48  ;;  %v4085_v46 = vmax.f32 %v4021_v31, 0.0  ;;  %v4003_v5 = vadd.f32 %v3939_v2, %v3621_v44 }
 0x4a3   :  { %v9359_v1 = vpop.permute.xlu1 %1531  ;;  %4540 = vmatpush3.msra.mxu0 %v4074_v15  ;;  %v2751_v14 = vsel %vm2691_vm3, %v2686_v9, %v9306_v47  ;;  %v4069_v6 = vmax.f32 %v4005_v29, 0.0  ;;  %v4084_v21 = vmax.f32 %v4020_v26, 0.0  ;;  %v4068_v42 = vmax.f32 %v4004_v35, 0.0  ;;  %v3199_v47 = vld [vmem:[%s9689_s2 + $0x3b0] sm:$0xff] }
 0x4a4   :  { %v1978_v36 = vpop.permute.xlu0 %1977  ;;  %v9366_v16 = vpop.f32.mrf.mxu1  ;;  %4541 = vmatprep.subr.mxu0 %v4089_v40  ;;  %v2816_v62 = vsel %vm2756_vm4, %v2751_v14, %v9334_v50  ;;  %v3202_v50 = vld [vmem:[%s9689_s2 + $0x3c8] sm:$0xff]  ;;  %v4083_v63 = vmax.f32 %v4019_v20, 0.0  ;;  %v4067_v40 = vmax.f32 %v4003_v5, 0.0  ;;  %v2687_v24 = vsel %vm189_vm0, %v10762_v23, %v9332_v10 }
 0x4a5   :  { %4542 = vmatpush3.msra.mxu0 %v4073_v37  ;;  %v2881_v60 = vsel %vm2821_vm5, %v2816_v62, %v1978_v36  ;;  %v3330_v37 = vmul.f32 %v3202_v50, %v10786_v56  ;;  %v2752_v51 = vsel %vm2691_vm3, %v2687_v24, %v9359_v1  ;;  %v10794_v52 = vmov 0.0   ;;  %v3201_v1 = vld [vmem:[%s9689_s2 + $0x3c0] sm:$0xff]  ;;  %v10796_v14 = vld [vmem:[#allocation254_spill] sm:$0xff] }
 0x4a6   :  { %v3807_v7 = vpop.f32.mrf.mxu1  ;;  %4543 = vmatprep.subr.mxu0 %v4088_v11  ;;  %v3206_v50 = vld [vmem:[%s9689_s2 + $0x3e8] sm:$0xff] }
 0x4a7   :  { %v1788_v57 = vpop.permute.xlu1 %1787  ;;  %4544 = vmatpush3.msra.mxu0 %v4072_v53  ;;  %v10798_v24 = vld [vmem:[#allocation258_spill] sm:$0xff] }
 0x4a8   :  { %v2170_v55 = vpop.permute.xlu0 %2169  ;;  %v9388_v8 = vpop.f32.mrf.mxu1  ;;  %4545 = vmatprep.subr.mxu0 %v4087_v58  ;;  %v2817_v54 = vsel %vm2756_vm4, %v2752_v51, %v1788_v57 }
 0x4a9   :  { %4546 = vmatpush3.msra.mxu0 %v4071_v34  ;;  %v2946_v15 = vsel %vm2886_vm6, %v2881_v60, %v2170_v55  ;;  %v10795_v55 = vld [vmem:[#allocation320_spill] sm:$0xff] }
 0x4aa   :  { %v3812_v17 = vpop.f32.mrf.mxu1  ;;  %4547 = vmatprep.subr.mxu0 %v4086_v33  ;;  %v3332_v44 = vmul.f32 %v3204_v30, %v10795_v55  ;;  %v3208_v30 = vld [vmem:[%s9689_s2 + $0x3f8] sm:$0xff] }
 0x4ab   :  { %v1980_v25 = vpop.permute.xlu1 %1979  ;;  %4548 = vmatpush3.msra.mxu0 %v4070_v13 }
 0x4ac   :  { %v2362_v59 = vpop.permute.xlu0 %2361  ;;  %v9400_v61 = vpop.f32.mrf.mxu1  ;;  %4549 = vmatprep.subr.mxu0 %v4085_v46  ;;  %v2882_v56 = vsel %vm2821_vm5, %v2817_v54, %v1980_v25 }
 0x4ad   :  { %4550 = vmatpush3.msra.mxu0 %v4069_v6  ;;  %v3011_v0 = vsel %vm2951_vm7, %v2946_v15, %v2362_v59 }
 0x4ae   :  { %v3817_v27 = vpop.f32.mrf.mxu1  ;;  %4551 = vmatprep.subr.mxu0 %v4084_v21 }
 0x4af   :  { %v2172_v41 = vpop.permute.xlu1 %2171  ;;  %4552 = vmatpush3.msra.mxu0 %v4068_v42 }
 0x4b0   :  { %v2554_v22 = vpop.permute.xlu0 %2553  ;;  %v9412_v43 = vpop.f32.mrf.mxu1  ;;  %4553 = vmatprep.subr.mxu0 %v4083_v63  ;;  %v2947_v23 = vsel %vm2886_vm6, %v2882_v56, %v2172_v41 }
 0x4b1   :  { %v3076_v36 = vsel %vm3016_vm8, %v3011_v0, %v2554_v22  ;;  %4554 = vmatpush3.msra.mxu0 %v4067_v40 }
 0x4b2   :  { %v3327_v3 = vmul.f32 %v3199_v47, %v3076_v36  ;;  %v3822_v49 = vpop.f32.mrf.mxu1  ;;  %4596 = vmatprep.subr.mxu0 %v10794_v52  ;;  %v3203_v47 = vld [vmem:[%s9689_s2 + $0x3d0] sm:$0xff] }
 0x4b3   :  { %v2364_v19 = vpop.permute.xlu1 %2363 }
 0x4b4   :  { %v1278_v11 = vpop.permute.xlu0 %1277  ;;  %3914 = vmatmul.mubr.f32.gmra.mxu1 %v3327_v3  ;;  %v9422_v53 = vpop.f32.mrf.mxu1  ;;  %v3012_v7 = vsel %vm2951_vm7, %v2947_v23, %v2364_v19  ;;  %v10797_v3 = vld [vmem:[#allocation8_spill] sm:$0xff] }
 0x4b5   :  { %4517 = vmatprep.mubr.msk.f32.mxu1 %vm189_vm0, %v3330_v37  ;;  %v2688_v25 = vsel %vm189_vm0, %v10796_v14, %v1278_v11  ;;  %v3334_v37 = vmul.f32 %v3206_v50, %v10797_v3 }
 0x4b6   :  { %v3827_v10 = vpop.f32.mrf.mxu1 }
 0x4b7   :  { %v2556_v28 = vpop.permute.xlu1 %2555 }
 0x4b8   :  { %v1534_v48 = vpop.permute.xlu0 %1533  ;;  %v3077_v31 = vsel %vm3016_vm8, %v3012_v7, %v2556_v28  ;;  %v9435_v58 = vpop.f32.mrf.mxu1 }
 0x4b9   :  { %v3329_v57 = vmul.f32 %v3201_v1, %v3077_v31  ;;  %v2753_v5 = vsel %vm2691_vm3, %v2688_v25, %v1534_v48  ;;  %v3205_v1 = vld [vmem:[%s9689_s2 + $0x3e0] sm:$0xff] }
 0x4ba   :  { %v3832_v29 = vpop.f32.mrf.mxu1 }
 0x4bb   :  { %v1280_v34 = vpop.permute.xlu1 %1279  ;;  %3919 = vmatmul.mubr.f32.gmra.mxu1 %v3329_v57 }
 0x4bc   :  { %v1790_v39 = vpop.permute.xlu0 %1789  ;;  %v9438_v2 = vpop.f32.mrf.mxu1  ;;  %4518 = vmatprep.mubr.msk.f32.mxu1 %vm189_vm0, %v3332_v44  ;;  %v2689_v49 = vsel %vm189_vm0, %v10798_v24, %v1280_v34  ;;  %v10799_v44 = vld [vmem:[#allocation10_spill] sm:$0xff] }
 0x4bd   :  { %v2818_v21 = vsel %vm2756_vm4, %v2753_v5, %v1790_v39  ;;  %v3336_v29 = vmul.f32 %v3208_v30, %v10799_v44 }
 0x4be   :  { %v3837_v26 = vpop.f32.mrf.mxu1 }
 0x4bf   :  { %v1536_v33 = vpop.permute.xlu1 %1535  ;;  %v10800_v26 = vld [vmem:[#allocation260_spill] sm:$0xff] }
 0x4c0   :  { %v1982_v35 = vpop.permute.xlu0 %1981  ;;  %v9441_v13 = vpop.f32.mrf.mxu1  ;;  %v2754_v19 = vsel %vm2691_vm3, %v2689_v49, %v1536_v33 }
 0x4c1   :  { %v2883_v42 = vsel %vm2821_vm5, %v2818_v21, %v1982_v35 }
 0x4c2   :  { %v3842_v9 = vpop.f32.mrf.mxu1 }
 0x4c3   :  { %v1792_v17 = vpop.permute.xlu1 %1791 }
 0x4c4   :  { %v2174_v20 = vpop.permute.xlu0 %2173  ;;  %v9443_v46 = vpop.f32.mrf.mxu1  ;;  %v2819_v56 = vsel %vm2756_vm4, %v2754_v19, %v1792_v17  ;;  %v4646_v19 = vmov 1983009808  }
 0x4c5   :  { %v2948_v15 = vsel %vm2886_vm6, %v2883_v42, %v2174_v20 }
 0x4c6   :  { %v3847_v59 = vpop.f32.mrf.mxu1 }
 0x4c7   :  { %v1984_v6 = vpop.permute.xlu1 %1983  ;;  %v3207_v59 = vld [vmem:[%s9689_s2 + $0x3f0] sm:$0xff] }
 0x4c8   :  { %v2366_v62 = vpop.permute.xlu0 %2365  ;;  %v9449_v60 = vpop.f32.mrf.mxu1  ;;  %v2884_v23 = vsel %vm2821_vm5, %v2819_v56, %v1984_v6 }
 0x4c9   :  { %v3013_v63 = vsel %vm2951_vm7, %v2948_v15, %v2366_v62 }
 0x4ca   :  { %v3852_v27 = vpop.f32.mrf.mxu1 }
 0x4cb   :  { %v2176_v0 = vpop.permute.xlu1 %2175 }
 0x4cc   :  { %v2558_v41 = vpop.permute.xlu0 %2557  ;;  %v9461_v40 = vpop.f32.mrf.mxu1  ;;  %v2949_v10 = vsel %vm2886_vm6, %v2884_v23, %v2176_v0  ;;  %v10801_v23 = vld [vmem:[#allocation6_spill] sm:$0xff] }
 0x4cd   :  { %v3078_v22 = vsel %vm3016_vm8, %v3013_v63, %v2558_v41 }
 0x4ce   :  { %v3331_v36 = vmul.f32 %v3203_v47, %v3078_v22  ;;  %v3857_v51 = vpop.f32.mrf.mxu1 }
 0x4cf   :  { %v2368_v11 = vpop.permute.xlu1 %2367 }
 0x4d0   :  { %v1282_v54 = vpop.permute.xlu0 %1281  ;;  %3924 = vmatmul.mubr.f32.gmra.mxu1 %v3331_v36  ;;  %v3014_v7 = vsel %vm2951_vm7, %v2949_v10, %v2368_v11  ;;  %v4135_v11 = vunpack.c.l.s4 %v4646_v19 }
 0x4d1   :  { %4519 = vmatprep.mubr.msk.f32.mxu1 %vm189_vm0, %v3334_v37  ;;  %v2690_v33 = vsel %vm189_vm0, %v10800_v26, %v1282_v54 }
 0x4d2   :  { %v4136_v54 = vunpack.c.0.s8 %v4135_v11 }
 0x4d3   :  { %v2560_v28 = vpop.permute.xlu1 %2559  ;;  %v9479_v57 = vpop.f32.mrf.mxu1 }
 0x4d4   :  { %v1538_v48 = vpop.permute.xlu0 %1537  ;;  %v3079_v31 = vsel %vm3016_vm8, %v3014_v7, %v2560_v28  ;;  %v4139_v10 = vsub.s32 %v4136_v54, %v10801_v23  ;;  %v3841_v23 = vadd.f32 %v9172_v12, %v9441_v13  ;;  %v3998_v13 = vld [vmem:[%s9688_s1 + $0x1d8] sm:$0xff] }
 0x4d5   :  { %v3333_v55 = vmul.f32 %v3205_v1, %v3079_v31  ;;  %v3862_v34 = vpop.f32.mrf.mxu1  ;;  %v2755_v35 = vsel %vm2691_vm3, %v2690_v33, %v1538_v48  ;;  %v4131_v1 = vld [vmem:[%s9690_s3] sm:$0xff] }
 0x4d6   :  { %v4140_v7 = vrot.slane %v4131_v1, %v4139_v10  ;;  %v4133_v28 = vcombine.high %v4131_v1, %v4131_v1  ;;  %v3983_v1 = vld [vmem:[%s9688_s1 + $0x160] sm:$0xff] }
 0x4d7   :  { %3929 = vmatmul.mubr.f32.gmra.mxu1 %v3333_v55  ;;  %v2178_v9 = vpop.permute.xlu1 %2177 }
 0x4d8   :  { %v1794_v39 = vpop.permute.xlu0 %1793  ;;  %4520 = vmatprep.mubr.msk.f32.mxu1 %vm189_vm0, %v3336_v29  ;;  %v4148_v48 = vcombine.high %v4140_v7, %v4140_v7  ;;  %v9514_v31 = vrot.slane %v4133_v28, %v4139_v10 }
 0x4d9   :  { %v2820_v17 = vsel %vm2756_vm4, %v2755_v35, %v1794_v39 }
 0x4da   :  { %4218 = vmatprep.mubr.f32.mxu0 %v4148_v48  ;;  %v4149_v55 = vcombine.high %v9514_v31, %v9514_v31  ;;  %v3836_v48 = vadd.f32 %v9172_v12, %v9438_v2 }
 0x4db   :  { %v2562_v6 = vpop.permute.xlu1 %2561  ;;  %4219 = vmatmul.mubr.f32.vlgmr.msra.gmra.mxu0 %v4140_v7 }
 0x4dc   :  { %v1986_v20 = vpop.permute.xlu0 %1985  ;;  %4600 = vmatprep.mubr.msk.f32.mxu0 %vm4647_vm9, %v10794_v52 }
 0x4dd   :  { %v2885_v14 = vsel %vm2821_vm5, %v2820_v17, %v1986_v20 }
 0x4de   :  { %v2950_v25 = vsel %vm2886_vm6, %v2885_v14, %v2178_v9 }
 0x4e0   :  { %v2370_v5 = vpop.permute.xlu0 %2369 }
 0x4e1   :  { %v3015_v62 = vsel %vm2951_vm7, %v2950_v25, %v2370_v5  ;;  %v3986_v5 = vld [vmem:[%s9688_s1 + $0x178] sm:$0xff] }
 0x4e2   :  { %v3080_v21 = vsel %vm3016_vm8, %v3015_v62, %v2562_v6  ;;  %v3851_v62 = vadd.f32 %v9172_v12, %v9449_v60  ;;  %v3846_v60 = vadd.f32 %v9172_v12, %v9443_v46  ;;  %v3999_v46 = vld [vmem:[%s9688_s1 + $0x1e0] sm:$0xff] }
 0x4e3   :  { %v3335_v42 = vmul.f32 %v3207_v59, %v3080_v21  ;;  %v3856_v59 = vadd.f32 %v9172_v12, %v9461_v40  ;;  %v4001_v21 = vld [vmem:[%s9688_s1 + $0x1f0] sm:$0xff] }
 0x4e4   :  { %v3985_v40 = vld [vmem:[%s9688_s1 + $0x170] sm:$0xff] }
 0x4e5   :  { %3934 = vmatmul.mubr.f32.gmra.mxu1 %v3335_v42  ;;  %v4049_v10 = vadd.f32 %v3985_v40, %v3851_v62  ;;  %v3996_v62 = vld [vmem:[%s9688_s1 + $0x1c8] sm:$0xff] }
 0x4e6   :  { %4288 = vmatprep.mubr.f32.mxu1 %v4149_v55 }
 0x4e7   :  { %v4113_v2 = vmax.f32 %v4049_v10, 0.0 }
 0x4e8   :  { %v9494_v15 = vpop.f32.mrf.mxu1 }
 0x4ea   :  { %v3867_v27 = vpop.f32.mrf.mxu1 }
 0x4eb   :  { %v4002_v27 = vld [vmem:[%s9688_s1 + $0x1f8] sm:$0xff] }
 0x4ef   :  { %v9496_v47 = vpop.f32.mrf.mxu1 }
 0x4f1   :  { %v3872_v50 = vpop.f32.mrf.mxu1 }
 0x504   :  { %v9498_v63 = vpop.f32.mrf.mxu1 }
 0x506   :  { %v3877_v0 = vpop.f32.mrf.mxu1 }
 0x50b   :  { %v9500_v41 = vpop.f32.mrf.mxu1 }
 0x50d   :  { %v3882_v22 = vpop.f32.mrf.mxu1 }
 0x50e   :  { %v4050_v22 = vadd.f32 %v3986_v5, %v3856_v59  ;;  %v3826_v5 = vadd.f32 %v9172_v12, %v9422_v53  ;;  %v3821_v53 = vadd.f32 %v9172_v12, %v9412_v43  ;;  %v3816_v43 = vadd.f32 %v9172_v12, %v9400_v61 }
 0x50f   :  { %v3811_v61 = vadd.f32 %v9172_v12, %v9388_v8  ;;  %v3806_v8 = vadd.f32 %v9172_v12, %v9366_v16  ;;  %v3801_v16 = vadd.f32 %v9172_v12, %v9341_v4  ;;  %v3796_v4 = vadd.f32 %v9172_v12, %v9314_v18 }
 0x510   :  { %v3791_v18 = vadd.f32 %v9172_v12, %v9278_v45  ;;  %v3786_v45 = vadd.f32 %v9172_v12, %v9247_v38  ;;  %v3781_v38 = vadd.f32 %v9172_v12, %v9219_v32 }
 0x520   :  { %v9502_v36 = vpop.f32.mrf.mxu1 }
 0x522   :  { %v3887_v3 = vpop.f32.mrf.mxu1 }
 0x523   :  { %v4000_v3 = vld [vmem:[%s9688_s1 + $0x1e8] sm:$0xff] }
 0x527   :  { %v9504_v37 = vpop.f32.mrf.mxu1 }
 0x529   :  { %v3892_v24 = vpop.f32.mrf.mxu1 }
 0x53c   :  { %v9506_v49 = vpop.f32.mrf.mxu1 }
 0x53e   :  { %v3897_v51 = vpop.f32.mrf.mxu1 }
 0x53f   :  { %v3984_v51 = vld [vmem:[%s9688_s1 + $0x168] sm:$0xff] }
 0x540   :  { %v4048_v55 = vadd.f32 %v3984_v51, %v3846_v60  ;;  %v3979_v60 = vld [vmem:[%s9688_s1 + $0x140] sm:$0xff] }
 0x541   :  { %v4043_v10 = vadd.f32 %v3979_v60, %v3821_v53 }
 0x543   :  { %v9508_v56 = vpop.f32.mrf.mxu1 }
 0x545   :  { %v3902_v30 = vpop.f32.mrf.mxu1 }
 0x558   :  { %v3905_v44 = vpop.f32.mrf.mxu1 }
 0x55a   :  { %v3907_v29 = vpop.f32.mrf.mxu1 }
 0x55b   :  { %v4114_v29 = vmax.f32 %v4050_v22, 0.0 }
 0x55f   :  { %v3910_v34 = vpop.f32.mrf.mxu1 }
 0x561   :  { %v3912_v39 = vpop.f32.mrf.mxu1 }
 0x562   :  { %v3982_v39 = vld [vmem:[%s9688_s1 + $0x158] sm:$0xff] }
 0x574   :  { %v3915_v26 = vpop.f32.mrf.mxu1 }
 0x575   :  { %v3916_v30 = vadd.f32 %v9172_v12, %v3915_v26  ;;  %v3831_v26 = vadd.f32 %v9172_v12, %v9435_v58  ;;  %v4046_v58 = vadd.f32 %v3982_v39, %v3836_v48 }
 0x576   :  { %v3917_v33 = vpop.f32.mrf.mxu1 }
 0x577   :  { %v3911_v33 = vadd.f32 %v9172_v12, %v3910_v34  ;;  %v4062_v34 = vadd.f32 %v3998_v13, %v3916_v30  ;;  %v4110_v51 = vmax.f32 %v4046_v58, 0.0  ;;  %v3977_v30 = vld [vmem:[%s9688_s1 + $0x130] sm:$0xff]  ;;  %v3976_v13 = vld [vmem:[%s9688_s1 + $0x128] sm:$0xff] }
 0x57b   :  { %v3920_v35 = vpop.f32.mrf.mxu1 }
 0x57c   :  { %v3921_v19 = vadd.f32 %v9172_v12, %v3920_v35 }
 0x57d   :  { %v3922_v9 = vpop.f32.mrf.mxu1 }
 0x57e   :  { %v4063_v35 = vadd.f32 %v3999_v46, %v3921_v19  ;;  %v3994_v19 = vld [vmem:[%s9688_s1 + $0x1b8] sm:$0xff] }
 0x590   :  { %v3925_v17 = vpop.f32.mrf.mxu1 }
 0x591   :  { %v3926_v50 = vadd.f32 %v9172_v12, %v3925_v17  ;;  %v4047_v17 = vadd.f32 %v3983_v1, %v3841_v23  ;;  %v3993_v1 = vld [vmem:[%s9688_s1 + $0x1b0] sm:$0xff] }
 0x592   :  { %v3927_v20 = vpop.f32.mrf.mxu1 }
 0x593   :  { %v4064_v7 = vadd.f32 %v4000_v3, %v3926_v50  ;;  %v3997_v20 = vld [vmem:[%s9688_s1 + $0x1d0] sm:$0xff]  ;;  %v4111_v50 = vmax.f32 %v4047_v17, 0.0  ;;  %v4126_v3 = vmax.f32 %v4062_v34, 0.0  ;;  %v3975_v17 = vld [vmem:[%s9688_s1 + $0x120] sm:$0xff]  ;;  %v3990_v34 = vld [vmem:[%s9688_s1 + $0x198] sm:$0xff] }
 0x595   :  { %v4128_v59 = vmax.f32 %v4064_v7, 0.0 }
 0x597   :  { %v3930_v14 = vpop.f32.mrf.mxu1 }
 0x598   :  { %v3931_v6 = vadd.f32 %v9172_v12, %v3930_v14  ;;  %v3981_v14 = vld [vmem:[%s9688_s1 + $0x150] sm:$0xff] }
 0x599   :  { %v3932_v25 = vpop.f32.mrf.mxu1  ;;  %v4045_v40 = vadd.f32 %v3981_v14, %v3831_v26  ;;  %v3991_v26 = vld [vmem:[%s9688_s1 + $0x1a0] sm:$0xff]  ;;  %v4040_v14 = vadd.f32 %v3976_v13, %v3806_v8 }
 0x59a   :  { %v4065_v11 = vadd.f32 %v4001_v21, %v3931_v6  ;;  %v3906_v25 = vadd.f32 %v9172_v12, %v3905_v44  ;;  %v4112_v6 = vmax.f32 %v4048_v55, 0.0  ;;  %v3980_v21 = vld [vmem:[%s9688_s1 + $0x148] sm:$0xff]  ;;  %v3901_v44 = vadd.f32 %v9172_v12, %v9508_v56 }
 0x59b   :  { %v3896_v56 = vadd.f32 %v9172_v12, %v9506_v49  ;;  %v3891_v49 = vadd.f32 %v9172_v12, %v9504_v37  ;;  %v4109_v46 = vmax.f32 %v4045_v40, 0.0  ;;  %v3886_v37 = vadd.f32 %v9172_v12, %v9502_v36 }
 0x59c   :  { %v4129_v9 = vmax.f32 %v4065_v11, 0.0  ;;  %v4060_v22 = vadd.f32 %v3996_v62, %v3906_v25  ;;  %v3978_v11 = vld [vmem:[%s9688_s1 + $0x138] sm:$0xff]  ;;  %v3881_v36 = vadd.f32 %v9172_v12, %v9500_v41  ;;  %v3876_v41 = vadd.f32 %v9172_v12, %v9498_v63 }
 0x59d   :  { %v4058_v7 = vadd.f32 %v3994_v19, %v3896_v56  ;;  %v4042_v48 = vadd.f32 %v3978_v11, %v3816_v43  ;;  %v4057_v39 = vadd.f32 %v3993_v1, %v3891_v49  ;;  %v3871_v63 = vadd.f32 %v9172_v12, %v9496_v47  ;;  %v3987_v43 = vld [vmem:[%s9688_s1 + $0x180] sm:$0xff]  ;;  %v4295_v1 = vld [vmem:[%s9695_s8 + $0x8] sm:$0xff] }
 0x59e   :  { %v3866_v47 = vadd.f32 %v9172_v12, %v9494_v15  ;;  %v4104_v40 = vmax.f32 %v4040_v14, 0.0  ;;  %v3861_v15 = vadd.f32 %v9172_v12, %v9479_v57  ;;  %4597 = vmatpush3.msra.mxu0 %v4295_v1 }
 0x59f   :  { %v4106_v25 = vmax.f32 %v4042_v48, 0.0  ;;  %v4121_v58 = vmax.f32 %v4057_v39, 0.0  ;;  %4598 = vmatprep.subr.mxu0 %v10794_v52 }
 0x5a0   :  { %v4051_v49 = vadd.f32 %v3987_v43, %v3861_v15 }
 0x5a5   :  { %v3935_v42 = vpop.f32.mrf.mxu1 }
 0x5a6   :  { %v3936_v0 = vadd.f32 %v9172_v12, %v3935_v42  ;;  %v4061_v42 = vadd.f32 %v3997_v20, %v3911_v33  ;;  %v4122_v20 = vmax.f32 %v4058_v7, 0.0 }
 0x5a7   :  { %v3937_v24 = vpop.f32.mrf.mxu1 }
 0x5a8   :  { %v4066_v54 = vadd.f32 %v4002_v27, %v3936_v0  ;;  %v4127_v27 = vmax.f32 %v4063_v35, 0.0  ;;  %v3995_v0 = vld [vmem:[%s9688_s1 + $0x1c0] sm:$0xff]  ;;  %v4044_v24 = vadd.f32 %v3980_v21, %v3826_v5  ;;  %v4125_v23 = vmax.f32 %v4061_v42, 0.0  ;;  %v3989_v21 = vld [vmem:[%s9688_s1 + $0x190] sm:$0xff] }
 0x5a9   :  { %v4041_v35 = vadd.f32 %v3977_v30, %v3811_v61  ;;  %v4055_v5 = vadd.f32 %v3991_v26, %v3881_v36  ;;  %v4054_v42 = vadd.f32 %v3990_v34, %v3876_v41  ;;  %v4053_v60 = vadd.f32 %v3989_v21, %v3871_v63  ;;  %v4294_v30 = vld [vmem:[%s9695_s8] sm:$0xff]  ;;  %s4648_s8 = smov [#allocation2]  }
 0x5aa   :  { %v4130_v28 = vmax.f32 %v4066_v54, 0.0  ;;  %v4059_v54 = vadd.f32 %v3995_v0, %v3901_v44  ;;  %v4108_v55 = vmax.f32 %v4044_v24, 0.0  ;;  %v3973_v44 = vld [vmem:[%s9688_s1 + $0x110] sm:$0xff]  ;;  %v3972_v0 = vld [vmem:[%s9688_s1 + $0x108] sm:$0xff]  ;;  %v3971_v24 = vld [vmem:[%s9688_s1 + $0x100] sm:$0xff]  ;;  %4599 = vmatpush3.msra.mxu0 %v4294_v30  ;;  %s4383_s14 = sshll.u32 %s4648_s8, 4  ;;  %s4384_s14 = int_to_ptr.vmem [resolvable:$true] %s4383_s14 }
 0x5ab   :  { %v4105_v62 = vmax.f32 %v4041_v35, 0.0  ;;  %v4119_v56 = vmax.f32 %v4055_v5, 0.0  ;;  %v4118_v19 = vmax.f32 %v4054_v42, 0.0  ;;  %v4036_v57 = vadd.f32 %v3972_v0, %v3786_v45  ;;  %s4616_s15 = scalar_lea.vmem %s4384_s14, 32  ;;  %p4621_p1 = scmp.lt.s32.totalorder %s4384_s14, %s4384_s14 }
 0x5ac   :  { %4558 = vmatprep.subr.mxu1 %v4130_v28  ;;  %v4124_v28 = vmax.f32 %v4060_v22, 0.0  ;;  %v4123_v33 = vmax.f32 %v4059_v54, 0.0  ;;  %v4037_v22 = vadd.f32 %v3973_v44, %v3791_v18  ;;  %v4117_v54 = vmax.f32 %v4053_v60, 0.0  ;;  %p4617_p0 = scmp.ne.s32.totalorder %s4384_s14, %s4616_s15  ;;  %p4622_p2 = scmp.lt.s32.totalorder %s4616_s15, %s4616_s15 }
 0x5ad   :  { %4559 = vmatpush3.msra.mxu1 %v4114_v29  ;;  %v3992_v29 = vld [vmem:[%s9688_s1 + $0x1a8] sm:$0xff]  ;;  %v4035_v12 = vadd.f32 %v3971_v24, %v3781_v38  ;;  %v4100_v61 = vmax.f32 %v4036_v57, 0.0 }
 0x5ae   :  { %4560 = vmatprep.subr.mxu1 %v4129_v9  ;;  %v4107_v9 = vmax.f32 %v4043_v10, 0.0  ;;  %v4101_v32 = vmax.f32 %v4037_v22, 0.0  ;;  %v4115_v10 = vmax.f32 %v4051_v49, 0.0  ;;  %p4623_p3 = por %p4622_p2, %p4621_p1 }
 0x5af   :  { %4561 = vmatpush3.msra.mxu1 %v4113_v2  ;;  %v4056_v2 = vadd.f32 %v3992_v29, %v3886_v37  ;;  %v4555_v37 = vpop.f32.mrf.mxu0  ;;  %v4521_v29 = vld [vmem:[%s9696_s9] ss:$0 sm:$0xff] }
 0x5b0   :  { %4562 = vmatprep.subr.mxu1 %v4128_v59  ;;  %v3974_v59 = vld [vmem:[%s9688_s1 + $0x118] sm:$0xff]  ;;  %p4624_p4 = pnand %p4623_p3, %p4617_p0 }
 0x5b1   :  { %4563 = vmatpush3.msra.mxu1 %v4112_v6  ;;  %v4039_v6 = vadd.f32 %v3975_v17, %v3801_v16  ;;  %v4038_v53 = vadd.f32 %v3974_v59, %v3796_v4 }
 0x5b2   :  { %4564 = vmatprep.subr.mxu1 %v4127_v27  ;;  %v4120_v27 = vmax.f32 %v4056_v2, 0.0 }
 0x5b3   :  { %4565 = vmatpush3.msra.mxu1 %v4111_v50  ;;  %v3988_v50 = vld [vmem:[%s9688_s1 + $0x188] sm:$0xff]  ;;  %v4102_v11 = vmax.f32 %v4038_v53, 0.0 }
 0x5b4   :  { %4566 = vmatprep.subr.mxu1 %v4126_v3  ;;  %v4103_v3 = vmax.f32 %v4039_v6, 0.0 }
 0x5b5   :  { %4567 = vmatpush3.msra.mxu1 %v4110_v51  ;;  %v4052_v51 = vadd.f32 %v3988_v50, %v3866_v47 }
 0x5b6   :  { %4568 = vmatprep.subr.mxu1 %v4125_v23 }
 0x5b7   :  { %4569 = vmatpush3.msra.mxu1 %v4109_v46  ;;  %v4116_v23 = vmax.f32 %v4052_v51, 0.0  ;;  %v4099_v46 = vmax.f32 %v4035_v12, 0.0 }
 0x5b8   :  { %4570 = vmatprep.subr.mxu1 %v4124_v28  ;;  %v4556_v28 = vpop.f32.mrf.mxu0 }
 0x5b9   :  { %4571 = vmatpush3.msra.mxu1 %v4108_v55 }
 0x5ba   :  { %4572 = vmatprep.subr.mxu1 %v4123_v33 }
 0x5bb   :  { %4573 = vmatpush3.msra.mxu1 %v4107_v9 }
 0x5bc   :  { %4574 = vmatprep.subr.mxu1 %v4122_v20 }
 0x5bd   :  { %4575 = vmatpush3.msra.mxu1 %v4106_v25 }
 0x5be   :  { %4576 = vmatprep.subr.mxu1 %v4121_v58 }
 0x5bf   :  { %4577 = vmatpush3.msra.mxu1 %v4105_v62 }
 0x5c0   :  { %4578 = vmatprep.subr.mxu1 %v4120_v27 }
 0x5c1   :  { %4579 = vmatpush3.msra.mxu1 %v4104_v40 }
 0x5c2   :  { %4580 = vmatprep.subr.mxu1 %v4119_v56 }
 0x5c3   :  { %4581 = vmatpush3.msra.mxu1 %v4103_v3 }
 0x5c4   :  { %4582 = vmatprep.subr.mxu1 %v4118_v19 }
 0x5c5   :  { %4583 = vmatpush3.msra.mxu1 %v4102_v11 }
 0x5c6   :  { %4584 = vmatprep.subr.mxu1 %v4117_v54 }
 0x5c7   :  { %4585 = vmatpush3.msra.mxu1 %v4101_v32 }
 0x5c8   :  { %4586 = vmatprep.subr.mxu1 %v4116_v23 }
 0x5c9   :  { %4587 = vmatpush3.msra.mxu1 %v4100_v61 }
 0x5ca   :  { %4588 = vmatprep.subr.mxu1 %v4115_v10 }
 0x5cb   :  { %4589 = vmatpush3.msra.mxu1 %v4099_v46 }
 0x5cc   :  { %4289 = vmatmul.mubr.f32.vlgmr.msra.gmra.mxu1 %v9514_v31  ;;  %v4557_v31 = vadd.f32 %v4556_v28, %v4555_v37 }
 0x68c   :  { %v4590_v7 = vpop.f32.mrf.mxu1 }
 0x68e   :  { %v4591_v8 = vpop.f32.mrf.mxu1 }
 0x68f   :  { %v4592_v48 = vadd.f32 %v4591_v8, %v4590_v7 }
 0x691   :  { %v4291_v55 = vadd.f32 %v4592_v48, %v4557_v31 }
 0x693   :  { %4601 = vmatmul.mubr.msk.f32.vlgmr.msra.gmra.mxu0 %vm189_vm0, %v4291_v55 }
 0x753   :  { %v4372_v13 = vpop.f32.mrf.mxu0 }
 0x754   :  { %v4373_v36 = vadd.f32 %v4521_v29, %v4372_v13 }
 0x755   :  { %v4602_v52 = vpop.f32.mrf.mxu0 }
 0x756   :  { %4376 = vst [vmem:[#allocation2] sm:$0x3] %v4373_v36 }
 0x757   :  { %4627 = shalt.err (!%p4624_p4)
}
 0x758   :  { %4386 = dma.vmem_to_hbm [thread:$0]  %s4384_s14, 32, %s9697_s10, [#allocation3]  }
 0x759   :  { %4636 = dma.done.wait [#allocation3], 32  }
 0x75a   :  { %4637 = vsyncadd [#allocation3], 4294967264 }
 0x75b   :  { %4390 = vsyncpa [#allocation3], 1 }

</bundles_post_ra>
